<compile_context>
chip_gen: v7x
topology: tpu7x:2x2x1
jax: 0.10.0
libtpu: 0.0.40
codegen_flags: <defaults>
</compile_context>

<pallas_src>
import functools
import math

import numpy as np

import jax
import jax.numpy as jnp
from jax.experimental import pallas as pl
from jax.experimental.pallas import tpu as pltpu


# ----------------------------------------------------------------------------
# Conv 3x3 / stride 2 / pad 1 + bias + ReLU, one pallas_call per layer.
# ----------------------------------------------------------------------------
def _pick_th(ho, wo, max_rows=640):
    """Largest output-row slab th | ho with th*wo <= max_rows (and 8-aligned)."""
    if ho * wo <= max_rows:
        return ho
    for th in range(ho, 0, -1):
        if ho % th == 0 and th * wo <= max_rows and (th * wo) % 8 == 0:
            return th
    return ho


def _conv3x3s2_kernel(xe_ref, xo_ref, wk_ref, b_ref, o_ref, *, th, wo, nh):
    """One image, one slab of `th` output rows.

    xe_ref, xo_ref : (1, (Ho+1)*Wo, 3*Cin)  even / odd padded input rows with the
                     three kw taps pre-concatenated along channels (bf16).
    wk_ref         : (3, 3*Cin, Cout)       per-kh weight matrices (bf16).
    b_ref          : (1, Cout)              bias (f32).
    o_ref          : (1, th*Wo, Cout)       output slab (bf16).
    """
    rows = th * wo
    if nh == 1:
        s0 = 0
    else:
        s0 = pl.program_id(1) * rows
        if rows % 8 == 0:
            s0 = pl.multiple_of(s0, 8)
    # kh=0 -> even padded rows, kh=1 -> odd rows, kh=2 -> even rows shifted by
    # one output row (= +Wo flattened rows).
    lhs0 = xe_ref[0, pl.ds(s0, rows), :]
    lhs1 = xo_ref[0, pl.ds(s0, rows), :]
    lhs2 = xe_ref[0, pl.ds(s0 + wo, rows), :]
    acc = jnp.dot(lhs0, wk_ref[0], preferred_element_type=jnp.float32)
    acc = acc + jnp.dot(lhs1, wk_ref[1], preferred_element_type=jnp.float32)
    acc = acc + jnp.dot(lhs2, wk_ref[2], preferred_element_type=jnp.float32)
    y = jnp.maximum(acc + b_ref[...], 0.0)
    o_ref[0] = y.astype(o_ref.dtype)


def conv3x3s2_relu(x, wk, b):
    """x: (B, H, W, Cin) bf16 NHWC -> (B, H//2, W//2, Cout) bf16 (ReLU fused)."""
    B, H, W, C = x.shape
    Ho, Wo = H // 2, W // 2
    K3 = 3 * C
    Cout = wk.shape[-1]
    xp = jnp.pad(x, ((0, 0), (1, 1), (1, 1), (0, 0)))
    # xrow[b, h, wo, kw*C + c] = xp[b, h, 2*wo + kw, c]
    xrow = jnp.concatenate(
        [xp[:, :, kw:kw + 2 * Wo:2, :] for kw in range(3)], axis=-1)
    xe = xrow[:, 0::2].reshape(B, (Ho + 1) * Wo, K3)   # even padded rows
    xo = xrow[:, 1::2].reshape(B, (Ho + 1) * Wo, K3)   # odd padded rows

    th = _pick_th(Ho, Wo)
    nh = Ho // th
    rows = th * Wo
    kernel = functools.partial(_conv3x3s2_kernel, th=th, wo=Wo, nh=nh)
    out = pl.pallas_call(
        kernel,
        out_shape=jax.ShapeDtypeStruct((B, Ho * Wo, Cout), jnp.bfloat16),
        grid=(B, nh),
        in_specs=[
            pl.BlockSpec((1, (Ho + 1) * Wo, K3), lambda bi, hi: (bi, 0, 0)),
            pl.BlockSpec((1, (Ho + 1) * Wo, K3), lambda bi, hi: (bi, 0, 0)),
            pl.BlockSpec((3, K3, Cout), lambda bi, hi: (0, 0, 0)),
            pl.BlockSpec((1, Cout), lambda bi, hi: (0, 0)),
        ],
        out_specs=pl.BlockSpec((1, rows, Cout), lambda bi, hi: (bi, hi, 0)),
        compiler_params=pltpu.CompilerParams(
            dimension_semantics=("parallel", "parallel")),
    )(xe, xo, wk, b)
    return out.reshape(B, Ho, Wo, Cout)


# ----------------------------------------------------------------------------
# Fused FC head: linear -> actor_linear -> softmax in one pallas_call.
# ----------------------------------------------------------------------------
def _head_kernel(x_ref, w1_ref, b1_ref, w2_ref, b2_ref, o_ref):
    # Note: the PyTorch forward has NO nonlinearity between linear and actor_linear.
    z = jnp.dot(x_ref[...], w1_ref[...], preferred_element_type=jnp.float32)
    z = z + b1_ref[...]
    logits = jnp.dot(z.astype(jnp.bfloat16), w2_ref[...],
                     preferred_element_type=jnp.float32) + b2_ref[...]
    m = jnp.max(logits, axis=-1, keepdims=True)
    e = jnp.exp(logits - m)
    denom = jnp.sum(e, axis=-1, keepdims=True)
    o_ref[...] = (e * pl.reciprocal(denom, approx=True)).astype(o_ref.dtype)


def actor_head(flat, w1, b1, w2, b2):
    B, K = flat.shape
    H1 = w1.shape[1]
    A = w2.shape[1]
    return pl.pallas_call(
        _head_kernel,
        out_shape=jax.ShapeDtypeStruct((B, A), jnp.float32),
        grid=(1,),
        in_specs=[
            pl.BlockSpec((B, K), lambda i: (0, 0)),
            pl.BlockSpec((K, H1), lambda i: (0, 0)),
            pl.BlockSpec((1, H1), lambda i: (0, 0)),
            pl.BlockSpec((H1, A), lambda i: (0, 0)),
            pl.BlockSpec((1, A), lambda i: (0, 0)),
        ],
        out_specs=pl.BlockSpec((B, A), lambda i: (0, 0)),
        compiler_params=pltpu.CompilerParams(
            dimension_semantics=("arbitrary",)),
    )(flat, w1, b1, w2, b2)


# ----------------------------------------------------------------------------
# Parameter init (orthogonal, gain=sqrt(2), zero bias — mirrors the PyTorch init)
# ----------------------------------------------------------------------------
def orthogonal_init(key, shape, gain):
    rows = shape[0]
    cols = int(math.prod(shape[1:]))
    a = jax.random.normal(key, (max(rows, cols), min(rows, cols)), jnp.float32)
    q, r = jnp.linalg.qr(a)
    q = q * jnp.sign(jnp.diagonal(r))[None, :]
    if rows < cols:
        q = q.T
    return (gain * q[:rows, :cols]).reshape(shape).astype(jnp.float32)


def init_params(key, num_inputs, num_actions):
    gain = math.sqrt(2.0)
    keys = jax.random.split(key, 6)
    p = {}
    in_c = num_inputs
    for l in range(4):
        p[f"conv{l + 1}_w"] = orthogonal_init(keys[l], (32, in_c, 3, 3), gain)
        p[f"conv{l + 1}_b"] = jnp.zeros((32,), jnp.float32)
        in_c = 32
    p["linear_w"] = orthogonal_init(keys[4], (256, 32 * 6 * 6), gain)
    p["linear_b"] = jnp.zeros((256,), jnp.float32)
    p["actor_w"] = orthogonal_init(keys[5], (num_actions, 256), gain)
    p["actor_b"] = jnp.zeros((num_actions,), jnp.float32)
    return p


def prepare_params(params):
    """One-time repack of PyTorch-layout weights into kernel layout (bf16)."""
    prep = {}
    for l in range(4):
        w = params[f"conv{l + 1}_w"]          # (Cout=32, Cin, 3, 3)
        cin = w.shape[1]
        # wk[kh][kw*Cin + ci, co] = w[co, ci, kh, kw]
        wk = jnp.stack(
            [w[:, :, kh, :].transpose(2, 1, 0).reshape(3 * cin, 32)
             for kh in range(3)], axis=0).astype(jnp.bfloat16)
        prep[f"conv{l + 1}_wk"] = wk
        prep[f"conv{l + 1}_b"] = params[f"conv{l + 1}_b"].reshape(1, 32).astype(jnp.float32)
    # First FC: permute columns so the NHWC (H,W,C) flatten matches torch's
    # NCHW (C,H,W) .view(B, -1).
    hh, ww, cc = np.unravel_index(np.arange(6 * 6 * 32), (6, 6, 32))
    perm = cc * 36 + hh * 6 + ww
    prep["w1"] = params["linear_w"][:, perm].T.astype(jnp.bfloat16)      # (1152, 256)
    prep["b1"] = params["linear_b"].reshape(1, -1).astype(jnp.float32)
    prep["w2"] = params["actor_w"].T.astype(jnp.bfloat16)                # (256, A)
    prep["b2"] = params["actor_b"].reshape(1, -1).astype(jnp.float32)
    return prep


# ----------------------------------------------------------------------------
# Forward pass (Pallas) and pure-JAX f32 reference.
# ----------------------------------------------------------------------------
def actor_net_forward(x, prep):
    """x: (B, num_inputs, 96, 96) NCHW f32 -> (B, num_actions) softmax probs."""
    B = x.shape[0]
    h = jnp.transpose(x.astype(jnp.bfloat16), (0, 2, 3, 1))   # one NCHW->NHWC
    for l in range(4):
        h = conv3x3s2_relu(h, prep[f"conv{l + 1}_wk"], prep[f"conv{l + 1}_b"])
    flat = h.reshape(B, -1)                                    # (B, 6*6*32), HWC order
    return actor_head(flat, prep["w1"], prep["b1"], prep["w2"], prep["b2"])


def reference_forward(x, params):
    h = x.astype(jnp.float32)
    for l in range(4):
        w = params[f"conv{l + 1}_w"]
        b = params[f"conv{l + 1}_b"]
        h = jax.lax.conv_general_dilated(
            h, w, window_strides=(2, 2), padding=((1, 1), (1, 1)),
            dimension_numbers=("NCHW", "OIHW", "NCHW"))
        h = jax.nn.relu(h + b.reshape(1, -1, 1, 1))
    flat = h.reshape(h.shape[0], -1)
    z = flat @ params["linear_w"].T + params["linear_b"]
    logits = z @ params["actor_w"].T + params["actor_b"]
    return jax.nn.softmax(logits, axis=-1)


if __name__ == "__main__":
    num_inputs = 4
    num_actions = 8
    batch = 2
    # 96x96 input -> 48 -> 24 -> 12 -> 6, matching Linear(32*6*6, 256).
    key = jax.random.PRNGKey(0)
    k_x, k_p = jax.random.split(key)
    x = jax.random.normal(k_x, (batch, num_inputs, 96, 96), jnp.float32)
    params = init_params(k_p, num_inputs, num_actions)
    prep = prepare_params(params)

    fwd = jax.jit(actor_net_forward)
    out = jax.block_until_ready(fwd(x, prep))

    assert out.shape == (batch, num_actions)
    row_sums = jnp.sum(out, axis=1)
    assert bool(jnp.all(jnp.abs(row_sums - 1.0) < 2e-2)), row_sums
    ref = reference_forward(x, params)
    max_err = float(jnp.max(jnp.abs(out.astype(jnp.float32) - ref)))
    assert max_err < 1e-1, max_err   # loose: bf16 matmuls vs f32 reference
    print("KERNEL_OK")
</pallas_src>

<mosaic_0001>
module attributes {stable_mosaic.version = 11 : i64} {
  func.func @_conv3x3s2_kernel(%arg0: i32, %arg1: i32, %arg2: memref<1x2352x12xbf16, #tpu.memory_space<vmem>>, %arg3: memref<1x2352x12xbf16, #tpu.memory_space<vmem>>, %arg4: memref<3x12x32xbf16, #tpu.memory_space<vmem>>, %arg5: memref<1x32xf32, #tpu.memory_space<vmem>>, %arg6: memref<1x576x32xbf16, #tpu.memory_space<vmem>>) attributes {dimension_semantics = [#tpu.dimension_semantics<parallel>, #tpu.dimension_semantics<parallel>], iteration_bounds = array<i64: 2, 4>, scalar_prefetch = 0 : i64, scratch_operands = 0 : i64, tpu.core_type = #tpu.core_type<tc>, window_params = [{transform_indices = @transform_0, window_bounds = array<i64: 1, 2352, 12>}, {transform_indices = @transform_1, window_bounds = array<i64: 1, 2352, 12>}, {pipeline_mode = #tpu.pipeline_mode<synchronous>, transform_indices = @transform_2, window_bounds = array<i64: 3, 12, 32>}, {pipeline_mode = #tpu.pipeline_mode<synchronous>, transform_indices = @transform_3, window_bounds = array<i64: 1, 32>}, {transform_indices = @transform_4, window_bounds = array<i64: 1, 576, 32>}]} {
    %c576_i32 = arith.constant 576 : i32
    %0 = arith.muli %arg1, %c576_i32 : i32
    %1 = tpu.assume_multiple %0, 8 : i32
    %c0 = arith.constant 0 : index
    %2 = arith.index_cast %1 : i32 to index
    %c0_0 = arith.constant 0 : index
    %3 = vector.load %arg2[%c0, %2, %c0_0] : memref<1x2352x12xbf16, #tpu.memory_space<vmem>>, vector<1x576x12xbf16>
    %4 = vector.shape_cast %3 : vector<1x576x12xbf16> to vector<576x12xbf16>
    %c0_1 = arith.constant 0 : index
    %5 = arith.index_cast %1 : i32 to index
    %c0_2 = arith.constant 0 : index
    %6 = vector.load %arg3[%c0_1, %5, %c0_2] : memref<1x2352x12xbf16, #tpu.memory_space<vmem>>, vector<1x576x12xbf16>
    %7 = vector.shape_cast %6 : vector<1x576x12xbf16> to vector<576x12xbf16>
    %c48_i32 = arith.constant 48 : i32
    %8 = arith.addi %1, %c48_i32 : i32
    %c0_3 = arith.constant 0 : index
    %9 = arith.index_cast %8 : i32 to index
    %c0_4 = arith.constant 0 : index
    %10 = vector.load %arg2[%c0_3, %9, %c0_4] : memref<1x2352x12xbf16, #tpu.memory_space<vmem>>, vector<1x576x12xbf16>
    %11 = vector.shape_cast %10 : vector<1x576x12xbf16> to vector<576x12xbf16>
    %c0_5 = arith.constant 0 : index
    %c0_6 = arith.constant 0 : index
    %c0_7 = arith.constant 0 : index
    %12 = vector.load %arg4[%c0_5, %c0_6, %c0_7] : memref<3x12x32xbf16, #tpu.memory_space<vmem>>, vector<1x12x32xbf16>
    %13 = vector.shape_cast %12 : vector<1x12x32xbf16> to vector<12x32xbf16>
    %cst = arith.constant dense<0.000000e+00> : vector<576x32xf32>
    %14 = tpu.matmul %4, %13, %cst {dimension_numbers = #tpu.dot_dimension_numbers<[1], [0], [0], [1], [0, 0, 1, 1], [], []>} : vector<576x12xbf16>, vector<12x32xbf16>, vector<576x32xf32> -> vector<576x32xf32>
    %c1 = arith.constant 1 : index
    %c0_8 = arith.constant 0 : index
    %c0_9 = arith.constant 0 : index
    %15 = vector.load %arg4[%c1, %c0_8, %c0_9] : memref<3x12x32xbf16, #tpu.memory_space<vmem>>, vector<1x12x32xbf16>
    %16 = vector.shape_cast %15 : vector<1x12x32xbf16> to vector<12x32xbf16>
    %cst_10 = arith.constant dense<0.000000e+00> : vector<576x32xf32>
    %17 = tpu.matmul %7, %16, %cst_10 {dimension_numbers = #tpu.dot_dimension_numbers<[1], [0], [0], [1], [0, 0, 1, 1], [], []>} : vector<576x12xbf16>, vector<12x32xbf16>, vector<576x32xf32> -> vector<576x32xf32>
    %18 = arith.addf %14, %17 : vector<576x32xf32>
    %c2 = arith.constant 2 : index
    %c0_11 = arith.constant 0 : index
    %c0_12 = arith.constant 0 : index
    %19 = vector.load %arg4[%c2, %c0_11, %c0_12] : memref<3x12x32xbf16, #tpu.memory_space<vmem>>, vector<1x12x32xbf16>
    %20 = vector.shape_cast %19 : vector<1x12x32xbf16> to vector<12x32xbf16>
    %cst_13 = arith.constant dense<0.000000e+00> : vector<576x32xf32>
    %21 = tpu.matmul %11, %20, %cst_13 {dimension_numbers = #tpu.dot_dimension_numbers<[1], [0], [0], [1], [0, 0, 1, 1], [], []>} : vector<576x12xbf16>, vector<12x32xbf16>, vector<576x32xf32> -> vector<576x32xf32>
    %22 = arith.addf %18, %21 : vector<576x32xf32>
    %c0_14 = arith.constant 0 : index
    %c0_15 = arith.constant 0 : index
    %23 = vector.load %arg5[%c0_14, %c0_15] : memref<1x32xf32, #tpu.memory_space<vmem>>, vector<1x32xf32>
    %24 = vector.broadcast %23 : vector<1x32xf32> to vector<576x32xf32>
    %25 = arith.addf %22, %24 : vector<576x32xf32>
    %cst_16 = arith.constant 0.000000e+00 : f32
    %26 = vector.broadcast %cst_16 : f32 to vector<576x32xf32>
    %27 = arith.maximumf %25, %26 : vector<576x32xf32>
    %28 = arith.truncf %27 : vector<576x32xf32> to vector<576x32xbf16>
    %c0_17 = arith.constant 0 : index
    %c0_18 = arith.constant 0 : index
    %c0_19 = arith.constant 0 : index
    %29 = vector.load %arg6[%c0_17, %c0_18, %c0_19] : memref<1x576x32xbf16, #tpu.memory_space<vmem>>, vector<1x576x32xbf16>
    %30 = vector.shape_cast %29 : vector<1x576x32xbf16> to vector<576x32xbf16>
    %31 = vector.shape_cast %28 : vector<576x32xbf16> to vector<1x576x32xbf16>
    tpu.vector_store %arg6[%c0_17, %c0_18, %c0_19], %31 {strides = array<i32>} : memref<1x576x32xbf16, #tpu.memory_space<vmem>>, vector<1x576x32xbf16>,
    return
  }
  func.func @transform_0(%arg0: i32, %arg1: i32) -> (i32, i32, i32) {
    %c0_i32 = arith.constant 0 : i32
    %c0_i32_0 = arith.constant 0 : i32
    %c0_i32_1 = arith.constant 0 : i32
    return %arg0, %c0_i32, %c0_i32_0 : i32, i32, i32
  }
  func.func @transform_1(%arg0: i32, %arg1: i32) -> (i32, i32, i32) {
    %c0_i32 = arith.constant 0 : i32
    %c0_i32_0 = arith.constant 0 : i32
    %c0_i32_1 = arith.constant 0 : i32
    return %arg0, %c0_i32, %c0_i32_0 : i32, i32, i32
  }
  func.func @transform_2(%arg0: i32, %arg1: i32) -> (i32, i32, i32) {
    %c0_i32 = arith.constant 0 : i32
    %c0_i32_0 = arith.constant 0 : i32
    %c0_i32_1 = arith.constant 0 : i32
    %c0_i32_2 = arith.constant 0 : i32
    return %c0_i32, %c0_i32_0, %c0_i32_1 : i32, i32, i32
  }
  func.func @transform_3(%arg0: i32, %arg1: i32) -> (i32, i32) {
    %c0_i32 = arith.constant 0 : i32
    %c0_i32_0 = arith.constant 0 : i32
    %c0_i32_1 = arith.constant 0 : i32
    return %c0_i32, %c0_i32_0 : i32, i32
  }
  func.func @transform_4(%arg0: i32, %arg1: i32) -> (i32, i32, i32) {
    %c0_i32 = arith.constant 0 : i32
    %c0_i32_0 = arith.constant 0 : i32
    return %arg0, %arg1, %c0_i32 : i32, i32, i32
  }
}

module attributes {stable_mosaic.version = 11 : i64} {
  func.func @_conv3x3s2_kernel(%arg0: i32, %arg1: i32, %arg2: memref<1x600x96xbf16, #tpu.memory_space<vmem>>, %arg3: memref<1x600x96xbf16, #tpu.memory_space<vmem>>, %arg4: memref<3x96x32xbf16, #tpu.memory_space<vmem>>, %arg5: memref<1x32xf32, #tpu.memory_space<vmem>>, %arg6: memref<1x576x32xbf16, #tpu.memory_space<vmem>>) attributes {dimension_semantics = [#tpu.dimension_semantics<parallel>, #tpu.dimension_semantics<parallel>], iteration_bounds = array<i64: 2, 1>, scalar_prefetch = 0 : i64, scratch_operands = 0 : i64, tpu.core_type = #tpu.core_type<tc>, window_params = [{transform_indices = @transform_0, window_bounds = array<i64: 1, 600, 96>}, {transform_indices = @transform_1, window_bounds = array<i64: 1, 600, 96>}, {pipeline_mode = #tpu.pipeline_mode<synchronous>, transform_indices = @transform_2, window_bounds = array<i64: 3, 96, 32>}, {pipeline_mode = #tpu.pipeline_mode<synchronous>, transform_indices = @transform_3, window_bounds = array<i64: 1, 32>}, {transform_indices = @transform_4, window_bounds = array<i64: 1, 576, 32>}]} {
    %c0 = arith.constant 0 : index
    %c0_0 = arith.constant 0 : index
    %c0_1 = arith.constant 0 : index
    %0 = vector.load %arg2[%c0, %c0_0, %c0_1] : memref<1x600x96xbf16, #tpu.memory_space<vmem>>, vector<1x576x96xbf16>
    %1 = vector.shape_cast %0 : vector<1x576x96xbf16> to vector<576x96xbf16>
    %c0_2 = arith.constant 0 : index
    %c0_3 = arith.constant 0 : index
    %c0_4 = arith.constant 0 : index
    %2 = vector.load %arg3[%c0_2, %c0_3, %c0_4] : memref<1x600x96xbf16, #tpu.memory_space<vmem>>, vector<1x576x96xbf16>
    %3 = vector.shape_cast %2 : vector<1x576x96xbf16> to vector<576x96xbf16>
    %c0_5 = arith.constant 0 : index
    %c24 = arith.constant 24 : index
    %c0_6 = arith.constant 0 : index
    %4 = vector.load %arg2[%c0_5, %c24, %c0_6] : memref<1x600x96xbf16, #tpu.memory_space<vmem>>, vector<1x576x96xbf16>
    %5 = vector.shape_cast %4 : vector<1x576x96xbf16> to vector<576x96xbf16>
    %c0_7 = arith.constant 0 : index
    %c0_8 = arith.constant 0 : index
    %c0_9 = arith.constant 0 : index
    %6 = vector.load %arg4[%c0_7, %c0_8, %c0_9] : memref<3x96x32xbf16, #tpu.memory_space<vmem>>, vector<1x96x32xbf16>
    %7 = vector.shape_cast %6 : vector<1x96x32xbf16> to vector<96x32xbf16>
    %cst = arith.constant dense<0.000000e+00> : vector<576x32xf32>
    %8 = tpu.matmul %1, %7, %cst {dimension_numbers = #tpu.dot_dimension_numbers<[1], [0], [0], [1], [0, 0, 1, 1], [], []>} : vector<576x96xbf16>, vector<96x32xbf16>, vector<576x32xf32> -> vector<576x32xf32>
    %c1 = arith.constant 1 : index
    %c0_10 = arith.constant 0 : index
    %c0_11 = arith.constant 0 : index
    %9 = vector.load %arg4[%c1, %c0_10, %c0_11] : memref<3x96x32xbf16, #tpu.memory_space<vmem>>, vector<1x96x32xbf16>
    %10 = vector.shape_cast %9 : vector<1x96x32xbf16> to vector<96x32xbf16>
    %cst_12 = arith.constant dense<0.000000e+00> : vector<576x32xf32>
    %11 = tpu.matmul %3, %10, %cst_12 {dimension_numbers = #tpu.dot_dimension_numbers<[1], [0], [0], [1], [0, 0, 1, 1], [], []>} : vector<576x96xbf16>, vector<96x32xbf16>, vector<576x32xf32> -> vector<576x32xf32>
    %12 = arith.addf %8, %11 : vector<576x32xf32>
    %c2 = arith.constant 2 : index
    %c0_13 = arith.constant 0 : index
    %c0_14 = arith.constant 0 : index
    %13 = vector.load %arg4[%c2, %c0_13, %c0_14] : memref<3x96x32xbf16, #tpu.memory_space<vmem>>, vector<1x96x32xbf16>
    %14 = vector.shape_cast %13 : vector<1x96x32xbf16> to vector<96x32xbf16>
    %cst_15 = arith.constant dense<0.000000e+00> : vector<576x32xf32>
    %15 = tpu.matmul %5, %14, %cst_15 {dimension_numbers = #tpu.dot_dimension_numbers<[1], [0], [0], [1], [0, 0, 1, 1], [], []>} : vector<576x96xbf16>, vector<96x32xbf16>, vector<576x32xf32> -> vector<576x32xf32>
    %16 = arith.addf %12, %15 : vector<576x32xf32>
    %c0_16 = arith.constant 0 : index
    %c0_17 = arith.constant 0 : index
    %17 = vector.load %arg5[%c0_16, %c0_17] : memref<1x32xf32, #tpu.memory_space<vmem>>, vector<1x32xf32>
    %18 = vector.broadcast %17 : vector<1x32xf32> to vector<576x32xf32>
    %19 = arith.addf %16, %18 : vector<576x32xf32>
    %cst_18 = arith.constant 0.000000e+00 : f32
    %20 = vector.broadcast %cst_18 : f32 to vector<576x32xf32>
    %21 = arith.maximumf %19, %20 : vector<576x32xf32>
    %22 = arith.truncf %21 : vector<576x32xf32> to vector<576x32xbf16>
    %c0_19 = arith.constant 0 : index
    %c0_20 = arith.constant 0 : index
    %c0_21 = arith.constant 0 : index
    %23 = vector.load %arg6[%c0_19, %c0_20, %c0_21] : memref<1x576x32xbf16, #tpu.memory_space<vmem>>, vector<1x576x32xbf16>
    %24 = vector.shape_cast %23 : vector<1x576x32xbf16> to vector<576x32xbf16>
    %25 = vector.shape_cast %22 : vector<576x32xbf16> to vector<1x576x32xbf16>
    tpu.vector_store %arg6[%c0_19, %c0_20, %c0_21], %25 {strides = array<i32>} : memref<1x576x32xbf16, #tpu.memory_space<vmem>>, vector<1x576x32xbf16>,
    return
  }
  func.func @transform_0(%arg0: i32, %arg1: i32) -> (i32, i32, i32) {
    %c0_i32 = arith.constant 0 : i32
    %c0_i32_0 = arith.constant 0 : i32
    %c0_i32_1 = arith.constant 0 : i32
    return %arg0, %c0_i32, %c0_i32_0 : i32, i32, i32
  }
  func.func @transform_1(%arg0: i32, %arg1: i32) -> (i32, i32, i32) {
    %c0_i32 = arith.constant 0 : i32
    %c0_i32_0 = arith.constant 0 : i32
    %c0_i32_1 = arith.constant 0 : i32
    return %arg0, %c0_i32, %c0_i32_0 : i32, i32, i32
  }
  func.func @transform_2(%arg0: i32, %arg1: i32) -> (i32, i32, i32) {
    %c0_i32 = arith.constant 0 : i32
    %c0_i32_0 = arith.constant 0 : i32
    %c0_i32_1 = arith.constant 0 : i32
    %c0_i32_2 = arith.constant 0 : i32
    return %c0_i32, %c0_i32_0, %c0_i32_1 : i32, i32, i32
  }
  func.func @transform_3(%arg0: i32, %arg1: i32) -> (i32, i32) {
    %c0_i32 = arith.constant 0 : i32
    %c0_i32_0 = arith.constant 0 : i32
    %c0_i32_1 = arith.constant 0 : i32
    return %c0_i32, %c0_i32_0 : i32, i32
  }
  func.func @transform_4(%arg0: i32, %arg1: i32) -> (i32, i32, i32) {
    %c0_i32 = arith.constant 0 : i32
    %c0_i32_0 = arith.constant 0 : i32
    return %arg0, %arg1, %c0_i32 : i32, i32, i32
  }
}

module attributes {stable_mosaic.version = 11 : i64} {
  func.func @_conv3x3s2_kernel(%arg0: i32, %arg1: i32, %arg2: memref<1x156x96xbf16, #tpu.memory_space<vmem>>, %arg3: memref<1x156x96xbf16, #tpu.memory_space<vmem>>, %arg4: memref<3x96x32xbf16, #tpu.memory_space<vmem>>, %arg5: memref<1x32xf32, #tpu.memory_space<vmem>>, %arg6: memref<1x144x32xbf16, #tpu.memory_space<vmem>>) attributes {dimension_semantics = [#tpu.dimension_semantics<parallel>, #tpu.dimension_semantics<parallel>], iteration_bounds = array<i64: 2, 1>, scalar_prefetch = 0 : i64, scratch_operands = 0 : i64, tpu.core_type = #tpu.core_type<tc>, window_params = [{transform_indices = @transform_0, window_bounds = array<i64: 1, 156, 96>}, {transform_indices = @transform_1, window_bounds = array<i64: 1, 156, 96>}, {pipeline_mode = #tpu.pipeline_mode<synchronous>, transform_indices = @transform_2, window_bounds = array<i64: 3, 96, 32>}, {pipeline_mode = #tpu.pipeline_mode<synchronous>, transform_indices = @transform_3, window_bounds = array<i64: 1, 32>}, {transform_indices = @transform_4, window_bounds = array<i64: 1, 144, 32>}]} {
    %c0 = arith.constant 0 : index
    %c0_0 = arith.constant 0 : index
    %c0_1 = arith.constant 0 : index
    %0 = vector.load %arg2[%c0, %c0_0, %c0_1] : memref<1x156x96xbf16, #tpu.memory_space<vmem>>, vector<1x144x96xbf16>
    %1 = vector.shape_cast %0 : vector<1x144x96xbf16> to vector<144x96xbf16>
    %c0_2 = arith.constant 0 : index
    %c0_3 = arith.constant 0 : index
    %c0_4 = arith.constant 0 : index
    %2 = vector.load %arg3[%c0_2, %c0_3, %c0_4] : memref<1x156x96xbf16, #tpu.memory_space<vmem>>, vector<1x144x96xbf16>
    %3 = vector.shape_cast %2 : vector<1x144x96xbf16> to vector<144x96xbf16>
    %c0_5 = arith.constant 0 : index
    %c12 = arith.constant 12 : index
    %c0_6 = arith.constant 0 : index
    %4 = vector.load %arg2[%c0_5, %c12, %c0_6] : memref<1x156x96xbf16, #tpu.memory_space<vmem>>, vector<1x144x96xbf16>
    %5 = vector.shape_cast %4 : vector<1x144x96xbf16> to vector<144x96xbf16>
    %c0_7 = arith.constant 0 : index
    %c0_8 = arith.constant 0 : index
    %c0_9 = arith.constant 0 : index
    %6 = vector.load %arg4[%c0_7, %c0_8, %c0_9] : memref<3x96x32xbf16, #tpu.memory_space<vmem>>, vector<1x96x32xbf16>
    %7 = vector.shape_cast %6 : vector<1x96x32xbf16> to vector<96x32xbf16>
    %cst = arith.constant dense<0.000000e+00> : vector<144x32xf32>
    %8 = tpu.matmul %1, %7, %cst {dimension_numbers = #tpu.dot_dimension_numbers<[1], [0], [0], [1], [0, 0, 1, 1], [], []>} : vector<144x96xbf16>, vector<96x32xbf16>, vector<144x32xf32> -> vector<144x32xf32>
    %c1 = arith.constant 1 : index
    %c0_10 = arith.constant 0 : index
    %c0_11 = arith.constant 0 : index
    %9 = vector.load %arg4[%c1, %c0_10, %c0_11] : memref<3x96x32xbf16, #tpu.memory_space<vmem>>, vector<1x96x32xbf16>
    %10 = vector.shape_cast %9 : vector<1x96x32xbf16> to vector<96x32xbf16>
    %cst_12 = arith.constant dense<0.000000e+00> : vector<144x32xf32>
    %11 = tpu.matmul %3, %10, %cst_12 {dimension_numbers = #tpu.dot_dimension_numbers<[1], [0], [0], [1], [0, 0, 1, 1], [], []>} : vector<144x96xbf16>, vector<96x32xbf16>, vector<144x32xf32> -> vector<144x32xf32>
    %12 = arith.addf %8, %11 : vector<144x32xf32>
    %c2 = arith.constant 2 : index
    %c0_13 = arith.constant 0 : index
    %c0_14 = arith.constant 0 : index
    %13 = vector.load %arg4[%c2, %c0_13, %c0_14] : memref<3x96x32xbf16, #tpu.memory_space<vmem>>, vector<1x96x32xbf16>
    %14 = vector.shape_cast %13 : vector<1x96x32xbf16> to vector<96x32xbf16>
    %cst_15 = arith.constant dense<0.000000e+00> : vector<144x32xf32>
    %15 = tpu.matmul %5, %14, %cst_15 {dimension_numbers = #tpu.dot_dimension_numbers<[1], [0], [0], [1], [0, 0, 1, 1], [], []>} : vector<144x96xbf16>, vector<96x32xbf16>, vector<144x32xf32> -> vector<144x32xf32>
    %16 = arith.addf %12, %15 : vector<144x32xf32>
    %c0_16 = arith.constant 0 : index
    %c0_17 = arith.constant 0 : index
    %17 = vector.load %arg5[%c0_16, %c0_17] : memref<1x32xf32, #tpu.memory_space<vmem>>, vector<1x32xf32>
    %18 = vector.broadcast %17 : vector<1x32xf32> to vector<144x32xf32>
    %19 = arith.addf %16, %18 : vector<144x32xf32>
    %cst_18 = arith.constant 0.000000e+00 : f32
    %20 = vector.broadcast %cst_18 : f32 to vector<144x32xf32>
    %21 = arith.maximumf %19, %20 : vector<144x32xf32>
    %22 = arith.truncf %21 : vector<144x32xf32> to vector<144x32xbf16>
    %c0_19 = arith.constant 0 : index
    %c0_20 = arith.constant 0 : index
    %c0_21 = arith.constant 0 : index
    %23 = vector.load %arg6[%c0_19, %c0_20, %c0_21] : memref<1x144x32xbf16, #tpu.memory_space<vmem>>, vector<1x144x32xbf16>
    %24 = vector.shape_cast %23 : vector<1x144x32xbf16> to vector<144x32xbf16>
    %25 = vector.shape_cast %22 : vector<144x32xbf16> to vector<1x144x32xbf16>
    tpu.vector_store %arg6[%c0_19, %c0_20, %c0_21], %25 {strides = array<i32>} : memref<1x144x32xbf16, #tpu.memory_space<vmem>>, vector<1x144x32xbf16>,
    return
  }
  func.func @transform_0(%arg0: i32, %arg1: i32) -> (i32, i32, i32) {
    %c0_i32 = arith.constant 0 : i32
    %c0_i32_0 = arith.constant 0 : i32
    %c0_i32_1 = arith.constant 0 : i32
    return %arg0, %c0_i32, %c0_i32_0 : i32, i32, i32
  }
  func.func @transform_1(%arg0: i32, %arg1: i32) -> (i32, i32, i32) {
    %c0_i32 = arith.constant 0 : i32
    %c0_i32_0 = arith.constant 0 : i32
    %c0_i32_1 = arith.constant 0 : i32
    return %arg0, %c0_i32, %c0_i32_0 : i32, i32, i32
  }
  func.func @transform_2(%arg0: i32, %arg1: i32) -> (i32, i32, i32) {
    %c0_i32 = arith.constant 0 : i32
    %c0_i32_0 = arith.constant 0 : i32
    %c0_i32_1 = arith.constant 0 : i32
    %c0_i32_2 = arith.constant 0 : i32
    return %c0_i32, %c0_i32_0, %c0_i32_1 : i32, i32, i32
  }
  func.func @transform_3(%arg0: i32, %arg1: i32) -> (i32, i32) {
    %c0_i32 = arith.constant 0 : i32
    %c0_i32_0 = arith.constant 0 : i32
    %c0_i32_1 = arith.constant 0 : i32
    return %c0_i32, %c0_i32_0 : i32, i32
  }
  func.func @transform_4(%arg0: i32, %arg1: i32) -> (i32, i32, i32) {
    %c0_i32 = arith.constant 0 : i32
    %c0_i32_0 = arith.constant 0 : i32
    return %arg0, %arg1, %c0_i32 : i32, i32, i32
  }
}

module attributes {stable_mosaic.version = 11 : i64} {
  func.func @_conv3x3s2_kernel(%arg0: i32, %arg1: i32, %arg2: memref<1x42x96xbf16, #tpu.memory_space<vmem>>, %arg3: memref<1x42x96xbf16, #tpu.memory_space<vmem>>, %arg4: memref<3x96x32xbf16, #tpu.memory_space<vmem>>, %arg5: memref<1x32xf32, #tpu.memory_space<vmem>>, %arg6: memref<1x36x32xbf16, #tpu.memory_space<vmem>>) attributes {dimension_semantics = [#tpu.dimension_semantics<parallel>, #tpu.dimension_semantics<parallel>], iteration_bounds = array<i64: 2, 1>, scalar_prefetch = 0 : i64, scratch_operands = 0 : i64, tpu.core_type = #tpu.core_type<tc>, window_params = [{transform_indices = @transform_0, window_bounds = array<i64: 1, 42, 96>}, {transform_indices = @transform_1, window_bounds = array<i64: 1, 42, 96>}, {pipeline_mode = #tpu.pipeline_mode<synchronous>, transform_indices = @transform_2, window_bounds = array<i64: 3, 96, 32>}, {pipeline_mode = #tpu.pipeline_mode<synchronous>, transform_indices = @transform_3, window_bounds = array<i64: 1, 32>}, {transform_indices = @transform_4, window_bounds = array<i64: 1, 36, 32>}]} {
    %c0 = arith.constant 0 : index
    %c0_0 = arith.constant 0 : index
    %c0_1 = arith.constant 0 : index
    %0 = vector.load %arg2[%c0, %c0_0, %c0_1] : memref<1x42x96xbf16, #tpu.memory_space<vmem>>, vector<1x36x96xbf16>
    %1 = vector.shape_cast %0 : vector<1x36x96xbf16> to vector<36x96xbf16>
    %c0_2 = arith.constant 0 : index
    %c0_3 = arith.constant 0 : index
    %c0_4 = arith.constant 0 : index
    %2 = vector.load %arg3[%c0_2, %c0_3, %c0_4] : memref<1x42x96xbf16, #tpu.memory_space<vmem>>, vector<1x36x96xbf16>
    %3 = vector.shape_cast %2 : vector<1x36x96xbf16> to vector<36x96xbf16>
    %c0_5 = arith.constant 0 : index
    %c6 = arith.constant 6 : index
    %c0_6 = arith.constant 0 : index
    %4 = vector.load %arg2[%c0_5, %c6, %c0_6] : memref<1x42x96xbf16, #tpu.memory_space<vmem>>, vector<1x36x96xbf16>
    %5 = vector.shape_cast %4 : vector<1x36x96xbf16> to vector<36x96xbf16>
    %c0_7 = arith.constant 0 : index
    %c0_8 = arith.constant 0 : index
    %c0_9 = arith.constant 0 : index
    %6 = vector.load %arg4[%c0_7, %c0_8, %c0_9] : memref<3x96x32xbf16, #tpu.memory_space<vmem>>, vector<1x96x32xbf16>
    %7 = vector.shape_cast %6 : vector<1x96x32xbf16> to vector<96x32xbf16>
    %cst = arith.constant dense<0.000000e+00> : vector<36x32xf32>
    %8 = tpu.matmul %1, %7, %cst {dimension_numbers = #tpu.dot_dimension_numbers<[1], [0], [0], [1], [0, 0, 1, 1], [], []>} : vector<36x96xbf16>, vector<96x32xbf16>, vector<36x32xf32> -> vector<36x32xf32>
    %c1 = arith.constant 1 : index
    %c0_10 = arith.constant 0 : index
    %c0_11 = arith.constant 0 : index
    %9 = vector.load %arg4[%c1, %c0_10, %c0_11] : memref<3x96x32xbf16, #tpu.memory_space<vmem>>, vector<1x96x32xbf16>
    %10 = vector.shape_cast %9 : vector<1x96x32xbf16> to vector<96x32xbf16>
    %cst_12 = arith.constant dense<0.000000e+00> : vector<36x32xf32>
    %11 = tpu.matmul %3, %10, %cst_12 {dimension_numbers = #tpu.dot_dimension_numbers<[1], [0], [0], [1], [0, 0, 1, 1], [], []>} : vector<36x96xbf16>, vector<96x32xbf16>, vector<36x32xf32> -> vector<36x32xf32>
    %12 = arith.addf %8, %11 : vector<36x32xf32>
    %c2 = arith.constant 2 : index
    %c0_13 = arith.constant 0 : index
    %c0_14 = arith.constant 0 : index
    %13 = vector.load %arg4[%c2, %c0_13, %c0_14] : memref<3x96x32xbf16, #tpu.memory_space<vmem>>, vector<1x96x32xbf16>
    %14 = vector.shape_cast %13 : vector<1x96x32xbf16> to vector<96x32xbf16>
    %cst_15 = arith.constant dense<0.000000e+00> : vector<36x32xf32>
    %15 = tpu.matmul %5, %14, %cst_15 {dimension_numbers = #tpu.dot_dimension_numbers<[1], [0], [0], [1], [0, 0, 1, 1], [], []>} : vector<36x96xbf16>, vector<96x32xbf16>, vector<36x32xf32> -> vector<36x32xf32>
    %16 = arith.addf %12, %15 : vector<36x32xf32>
    %c0_16 = arith.constant 0 : index
    %c0_17 = arith.constant 0 : index
    %17 = vector.load %arg5[%c0_16, %c0_17] : memref<1x32xf32, #tpu.memory_space<vmem>>, vector<1x32xf32>
    %18 = vector.broadcast %17 : vector<1x32xf32> to vector<36x32xf32>
    %19 = arith.addf %16, %18 : vector<36x32xf32>
    %cst_18 = arith.constant 0.000000e+00 : f32
    %20 = vector.broadcast %cst_18 : f32 to vector<36x32xf32>
    %21 = arith.maximumf %19, %20 : vector<36x32xf32>
    %22 = arith.truncf %21 : vector<36x32xf32> to vector<36x32xbf16>
    %c0_19 = arith.constant 0 : index
    %c0_20 = arith.constant 0 : index
    %c0_21 = arith.constant 0 : index
    %23 = vector.load %arg6[%c0_19, %c0_20, %c0_21] : memref<1x36x32xbf16, #tpu.memory_space<vmem>>, vector<1x36x32xbf16>
    %24 = vector.shape_cast %23 : vector<1x36x32xbf16> to vector<36x32xbf16>
    %25 = vector.shape_cast %22 : vector<36x32xbf16> to vector<1x36x32xbf16>
    tpu.vector_store %arg6[%c0_19, %c0_20, %c0_21], %25 {strides = array<i32>} : memref<1x36x32xbf16, #tpu.memory_space<vmem>>, vector<1x36x32xbf16>,
    return
  }
  func.func @transform_0(%arg0: i32, %arg1: i32) -> (i32, i32, i32) {
    %c0_i32 = arith.constant 0 : i32
    %c0_i32_0 = arith.constant 0 : i32
    %c0_i32_1 = arith.constant 0 : i32
    return %arg0, %c0_i32, %c0_i32_0 : i32, i32, i32
  }
  func.func @transform_1(%arg0: i32, %arg1: i32) -> (i32, i32, i32) {
    %c0_i32 = arith.constant 0 : i32
    %c0_i32_0 = arith.constant 0 : i32
    %c0_i32_1 = arith.constant 0 : i32
    return %arg0, %c0_i32, %c0_i32_0 : i32, i32, i32
  }
  func.func @transform_2(%arg0: i32, %arg1: i32) -> (i32, i32, i32) {
    %c0_i32 = arith.constant 0 : i32
    %c0_i32_0 = arith.constant 0 : i32
    %c0_i32_1 = arith.constant 0 : i32
    %c0_i32_2 = arith.constant 0 : i32
    return %c0_i32, %c0_i32_0, %c0_i32_1 : i32, i32, i32
  }
  func.func @transform_3(%arg0: i32, %arg1: i32) -> (i32, i32) {
    %c0_i32 = arith.constant 0 : i32
    %c0_i32_0 = arith.constant 0 : i32
    %c0_i32_1 = arith.constant 0 : i32
    return %c0_i32, %c0_i32_0 : i32, i32
  }
  func.func @transform_4(%arg0: i32, %arg1: i32) -> (i32, i32, i32) {
    %c0_i32 = arith.constant 0 : i32
    %c0_i32_0 = arith.constant 0 : i32
    return %arg0, %arg1, %c0_i32 : i32, i32, i32
  }
}

module attributes {stable_mosaic.version = 11 : i64} {
  func.func @_head_kernel(%arg0: i32, %arg1: memref<2x1152xbf16, #tpu.memory_space<vmem>>, %arg2: memref<1152x256xbf16, #tpu.memory_space<vmem>>, %arg3: memref<1x256xf32, #tpu.memory_space<vmem>>, %arg4: memref<256x8xbf16, #tpu.memory_space<vmem>>, %arg5: memref<1x8xf32, #tpu.memory_space<vmem>>, %arg6: memref<2x8xf32, #tpu.memory_space<vmem>>) attributes {dimension_semantics = [#tpu.dimension_semantics<arbitrary>], iteration_bounds = array<i64: 1>, scalar_prefetch = 0 : i64, scratch_operands = 0 : i64, tpu.core_type = #tpu.core_type<tc>, window_params = [{pipeline_mode = #tpu.pipeline_mode<synchronous>, transform_indices = @transform_0, window_bounds = array<i64: 2, 1152>}, {pipeline_mode = #tpu.pipeline_mode<synchronous>, transform_indices = @transform_1, window_bounds = array<i64: 1152, 256>}, {pipeline_mode = #tpu.pipeline_mode<synchronous>, transform_indices = @transform_2, window_bounds = array<i64: 1, 256>}, {pipeline_mode = #tpu.pipeline_mode<synchronous>, transform_indices = @transform_3, window_bounds = array<i64: 256, 8>}, {pipeline_mode = #tpu.pipeline_mode<synchronous>, transform_indices = @transform_4, window_bounds = array<i64: 1, 8>}, {pipeline_mode = #tpu.pipeline_mode<synchronous>, transform_indices = @transform_5, window_bounds = array<i64: 2, 8>}]} {
    %c0 = arith.constant 0 : index
    %c0_0 = arith.constant 0 : index
    %0 = vector.load %arg1[%c0, %c0_0] : memref<2x1152xbf16, #tpu.memory_space<vmem>>, vector<2x1152xbf16>
    %c0_1 = arith.constant 0 : index
    %c0_2 = arith.constant 0 : index
    %1 = vector.load %arg2[%c0_1, %c0_2] : memref<1152x256xbf16, #tpu.memory_space<vmem>>, vector<1152x256xbf16>
    %cst = arith.constant dense<0.000000e+00> : vector<2x256xf32>
    %2 = tpu.matmul %0, %1, %cst {dimension_numbers = #tpu.dot_dimension_numbers<[1], [0], [0], [1], [0, 0, 1, 1], [], []>} : vector<2x1152xbf16>, vector<1152x256xbf16>, vector<2x256xf32> -> vector<2x256xf32>
    %c0_3 = arith.constant 0 : index
    %c0_4 = arith.constant 0 : index
    %3 = vector.load %arg3[%c0_3, %c0_4] : memref<1x256xf32, #tpu.memory_space<vmem>>, vector<1x256xf32>
    %4 = vector.broadcast %3 : vector<1x256xf32> to vector<2x256xf32>
    %5 = arith.addf %2, %4 : vector<2x256xf32>
    %6 = arith.truncf %5 : vector<2x256xf32> to vector<2x256xbf16>
    %c0_5 = arith.constant 0 : index
    %c0_6 = arith.constant 0 : index
    %7 = vector.load %arg4[%c0_5, %c0_6] : memref<256x8xbf16, #tpu.memory_space<vmem>>, vector<256x8xbf16>
    %cst_7 = arith.constant dense<0.000000e+00> : vector<2x8xf32>
    %8 = tpu.matmul %6, %7, %cst_7 {dimension_numbers = #tpu.dot_dimension_numbers<[1], [0], [0], [1], [0, 0, 1, 1], [], []>} : vector<2x256xbf16>, vector<256x8xbf16>, vector<2x8xf32> -> vector<2x8xf32>
    %c0_8 = arith.constant 0 : index
    %c0_9 = arith.constant 0 : index
    %9 = vector.load %arg5[%c0_8, %c0_9] : memref<1x8xf32, #tpu.memory_space<vmem>>, vector<1x8xf32>
    %10 = vector.broadcast %9 : vector<1x8xf32> to vector<2x8xf32>
    %11 = arith.addf %8, %10 : vector<2x8xf32>
    %cst_10 = arith.constant dense<0xFF800000> : vector<2xf32>
    %12 = vector.multi_reduction <maximumf>, %11, %cst_10 [1] : vector<2x8xf32> to vector<2xf32>
    %13 = vector.shape_cast %12 : vector<2xf32> to vector<2x1xf32>
    %14 = vector.broadcast %13 : vector<2x1xf32> to vector<2x8xf32>
    %15 = arith.subf %11, %14 : vector<2x8xf32>
    %16 = math.exp %15 : vector<2x8xf32>
    %cst_11 = arith.constant dense<0.000000e+00> : vector<2xf32>
    %17 = vector.multi_reduction <add>, %16, %cst_11 [1] : vector<2x8xf32> to vector<2xf32>
    %18 = vector.shape_cast %17 : vector<2xf32> to vector<2x1xf32>
    %19 = tpu.reciprocal %18 {approx = true} : vector<2x1xf32> -> vector<2x1xf32>
    %20 = vector.broadcast %19 : vector<2x1xf32> to vector<2x8xf32>
    %21 = arith.mulf %16, %20 : vector<2x8xf32>
    %c0_12 = arith.constant 0 : index
    %c0_13 = arith.constant 0 : index
    %22 = vector.load %arg6[%c0_12, %c0_13] : memref<2x8xf32, #tpu.memory_space<vmem>>, vector<2x8xf32>
    tpu.vector_store %arg6[%c0_12, %c0_13], %21 {strides = array<i32>} : memref<2x8xf32, #tpu.memory_space<vmem>>, vector<2x8xf32>,
    return
  }
  func.func @transform_0(%arg0: i32) -> (i32, i32) {
    %c0_i32 = arith.constant 0 : i32
    %c0_i32_0 = arith.constant 0 : i32
    %c0_i32_1 = arith.constant 0 : i32
    return %c0_i32, %c0_i32_0 : i32, i32
  }
  func.func @transform_1(%arg0: i32) -> (i32, i32) {
    %c0_i32 = arith.constant 0 : i32
    %c0_i32_0 = arith.constant 0 : i32
    %c0_i32_1 = arith.constant 0 : i32
    return %c0_i32, %c0_i32_0 : i32, i32
  }
  func.func @transform_2(%arg0: i32) -> (i32, i32) {
    %c0_i32 = arith.constant 0 : i32
    %c0_i32_0 = arith.constant 0 : i32
    %c0_i32_1 = arith.constant 0 : i32
    return %c0_i32, %c0_i32_0 : i32, i32
  }
  func.func @transform_3(%arg0: i32) -> (i32, i32) {
    %c0_i32 = arith.constant 0 : i32
    %c0_i32_0 = arith.constant 0 : i32
    %c0_i32_1 = arith.constant 0 : i32
    return %c0_i32, %c0_i32_0 : i32, i32
  }
  func.func @transform_4(%arg0: i32) -> (i32, i32) {
    %c0_i32 = arith.constant 0 : i32
    %c0_i32_0 = arith.constant 0 : i32
    %c0_i32_1 = arith.constant 0 : i32
    return %c0_i32, %c0_i32_0 : i32, i32
  }
  func.func @transform_5(%arg0: i32) -> (i32, i32) {
    %c0_i32 = arith.constant 0 : i32
    %c0_i32_0 = arith.constant 0 : i32
    %c0_i32_1 = arith.constant 0 : i32
    return %c0_i32, %c0_i32_0 : i32, i32
  }
}

</mosaic_0001>

<bundles_post_ra>
// kernel: actor_net_forward.5
= control target key start
LH: loop header
LB: loop body
LE: loop exit
PB: predicated region body
PF: predicated region fallthrough
CT: control target
= control target key end

     0   :  { %s4099_s15 = smov 0   ;;  %s4101_s16 = smov 0   ;;  %s4723_s0 = inlined_call_operand.vmem [shape: bf16[2,2352,12], index: 0, kind: input, shape index: {}]   ;;  %s4724_s1 = inlined_call_operand.vmem [shape: bf16[2,2352,12], index: 1, kind: input, shape index: {}]   ;;  %s4725_s2 = inlined_call_operand.vmem [shape: bf16[3,12,32], index: 2, kind: input, shape index: {}]   ;;  %s4726_s3 = inlined_call_operand.vmem [shape: f32[1,32], index: 3, kind: input, shape index: {}]   ;;  %s4727_s4 = inlined_call_operand.vmem [shape: bf16[2,2304,32], index: 4, kind: output, shape index: {}]  }
   0x1   :  { %s4103_s17 = smov 0   ;;  %s4105_s18 = smov 0  }
   0x2   :  { %s4107_s19 = smov 0  }
   0x3 LB: > { %s23_s20 = sadd.s32 1, %s4064_s17  ;;  %s26_s21 = sadd.s32 1, %s4068_s18  ;;  %s4072_s19 = sphi %s4107_s19, %s14_s19   ;;  %s4068_s18 = sphi %s4105_s18, %s4731_s18   ;;  %s4064_s17 = sphi %s4103_s17, %s4730_s17   ;;  %s4060_s16 = sphi %s4101_s16, %s4729_s16   ;;  %s4056_s15 = sphi %s4099_s15, %s4728_s15  }
   0x4   : > { %p24_p0 = scmp.ge.s32.totalorder %s23_s20, 4  ;;  %p3021_p1 = scmp.ge.s32.totalorder %s4072_s19, 1 }
   0x5   : > { %p186_p2 = scmp.lt.s32.totalorder %s4072_s19, 9 }
   0x6   : > { %s4733_s20 = smov (%p24_p0, %s23_s20), 0  ;;  %s4735_s21 = smov (!%p24_p0, %s26_s21), %s4068_s18 }
   0x7   : > { %p187_p3 = pnand %p3021_p1, %p186_p2  ;;  %p28_p4 = scmp.ge.s32.totalorder %s4735_s21, 2 }
   0x8   : > { %v3923_v0 = vld [vmem:[%s4725_s2 + $0x8] sm:$0x3f] (!%p187_p3)   ;;  %vm769_vm0 = vcmask (!%p187_p3), 1045504   ;;  %p221_p5 = scmp.lt.s32.totalorder (!%p187_p3), %s4060_s16, 1  ;;  %v3924_v1 = vld [vmem:[%s4725_s2] sm:$0x3f] (!%p187_p3)  }
   0x9   : > { %s4737_s21 = smov (%p28_p4, %s4735_s21), 0  ;;  %190 = sbr.rel (%p187_p3) target bundleno = 456 (0x1c8), region = 36 }
   0xa   : > { %3877 = vmatprep.subr.msk.bf16.mxu1 (!%p187_p3), %vm769_vm0, %v3923_v0  ;;  %v771_v2 = vsel (!%p187_p3), %vm769_vm0, %v3923_v0, 0  ;;  %s242_s26 = smul.u32 (!%p187_p3), 576, %s4056_s15  ;;  %3878 = vmatprep.subr.msk.bf16.mxu0 (!%p187_p3), %vm769_vm0, %v3924_v1  ;;  %v1388_v3 = vsel (!%p187_p3), %vm769_vm0, %v3924_v1, 0  ;;  %v3927_v4 = vld [vmem:[%s4725_s2 + $0x10] sm:$0x3f] (!%p187_p3)   ;;  %vm660_vm1 = vcmask (!%p187_p3), 97280  }
   0xb   : > { %3510 = vmatpush3.bf16.msra.mxu1 (!%p187_p3), %v771_v2  ;;  %3584 = vmatpush3.bf16.msra.mxu0 (!%p187_p3), %v1388_v3  ;;  %v2008_v9 = vsel (!%p187_p3), %vm769_vm0, %v3927_v4, 0  ;;  %s231_s25 = smul.u32 (!%p187_p3), 72, %s4056_s15  ;;  %vm2842_vm2 = vcmask (!%p187_p3), 257024  }
   0xc   : > { %s243_s27 = sshra.s32 (!%p187_p3), %s242_s26, 3  ;;  %3879 = vmatprep.subr.msk.bf16.mxu1 (!%p187_p3), %vm769_vm0, %v3924_v1  ;;  %3880 = vmatprep.subr.msk.bf16.mxu0 (!%p187_p3), %vm769_vm0, %v3927_v4  ;;  %s393_s14 = sadd.s32 (!%p187_p3), 48, %s242_s26 }
   0xd   : > { %s3025_s5 = sshll.u32 (!%p187_p3), %s243_s27, 2  ;;  %s394_s22 = sshra.s32 (!%p187_p3), %s393_s14, 3 }
   0xe   : > { %s3027_s23 = sshll.u32 (!%p187_p3), %s394_s22, 2  ;;  %p234_p6 = scmp.lt.s32.totalorder (!%p187_p3), %s231_s25, 287 }
  0x10   : > { %s4739_s16 = smov (!%p221_p5, %s4060_s16), 1  ;;  %s4741_s25 = smov (!%p234_p6, %s231_s25), 287 }
  0x11   : > { %s3881_s30 = smul.u32 1176, %s4739_s16 }
  0x12   : > { %s3882_s26 = smul.u32 288, %s4739_s16 }
  0x13   : > { %s230_s8 = scalar_lea.vmem %s4724_s1, %s3881_s30  ;;  %s4160_s12 = scalar_lea.vmem %s4723_s0, %s3881_s30 }
  0x14   : > { %s4155_s9 = scalar_lea.vmem %s230_s8, %s3025_s5  ;;  %s4164_s13 = scalar_lea.vmem %s4160_s12, %s3025_s5 }
  0x15   : > { %v3925_v5 = vld [vmem:[%s4155_s9] sm:$0xff]   ;;  %v3928_v7 = vld [vmem:[%s4155_s9 + $0x8] sm:$0xff]   ;;  %v3930_v10 = vld [vmem:[%s4155_s9 + $0x10] sm:$0xff]   ;;  %s4209_s24 = scalar_lea.vmem %s4160_s12, %s3027_s23  ;;  %s237_s27 = sadd.s32 %s3882_s26, %s4741_s25 }
  0x16   : > { %v3926_v6 = vld [vmem:[%s4164_s13] sm:$0xff]   ;;  %3511 = vmatprep.mubr.msk.bf16.mxu1 %vm660_vm1, %v3925_v5  ;;  %v3929_v8 = vld [vmem:[%s4164_s13 + $0x8] sm:$0xff]   ;;  %v3931_v11 = vld [vmem:[%s4164_s13 + $0x10] sm:$0xff]   ;;  %s3024_s15 = sshll.u32 %s237_s27, 2 }
  0x17   : > { %3585 = vmatprep.mubr.msk.bf16.mxu0 %vm660_vm1, %v3926_v6  ;;  %3512 = vmatmul.mubr.msk.bf16.vlgmr.msra.gmra.mrb[0].mxu1 %vm660_vm1, %v3928_v7  ;;  %v3932_v12 = vld [vmem:[%s4155_s9 + $0x18] sm:$0xff]   ;;  %v3934_v14 = vld [vmem:[%s4155_s9 + $0x20] sm:$0xff]   ;;  %v3936_v16 = vld [vmem:[%s4155_s9 + $0x28] sm:$0xff]   ;;  %s4462_s5 = scalar_lea.vmem %s4727_s4, %s3024_s15 }
  0x18   : > { %3732 = vmatpush3.bf16.msra.mxu1 %v1388_v3  ;;  %3586 = vmatmul.mubr.msk.bf16.vlgmr.msra.gmra.mrb[0].mxu0 %vm660_vm1, %v3929_v8  ;;  %v3933_v13 = vld [vmem:[%s4164_s13 + $0x18] sm:$0xff]   ;;  %v3935_v15 = vld [vmem:[%s4164_s13 + $0x20] sm:$0xff]   ;;  %v3937_v17 = vld [vmem:[%s4164_s13 + $0x28] sm:$0xff]  }
  0x19   : > { %3658 = vmatpush3.bf16.msra.mxu0 %v2008_v9  ;;  %3515 = vmatprep.mubr.msk.bf16.mxu1 %vm660_vm1, %v3930_v10  ;;  %v3938_v18 = vld [vmem:[%s4155_s9 + $0x30] sm:$0xff]   ;;  %v3940_v20 = vld [vmem:[%s4155_s9 + $0x38] sm:$0xff]   ;;  %v3942_v22 = vld [vmem:[%s4155_s9 + $0x40] sm:$0xff]  }
  0x1a   : > { %3589 = vmatprep.mubr.msk.bf16.mxu0 %vm660_vm1, %v3931_v11  ;;  %v3939_v19 = vld [vmem:[%s4164_s13 + $0x30] sm:$0xff]   ;;  %v3941_v21 = vld [vmem:[%s4164_s13 + $0x38] sm:$0xff]   ;;  %v3943_v23 = vld [vmem:[%s4164_s13 + $0x40] sm:$0xff]  }
  0x1b   : > { %v3944_v24 = vld [vmem:[%s4155_s9 + $0x48] sm:$0xff]   ;;  %v3946_v26 = vld [vmem:[%s4155_s9 + $0x50] sm:$0xff]   ;;  %v3948_v28 = vld [vmem:[%s4155_s9 + $0x58] sm:$0xff]  }
  0x1c   : > { %v3945_v25 = vld [vmem:[%s4164_s13 + $0x48] sm:$0xff]   ;;  %v3947_v27 = vld [vmem:[%s4164_s13 + $0x50] sm:$0xff]   ;;  %v3949_v29 = vld [vmem:[%s4164_s13 + $0x58] sm:$0xff]  }
  0x1d   : > { %v3950_v30 = vld [vmem:[%s4155_s9 + $0x60] sm:$0xff]   ;;  %v3952_v32 = vld [vmem:[%s4155_s9 + $0x68] sm:$0xff]   ;;  %v3954_v34 = vld [vmem:[%s4155_s9 + $0x70] sm:$0xff]  }
  0x1e   : > { %v3951_v31 = vld [vmem:[%s4164_s13 + $0x60] sm:$0xff]   ;;  %v3953_v33 = vld [vmem:[%s4164_s13 + $0x68] sm:$0xff]   ;;  %v3955_v35 = vld [vmem:[%s4164_s13 + $0x70] sm:$0xff]  }
  0x1f   : > { %3516 = vmatmul.mubr.msk.bf16.gmra.mrb[4].mxu1 %vm660_vm1, %v3932_v12  ;;  %v3956_v36 = vld [vmem:[%s4155_s9 + $0x78] sm:$0xff]   ;;  %v3958_v38 = vld [vmem:[%s4155_s9 + $0x80] sm:$0xff]   ;;  %v3960_v40 = vld [vmem:[%s4155_s9 + $0x88] sm:$0xff]  }
  0x20   : > { %3590 = vmatmul.mubr.msk.bf16.gmra.mrb[4].mxu0 %vm660_vm1, %v3933_v13  ;;  %3519 = vmatprep.mubr.msk.bf16.mxu1 %vm660_vm1, %v3934_v14  ;;  %v3957_v37 = vld [vmem:[%s4164_s13 + $0x78] sm:$0xff]   ;;  %v3959_v39 = vld [vmem:[%s4164_s13 + $0x80] sm:$0xff]   ;;  %v3961_v41 = vld [vmem:[%s4164_s13 + $0x88] sm:$0xff]  }
  0x21   : > { %3593 = vmatprep.mubr.msk.bf16.mxu0 %vm660_vm1, %v3935_v15  ;;  %v3962_v42 = vld [vmem:[%s4155_s9 + $0x90] sm:$0xff]   ;;  %v3963_v43 = vld [vmem:[%s4209_s24] sm:$0xff]   ;;  %v3964_v44 = vld [vmem:[%s4155_s9 + $0x98] sm:$0xff]  }
  0x22   : > { %v3965_v45 = vld [vmem:[%s4209_s24 + $0x8] sm:$0xff]   ;;  %v3966_v46 = vld [vmem:[%s4155_s9 + $0xa0] sm:$0xff]   ;;  %v3967_v47 = vld [vmem:[%s4209_s24 + $0x10] sm:$0xff]  }
  0x23   : > { %v3968_v48 = vld [vmem:[%s4155_s9 + $0xa8] sm:$0xff]   ;;  %v3969_v49 = vld [vmem:[%s4209_s24 + $0x18] sm:$0xff]   ;;  %v3970_v50 = vld [vmem:[%s4155_s9 + $0xb0] sm:$0xff]  }
  0x24   : > { %v3971_v51 = vld [vmem:[%s4209_s24 + $0x20] sm:$0xff]   ;;  %v3972_v52 = vld [vmem:[%s4155_s9 + $0xb8] sm:$0xff]   ;;  %v3973_v53 = vld [vmem:[%s4209_s24 + $0x28] sm:$0xff]  }
  0x25   : > { %v3974_v54 = vld [vmem:[%s4155_s9 + $0xc0] sm:$0xff]   ;;  %v3975_v55 = vld [vmem:[%s4209_s24 + $0x30] sm:$0xff]   ;;  %v3976_v56 = vld [vmem:[%s4155_s9 + $0xc8] sm:$0xff]  }
  0x26   : > { %v3977_v57 = vld [vmem:[%s4209_s24 + $0x38] sm:$0xff]   ;;  %v3978_v58 = vld [vmem:[%s4155_s9 + $0xd0] sm:$0xff]   ;;  %v3979_v59 = vld [vmem:[%s4209_s24 + $0x40] sm:$0xff]  }
  0x27   : > { %3520 = vmatmul.mubr.msk.bf16.gmra.mrb[8].mxu1 %vm660_vm1, %v3936_v16  ;;  %v3980_v60 = vld [vmem:[%s4155_s9 + $0xd8] sm:$0xff]   ;;  %v3981_v61 = vld [vmem:[%s4209_s24 + $0x48] sm:$0xff]   ;;  %v3982_v62 = vld [vmem:[%s4155_s9 + $0xe0] sm:$0xff]  }
  0x28   : > { %3594 = vmatmul.mubr.msk.bf16.gmra.mrb[8].mxu0 %vm660_vm1, %v3937_v17  ;;  %3523 = vmatprep.mubr.msk.bf16.mxu1 %vm660_vm1, %v3938_v18  ;;  %v3983_v63 = vld [vmem:[%s4209_s24 + $0x50] sm:$0xff]   ;;  %v3984_v0 = vld [vmem:[%s4155_s9 + $0xe8] sm:$0xff]   ;;  %v3985_v1 = vld [vmem:[%s4209_s24 + $0x58] sm:$0xff]  }
  0x29   : > { %3597 = vmatprep.mubr.msk.bf16.mxu0 %vm660_vm1, %v3939_v19  ;;  %v3986_v2 = vld [vmem:[%s4155_s9 + $0xf0] sm:$0xff]   ;;  %v3987_v3 = vld [vmem:[%s4209_s24 + $0x60] sm:$0xff]   ;;  %v3988_v4 = vld [vmem:[%s4155_s9 + $0xf8] sm:$0xff]  }
  0x2a   : > { %v3989_v5 = vld [vmem:[%s4209_s24 + $0x68] sm:$0xff]   ;;  %v3990_v6 = vld [vmem:[%s4155_s9 + $0x100] sm:$0xff]   ;;  %v3991_v7 = vld [vmem:[%s4209_s24 + $0x70] sm:$0xff]  }
  0x2b   : > { %v3992_v8 = vld [vmem:[%s4155_s9 + $0x108] sm:$0xff]   ;;  %v3993_v9 = vld [vmem:[%s4209_s24 + $0x78] sm:$0xff]   ;;  %v3994_v10 = vld [vmem:[%s4155_s9 + $0x110] sm:$0xff]  }
  0x2c   : > { %v3995_v11 = vld [vmem:[%s4209_s24 + $0x80] sm:$0xff]   ;;  %v3996_v12 = vld [vmem:[%s4155_s9 + $0x118] sm:$0xff]   ;;  %v3997_v13 = vld [vmem:[%s4209_s24 + $0x88] sm:$0xff]  }
  0x2d   : > { %v3998_v14 = vld [vmem:[%s4164_s13 + $0x90] sm:$0xff]   ;;  %v4000_v16 = vld [vmem:[%s4164_s13 + $0x98] sm:$0xff]   ;;  %v4002_v18 = vld [vmem:[%s4164_s13 + $0xa0] sm:$0xff]  }
  0x2e   : > { %v3999_v15 = vld [vmem:[%s4209_s24 + $0x90] sm:$0xff]   ;;  %v4001_v17 = vld [vmem:[%s4209_s24 + $0x98] sm:$0xff]   ;;  %v4003_v19 = vld [vmem:[%s4209_s24 + $0xa0] sm:$0xff]  }
  0x2f   : > { %3524 = vmatmul.mubr.msk.bf16.gmra.mrb[12].mxu1 %vm660_vm1, %v3940_v20  ;;  %v4004_v20 = vld [vmem:[%s4164_s13 + $0xa8] sm:$0xff]  }
  0x30   : > { %3598 = vmatmul.mubr.msk.bf16.gmra.mrb[12].mxu0 %vm660_vm1, %v3941_v21  ;;  %3527 = vmatprep.mubr.msk.bf16.mxu1 %vm660_vm1, %v3942_v22  ;;  %v4005_v21 = vld [vmem:[%s4209_s24 + $0xa8] sm:$0xff]   ;;  %v4006_v22 = vld [vmem:[%s4164_s13 + $0xb0] sm:$0xff]  }
  0x31   : > { %3601 = vmatprep.mubr.msk.bf16.mxu0 %vm660_vm1, %v3943_v23  ;;  %v4007_v23 = vld [vmem:[%s4209_s24 + $0xb0] sm:$0xff]  }
  0x37   : > { %3528 = vmatmul.mubr.msk.bf16.gmra.mrb[16].mxu1 %vm660_vm1, %v3944_v24  ;;  %v4008_v24 = vld [vmem:[%s4164_s13 + $0xb8] sm:$0xff]  }
  0x38   : > { %3602 = vmatmul.mubr.msk.bf16.gmra.mrb[16].mxu0 %vm660_vm1, %v3945_v25  ;;  %3531 = vmatprep.mubr.msk.bf16.mxu1 %vm660_vm1, %v3946_v26  ;;  %v4009_v25 = vld [vmem:[%s4209_s24 + $0xb8] sm:$0xff]   ;;  %v4010_v26 = vld [vmem:[%s4164_s13 + $0xc0] sm:$0xff]  }
  0x39   : > { %3605 = vmatprep.mubr.msk.bf16.mxu0 %vm660_vm1, %v3947_v27  ;;  %v4011_v27 = vld [vmem:[%s4209_s24 + $0xc0] sm:$0xff]  }
  0x3f   : > { %3532 = vmatmul.mubr.msk.bf16.gmra.mrb[20].mxu1 %vm660_vm1, %v3948_v28  ;;  %v4012_v28 = vld [vmem:[%s4164_s13 + $0xc8] sm:$0xff]  }
  0x40   : > { %3606 = vmatmul.mubr.msk.bf16.gmra.mrb[20].mxu0 %vm660_vm1, %v3949_v29  ;;  %3535 = vmatprep.mubr.msk.bf16.mxu1 %vm660_vm1, %v3950_v30  ;;  %v4013_v29 = vld [vmem:[%s4209_s24 + $0xc8] sm:$0xff]   ;;  %v4014_v30 = vld [vmem:[%s4164_s13 + $0xd0] sm:$0xff]  }
  0x41   : > { %3609 = vmatprep.mubr.msk.bf16.mxu0 %vm660_vm1, %v3951_v31  ;;  %v4015_v31 = vld [vmem:[%s4209_s24 + $0xd0] sm:$0xff]  }
  0x47   : > { %3536 = vmatmul.mubr.msk.bf16.gmra.mrb[24].mxu1 %vm660_vm1, %v3952_v32  ;;  %v4016_v32 = vld [vmem:[%s4164_s13 + $0xd8] sm:$0xff]  }
  0x48   : > { %3610 = vmatmul.mubr.msk.bf16.gmra.mrb[24].mxu0 %vm660_vm1, %v3953_v33  ;;  %3539 = vmatprep.mubr.msk.bf16.mxu1 %vm660_vm1, %v3954_v34  ;;  %v4017_v33 = vld [vmem:[%s4209_s24 + $0xd8] sm:$0xff]   ;;  %v4018_v34 = vld [vmem:[%s4164_s13 + $0xe0] sm:$0xff]  }
  0x49   : > { %3613 = vmatprep.mubr.msk.bf16.mxu0 %vm660_vm1, %v3955_v35  ;;  %v4019_v35 = vld [vmem:[%s4209_s24 + $0xe0] sm:$0xff]  }
  0x4f   : > { %3540 = vmatmul.mubr.msk.bf16.gmra.mrb[28].mxu1 %vm660_vm1, %v3956_v36  ;;  %v4020_v36 = vld [vmem:[%s4164_s13 + $0xe8] sm:$0xff]  }
  0x50   : > { %3614 = vmatmul.mubr.msk.bf16.gmra.mrb[28].mxu0 %vm660_vm1, %v3957_v37  ;;  %3543 = vmatprep.mubr.msk.bf16.mxu1 %vm660_vm1, %v3958_v38  ;;  %v4021_v37 = vld [vmem:[%s4209_s24 + $0xe8] sm:$0xff]   ;;  %v4022_v38 = vld [vmem:[%s4164_s13 + $0xf0] sm:$0xff]  }
  0x51   : > { %3617 = vmatprep.mubr.msk.bf16.mxu0 %vm660_vm1, %v3959_v39  ;;  %v4023_v39 = vld [vmem:[%s4209_s24 + $0xf0] sm:$0xff]  }
  0x57   : > { %3544 = vmatmul.mubr.msk.bf16.gmra.mrb[32].mxu1 %vm660_vm1, %v3960_v40  ;;  %v4024_v40 = vld [vmem:[%s4164_s13 + $0xf8] sm:$0xff]  }
  0x58   : > { %3618 = vmatmul.mubr.msk.bf16.gmra.mrb[32].mxu0 %vm660_vm1, %v3961_v41  ;;  %3547 = vmatprep.mubr.msk.bf16.mxu1 %vm660_vm1, %v3962_v42  ;;  %v4025_v41 = vld [vmem:[%s4209_s24 + $0xf8] sm:$0xff]   ;;  %v4026_v42 = vld [vmem:[%s4164_s13 + $0x100] sm:$0xff]  }
  0x59   : > { %3659 = vmatprep.mubr.msk.bf16.mxu0 %vm660_vm1, %v3963_v43  ;;  %v4027_v43 = vld [vmem:[%s4209_s24 + $0x100] sm:$0xff]  }
  0x5f   : > { %3548 = vmatmul.mubr.msk.bf16.gmra.mrb[36].mxu1 %vm660_vm1, %v3964_v44  ;;  %v4028_v44 = vld [vmem:[%s4164_s13 + $0x108] sm:$0xff]  }
  0x60   : > { %3660 = vmatmul.mubr.msk.bf16.vlgmr.msra.gmra.mrb[0].mxu0 %vm660_vm1, %v3965_v45  ;;  %3551 = vmatprep.mubr.msk.bf16.mxu1 %vm660_vm1, %v3966_v46  ;;  %v4029_v45 = vld [vmem:[%s4209_s24 + $0x108] sm:$0xff]   ;;  %v4030_v46 = vld [vmem:[%s4164_s13 + $0x110] sm:$0xff]  }
  0x61   : > { %3663 = vmatprep.mubr.msk.bf16.mxu0 %vm660_vm1, %v3967_v47  ;;  %v4031_v47 = vld [vmem:[%s4209_s24 + $0x110] sm:$0xff]  }
  0x67   : > { %3552 = vmatmul.mubr.msk.bf16.gmra.mrb[40].mxu1 %vm660_vm1, %v3968_v48  ;;  %v4032_v48 = vld [vmem:[%s4164_s13 + $0x118] sm:$0xff]  }
  0x68   : > { %3664 = vmatmul.mubr.msk.bf16.gmra.mrb[4].mxu0 %vm660_vm1, %v3969_v49  ;;  %3555 = vmatprep.mubr.msk.bf16.mxu1 %vm660_vm1, %v3970_v50  ;;  %v4033_v49 = vld [vmem:[%s4209_s24 + $0x118] sm:$0xff]  }
  0x69   : > { %3667 = vmatprep.mubr.msk.bf16.mxu0 %vm660_vm1, %v3971_v51 }
  0x6f   : > { %3556 = vmatmul.mubr.msk.bf16.gmra.mrb[44].mxu1 %vm660_vm1, %v3972_v52 }
  0x70   : > { %3668 = vmatmul.mubr.msk.bf16.gmra.mrb[8].mxu0 %vm660_vm1, %v3973_v53  ;;  %3559 = vmatprep.mubr.msk.bf16.mxu1 %vm660_vm1, %v3974_v54 }
  0x71   : > { %3671 = vmatprep.mubr.msk.bf16.mxu0 %vm660_vm1, %v3975_v55 }
  0x77   : > { %3560 = vmatmul.mubr.msk.bf16.gmra.mrb[48].mxu1 %vm660_vm1, %v3976_v56 }
  0x78   : > { %3672 = vmatmul.mubr.msk.bf16.gmra.mrb[12].mxu0 %vm660_vm1, %v3977_v57  ;;  %3563 = vmatprep.mubr.msk.bf16.mxu1 %vm660_vm1, %v3978_v58 }
  0x79   : > { %3675 = vmatprep.mubr.msk.bf16.mxu0 %vm660_vm1, %v3979_v59 }
  0x7f   : > { %3564 = vmatmul.mubr.msk.bf16.gmra.mrb[52].mxu1 %vm660_vm1, %v3980_v60 }
  0x80   : > { %3676 = vmatmul.mubr.msk.bf16.gmra.mrb[16].mxu0 %vm660_vm1, %v3981_v61  ;;  %3567 = vmatprep.mubr.msk.bf16.mxu1 %vm660_vm1, %v3982_v62 }
  0x81   : > { %3679 = vmatprep.mubr.msk.bf16.mxu0 %vm660_vm1, %v3983_v63 }
  0x87   : > { %3568 = vmatmul.mubr.msk.bf16.gmra.mrb[56].mxu1 %vm660_vm1, %v3984_v0 }
  0x88   : > { %3680 = vmatmul.mubr.msk.bf16.gmra.mrb[20].mxu0 %vm660_vm1, %v3985_v1  ;;  %3571 = vmatprep.mubr.msk.bf16.mxu1 %vm660_vm1, %v3986_v2 }
  0x89   : > { %3683 = vmatprep.mubr.msk.bf16.mxu0 %vm660_vm1, %v3987_v3 }
  0x8f   : > { %3572 = vmatmul.mubr.msk.bf16.gmra.mrb[60].mxu1 %vm660_vm1, %v3988_v4 }
  0x90   : > { %3684 = vmatmul.mubr.msk.bf16.gmra.mrb[24].mxu0 %vm660_vm1, %v3989_v5  ;;  %3575 = vmatprep.mubr.msk.bf16.mxu1 %vm660_vm1, %v3990_v6 }
  0x91   : > { %3687 = vmatprep.mubr.msk.bf16.mxu0 %vm660_vm1, %v3991_v7 }
  0x97   : > { %3576 = vmatmul.mubr.msk.bf16.gmra.mrb[64].mxu1 %vm660_vm1, %v3992_v8 }
  0x98   : > { %3688 = vmatmul.mubr.msk.bf16.gmra.mrb[28].mxu0 %vm660_vm1, %v3993_v9  ;;  %3579 = vmatprep.mubr.msk.bf16.mxu1 %vm660_vm1, %v3994_v10 }
  0x99   : > { %3691 = vmatprep.mubr.msk.bf16.mxu0 %vm660_vm1, %v3995_v11 }
  0x9f   : > { %3580 = vmatmul.mubr.msk.bf16.gmra.mrb[68].mxu1 %vm660_vm1, %v3996_v12 }
  0xa0   : > { %3692 = vmatmul.mubr.msk.bf16.gmra.mrb[32].mxu0 %vm660_vm1, %v3997_v13  ;;  %3621 = vmatprep.mubr.msk.bf16.mxu1 %vm660_vm1, %v3998_v14 }
  0xa1   : > { %3695 = vmatprep.mubr.msk.bf16.mxu0 %vm660_vm1, %v3999_v15 }
  0xa7   : > { %3622 = vmatmul.mubr.msk.bf16.vlgmr.msra.gmra.mrb[36].mxu1 %vm660_vm1, %v4000_v16 }
  0xa8   : > { %3696 = vmatmul.mubr.msk.bf16.gmra.mrb[36].mxu0 %vm660_vm1, %v4001_v17  ;;  %3625 = vmatprep.mubr.msk.bf16.mxu1 %vm660_vm1, %v4002_v18 }
  0xa9   : > { %3699 = vmatprep.mubr.msk.bf16.mxu0 %vm660_vm1, %v4003_v19 }
  0xaf   : > { %3626 = vmatmul.mubr.msk.bf16.gmra.mrb[40].mxu1 %vm660_vm1, %v4004_v20 }
  0xb0   : > { %3700 = vmatmul.mubr.msk.bf16.gmra.mrb[40].mxu0 %vm660_vm1, %v4005_v21  ;;  %3629 = vmatprep.mubr.msk.bf16.mxu1 %vm660_vm1, %v4006_v22 }
  0xb1   : > { %3703 = vmatprep.mubr.msk.bf16.mxu0 %vm660_vm1, %v4007_v23  ;;  %v4454_v23 = vld [vmem:[%s4726_s3] ss:$0 sm:$0xff] }
  0xb7   : > { %3630 = vmatmul.mubr.msk.bf16.gmra.mrb[44].mxu1 %vm660_vm1, %v4008_v24 }
  0xb8   : > { %3704 = vmatmul.mubr.msk.bf16.gmra.mrb[44].mxu0 %vm660_vm1, %v4009_v25  ;;  %3633 = vmatprep.mubr.msk.bf16.mxu1 %vm660_vm1, %v4010_v26 }
  0xb9   : > { %3707 = vmatprep.mubr.msk.bf16.mxu0 %vm660_vm1, %v4011_v27 }
  0xbf   : > { %3634 = vmatmul.mubr.msk.bf16.gmra.mrb[48].mxu1 %vm660_vm1, %v4012_v28 }
  0xc0   : > { %3708 = vmatmul.mubr.msk.bf16.gmra.mrb[48].mxu0 %vm660_vm1, %v4013_v29  ;;  %3637 = vmatprep.mubr.msk.bf16.mxu1 %vm660_vm1, %v4014_v30 }
  0xc1   : > { %3711 = vmatprep.mubr.msk.bf16.mxu0 %vm660_vm1, %v4015_v31 }
  0xc7   : > { %3638 = vmatmul.mubr.msk.bf16.gmra.mrb[52].mxu1 %vm660_vm1, %v4016_v32 }
  0xc8   : > { %3712 = vmatmul.mubr.msk.bf16.gmra.mrb[52].mxu0 %vm660_vm1, %v4017_v33  ;;  %3641 = vmatprep.mubr.msk.bf16.mxu1 %vm660_vm1, %v4018_v34 }
  0xc9   : > { %3715 = vmatprep.mubr.msk.bf16.mxu0 %vm660_vm1, %v4019_v35 }
  0xcf   : > { %3642 = vmatmul.mubr.msk.bf16.gmra.mrb[56].mxu1 %vm660_vm1, %v4020_v36 }
  0xd0   : > { %3716 = vmatmul.mubr.msk.bf16.gmra.mrb[56].mxu0 %vm660_vm1, %v4021_v37  ;;  %3645 = vmatprep.mubr.msk.bf16.mxu1 %vm660_vm1, %v4022_v38 }
  0xd1   : > { %3719 = vmatprep.mubr.msk.bf16.mxu0 %vm660_vm1, %v4023_v39 }
  0xd7   : > { %3646 = vmatmul.mubr.msk.bf16.gmra.mrb[60].mxu1 %vm660_vm1, %v4024_v40 }
  0xd8   : > { %3720 = vmatmul.mubr.msk.bf16.gmra.mrb[60].mxu0 %vm660_vm1, %v4025_v41  ;;  %3649 = vmatprep.mubr.msk.bf16.mxu1 %vm660_vm1, %v4026_v42 }
  0xd9   : > { %3723 = vmatprep.mubr.msk.bf16.mxu0 %vm660_vm1, %v4027_v43 }
  0xdf   : > { %3650 = vmatmul.mubr.msk.bf16.gmra.mrb[64].mxu1 %vm660_vm1, %v4028_v44 }
  0xe0   : > { %3724 = vmatmul.mubr.msk.bf16.gmra.mrb[64].mxu0 %vm660_vm1, %v4029_v45  ;;  %3653 = vmatprep.mubr.msk.bf16.mxu1 %vm660_vm1, %v4030_v46 }
  0xe1   : > { %3727 = vmatprep.mubr.msk.bf16.mxu0 %vm660_vm1, %v4031_v47 }
  0xe7   : > { %3654 = vmatmul.mubr.msk.bf16.gmra.mrb[68].mxu1 %vm660_vm1, %v4032_v48 }
  0xe8   : > { %3728 = vmatmul.mubr.msk.bf16.gmra.mrb[68].mxu0 %vm660_vm1, %v4033_v49 }
  0xea   : > { %v3513_v50 = vpop.f32.mrb[0].mxu1 }
  0xeb   : > { %v807_v51 = vpop.f32.mrb[1].mxu1 }
  0xec   : > { %v3514_v52 = vpop.f32.mrb[2].mxu1 }
  0xed   : > { %v810_v53 = vpop.f32.mrb[3].mxu1 }
  0xf2   : > { %v3517_v54 = vpop.f32.mrb[4].mxu1 }
  0xf3   : > { %v4387_v55 = vpop.f32.mrb[5].mxu1 }
  0xf4   : > { %v4389_v56 = vpop.f32.mrb[6].mxu1 }
  0xf5   : > { %v4391_v57 = vpop.f32.mrb[7].mxu1 }
  0xfa   : > { %v4393_v58 = vpop.f32.mrb[8].mxu1 }
  0xfb   : > { %v4395_v59 = vpop.f32.mrb[9].mxu1 }
  0xfc   : > { %v4397_v60 = vpop.f32.mrb[10].mxu1 }
  0xfd   : > { %v4399_v61 = vpop.f32.mrb[11].mxu1 }
 0x102   : > { %v4401_v62 = vpop.f32.mrb[12].mxu1 }
 0x103   : > { %v4403_v63 = vpop.f32.mrb[13].mxu1 }
 0x104   : > { %v4405_v0 = vpop.f32.mrb[14].mxu1 }
 0x105   : > { %v4407_v1 = vpop.f32.mrb[15].mxu1 }
 0x10a   : > { %v4409_v2 = vpop.f32.mrb[16].mxu1 }
 0x10b   : > { %v4411_v3 = vpop.f32.mrb[17].mxu1 }
 0x10c   : > { %v4413_v4 = vpop.f32.mrb[18].mxu1 }
 0x10d   : > { %v4415_v5 = vpop.f32.mrb[19].mxu1 }
 0x112   : > { %v4417_v6 = vpop.f32.mrb[20].mxu1 }
 0x113   : > { %v4419_v7 = vpop.f32.mrb[21].mxu1 }
 0x114   : > { %v4421_v8 = vpop.f32.mrb[22].mxu1 }
 0x115   : > { %v4423_v9 = vpop.f32.mrb[23].mxu1 }
 0x11a   : > { %v4425_v10 = vpop.f32.mrb[24].mxu1 }
 0x11b   : > { %v4427_v11 = vpop.f32.mrb[25].mxu1 }
 0x11c   : > { %v4429_v12 = vpop.f32.mrb[26].mxu1 }
 0x11d   : > { %v4431_v13 = vpop.f32.mrb[27].mxu1 }
 0x122   : > { %v4433_v14 = vpop.f32.mrb[28].mxu1 }
 0x123   : > { %v4435_v15 = vpop.f32.mrb[29].mxu1 }
 0x124   : > { %v4437_v16 = vpop.f32.mrb[30].mxu1 }
 0x125   : > { %v4439_v17 = vpop.f32.mrb[31].mxu1 }
 0x12a   : > { %v4442_v18 = vpop.f32.mrb[32].mxu1 }
 0x12b   : > { %v4444_v19 = vpop.f32.mrb[33].mxu1 }
 0x12c   : > { %v4446_v20 = vpop.f32.mrb[34].mxu1 }
 0x12d   : > { %v4448_v21 = vpop.f32.mrb[35].mxu1 }
 0x133   : > { %v3661_v22 = vpop.f32.mrb[0].mxu0 }
 0x134   : > { %v3733_v24 = vadd.f32 %v3661_v22, %v3513_v50  ;;  %v2044_v25 = vpop.f32.mrb[1].mxu0 }
 0x135   : > { %v3734_v26 = vadd.f32 %v2044_v25, %v807_v51  ;;  %v3662_v27 = vpop.f32.mrb[2].mxu0 }
 0x136   : > { %v2412_v28 = vadd.f32 %v3733_v24, %v4454_v23  ;;  %v3735_v29 = vadd.f32 %v3662_v27, %v3514_v52  ;;  %v2047_v30 = vpop.f32.mrb[3].mxu0 }
 0x137   : > { %v2410_v31 = vadd.f32 %v3734_v26, %v4454_v23  ;;  %v3736_v32 = vadd.f32 %v2047_v30, %v810_v53 }
 0x138   : > { %v2484_v33 = vmax.f32 %v2412_v28, 0.0  ;;  %v2413_v34 = vadd.f32 %v3735_v29, %v4454_v23 }
 0x139   : > { %v2482_v35 = vmax.f32 %v2410_v31, 0.0  ;;  %v2411_v36 = vadd.f32 %v3736_v32, %v4454_v23 }
 0x13a   : > { %v3328_v37 = vpack.c.bf16 %v2484_v33, %v2484_v33  ;;  %v2485_v38 = vmax.f32 %v2413_v34, 0.0 }
 0x13b   : > { %v3326_v39 = vpack.c.bf16 %v2482_v35, %v2482_v35  ;;  %v2483_v40 = vmax.f32 %v2411_v36, 0.0  ;;  %v3665_v41 = vpop.f32.mrb[4].mxu0 }
 0x13c   : > { %2845 = vst.msk [vmem:[%s4462_s5 + $0x8] sm:$0xf] %vm2842_vm2, %v3328_v37  ;;  %v3329_v42 = vpack.c.bf16 %v2485_v38, %v2485_v38  ;;  %v3737_v43 = vadd.f32 %v3665_v41, %v3517_v54  ;;  %v2060_v44 = vpop.f32.mrb[5].mxu0 }
 0x13d   : > { %2843 = vst.msk [vmem:[%s4462_s5] sm:$0xf] %vm2842_vm2, %v3326_v39  ;;  %v3327_v45 = vpack.c.bf16 %v2483_v40, %v2483_v40  ;;  %v3738_v46 = vadd.f32 %v2060_v44, %v4387_v55  ;;  %v3666_v47 = vpop.f32.mrb[6].mxu0 }
 0x13e   : > { %2846 = vst.msk [vmem:[%s4462_s5 + $0xc] sm:$0xf] %vm2842_vm2, %v3329_v42  ;;  %v2416_v48 = vadd.f32 %v3737_v43, %v4454_v23  ;;  %v3739_v49 = vadd.f32 %v3666_v47, %v4389_v56  ;;  %v2063_v50 = vpop.f32.mrb[7].mxu0 }
 0x13f   : > { %2844 = vst.msk [vmem:[%s4462_s5 + $0x4] sm:$0xf] %vm2842_vm2, %v3327_v45  ;;  %v2414_v51 = vadd.f32 %v3738_v46, %v4454_v23  ;;  %v3740_v52 = vadd.f32 %v2063_v50, %v4391_v57 }
 0x140   : > { %v2488_v53 = vmax.f32 %v2416_v48, 0.0  ;;  %v2417_v54 = vadd.f32 %v3739_v49, %v4454_v23 }
 0x141   : > { %v2486_v55 = vmax.f32 %v2414_v51, 0.0  ;;  %v2415_v22 = vadd.f32 %v3740_v52, %v4454_v23 }
 0x142   : > { %v3332_v24 = vpack.c.bf16 %v2488_v53, %v2488_v53  ;;  %v2489_v25 = vmax.f32 %v2417_v54, 0.0 }
 0x143   : > { %v3330_v26 = vpack.c.bf16 %v2486_v55, %v2486_v55  ;;  %v2487_v56 = vmax.f32 %v2415_v22, 0.0  ;;  %v3669_v27 = vpop.f32.mrb[8].mxu0 }
 0x144   : > { %2849 = vst.msk [vmem:[%s4462_s5 + $0x18] sm:$0xf] %vm2842_vm2, %v3332_v24  ;;  %v3333_v28 = vpack.c.bf16 %v2489_v25, %v2489_v25  ;;  %v3741_v29 = vadd.f32 %v3669_v27, %v4393_v58  ;;  %v2076_v30 = vpop.f32.mrb[9].mxu0 }
 0x145   : > { %2847 = vst.msk [vmem:[%s4462_s5 + $0x10] sm:$0xf] %vm2842_vm2, %v3330_v26  ;;  %v3331_v57 = vpack.c.bf16 %v2487_v56, %v2487_v56  ;;  %v3742_v31 = vadd.f32 %v2076_v30, %v4395_v59  ;;  %v3670_v32 = vpop.f32.mrb[10].mxu0 }
 0x146   : > { %2850 = vst.msk [vmem:[%s4462_s5 + $0x1c] sm:$0xf] %vm2842_vm2, %v3333_v28  ;;  %v2420_v33 = vadd.f32 %v3741_v29, %v4454_v23  ;;  %v3743_v34 = vadd.f32 %v3670_v32, %v4397_v60  ;;  %v2079_v35 = vpop.f32.mrb[11].mxu0 }
 0x147   : > { %2848 = vst.msk [vmem:[%s4462_s5 + $0x14] sm:$0xf] %vm2842_vm2, %v3331_v57  ;;  %v2418_v58 = vadd.f32 %v3742_v31, %v4454_v23  ;;  %v3744_v36 = vadd.f32 %v2079_v35, %v4399_v61 }
 0x148   : > { %v2492_v37 = vmax.f32 %v2420_v33, 0.0  ;;  %v2421_v38 = vadd.f32 %v3743_v34, %v4454_v23 }
 0x149   : > { %v2490_v59 = vmax.f32 %v2418_v58, 0.0  ;;  %v2419_v39 = vadd.f32 %v3744_v36, %v4454_v23 }
 0x14a   : > { %v3336_v40 = vpack.c.bf16 %v2492_v37, %v2492_v37  ;;  %v2493_v41 = vmax.f32 %v2421_v38, 0.0 }
 0x14b   : > { %v3334_v42 = vpack.c.bf16 %v2490_v59, %v2490_v59  ;;  %v2491_v60 = vmax.f32 %v2419_v39, 0.0  ;;  %v3673_v43 = vpop.f32.mrb[12].mxu0 }
 0x14c   : > { %2853 = vst.msk [vmem:[%s4462_s5 + $0x28] sm:$0xf] %vm2842_vm2, %v3336_v40  ;;  %v3337_v44 = vpack.c.bf16 %v2493_v41, %v2493_v41  ;;  %v3745_v45 = vadd.f32 %v3673_v43, %v4401_v62  ;;  %v2092_v46 = vpop.f32.mrb[13].mxu0 }
 0x14d   : > { %2851 = vst.msk [vmem:[%s4462_s5 + $0x20] sm:$0xf] %vm2842_vm2, %v3334_v42  ;;  %v3335_v61 = vpack.c.bf16 %v2491_v60, %v2491_v60  ;;  %v3746_v47 = vadd.f32 %v2092_v46, %v4403_v63  ;;  %v3674_v48 = vpop.f32.mrb[14].mxu0 }
 0x14e   : > { %2854 = vst.msk [vmem:[%s4462_s5 + $0x2c] sm:$0xf] %vm2842_vm2, %v3337_v44  ;;  %v2424_v49 = vadd.f32 %v3745_v45, %v4454_v23  ;;  %v3747_v50 = vadd.f32 %v3674_v48, %v4405_v0  ;;  %v2095_v51 = vpop.f32.mrb[15].mxu0 }
 0x14f   : > { %2852 = vst.msk [vmem:[%s4462_s5 + $0x24] sm:$0xf] %vm2842_vm2, %v3335_v61  ;;  %v2422_v62 = vadd.f32 %v3746_v47, %v4454_v23  ;;  %v3748_v52 = vadd.f32 %v2095_v51, %v4407_v1 }
 0x150   : > { %v2496_v53 = vmax.f32 %v2424_v49, 0.0  ;;  %v2425_v54 = vadd.f32 %v3747_v50, %v4454_v23 }
 0x151   : > { %v2494_v63 = vmax.f32 %v2422_v62, 0.0  ;;  %v2423_v55 = vadd.f32 %v3748_v52, %v4454_v23 }
 0x152   : > { %v3340_v22 = vpack.c.bf16 %v2496_v53, %v2496_v53  ;;  %v2497_v24 = vmax.f32 %v2425_v54, 0.0 }
 0x153   : > { %v3338_v25 = vpack.c.bf16 %v2494_v63, %v2494_v63  ;;  %v2495_v0 = vmax.f32 %v2423_v55, 0.0  ;;  %v3677_v26 = vpop.f32.mrb[16].mxu0 }
 0x154   : > { %2857 = vst.msk [vmem:[%s4462_s5 + $0x38] sm:$0xf] %vm2842_vm2, %v3340_v22  ;;  %v3341_v56 = vpack.c.bf16 %v2497_v24, %v2497_v24  ;;  %v3749_v27 = vadd.f32 %v3677_v26, %v4409_v2  ;;  %v2108_v28 = vpop.f32.mrb[17].mxu0 }
 0x155   : > { %2855 = vst.msk [vmem:[%s4462_s5 + $0x30] sm:$0xf] %vm2842_vm2, %v3338_v25  ;;  %v3339_v1 = vpack.c.bf16 %v2495_v0, %v2495_v0  ;;  %v3750_v29 = vadd.f32 %v2108_v28, %v4411_v3  ;;  %v3678_v30 = vpop.f32.mrb[18].mxu0 }
 0x156   : > { %2858 = vst.msk [vmem:[%s4462_s5 + $0x3c] sm:$0xf] %vm2842_vm2, %v3341_v56  ;;  %v2428_v57 = vadd.f32 %v3749_v27, %v4454_v23  ;;  %v3751_v31 = vadd.f32 %v3678_v30, %v4413_v4  ;;  %v2111_v32 = vpop.f32.mrb[19].mxu0 }
 0x157   : > { %2856 = vst.msk [vmem:[%s4462_s5 + $0x34] sm:$0xf] %vm2842_vm2, %v3339_v1  ;;  %v2426_v2 = vadd.f32 %v3750_v29, %v4454_v23  ;;  %v3752_v33 = vadd.f32 %v2111_v32, %v4415_v5 }
 0x158   : > { %v2500_v34 = vmax.f32 %v2428_v57, 0.0  ;;  %v2429_v35 = vadd.f32 %v3751_v31, %v4454_v23 }
 0x159   : > { %v2498_v3 = vmax.f32 %v2426_v2, 0.0  ;;  %v2427_v58 = vadd.f32 %v3752_v33, %v4454_v23 }
 0x15a   : > { %v3344_v36 = vpack.c.bf16 %v2500_v34, %v2500_v34  ;;  %v2501_v37 = vmax.f32 %v2429_v35, 0.0 }
 0x15b   : > { %v3342_v38 = vpack.c.bf16 %v2498_v3, %v2498_v3  ;;  %v2499_v4 = vmax.f32 %v2427_v58, 0.0  ;;  %v3681_v59 = vpop.f32.mrb[20].mxu0 }
 0x15c   : > { %2861 = vst.msk [vmem:[%s4462_s5 + $0x48] sm:$0xf] %vm2842_vm2, %v3344_v36  ;;  %v3345_v39 = vpack.c.bf16 %v2501_v37, %v2501_v37  ;;  %v3753_v40 = vadd.f32 %v3681_v59, %v4417_v6  ;;  %v2124_v41 = vpop.f32.mrb[21].mxu0 }
 0x15d   : > { %2859 = vst.msk [vmem:[%s4462_s5 + $0x40] sm:$0xf] %vm2842_vm2, %v3342_v38  ;;  %v3343_v5 = vpack.c.bf16 %v2499_v4, %v2499_v4  ;;  %v3754_v42 = vadd.f32 %v2124_v41, %v4419_v7  ;;  %v3682_v60 = vpop.f32.mrb[22].mxu0 }
 0x15e   : > { %2862 = vst.msk [vmem:[%s4462_s5 + $0x4c] sm:$0xf] %vm2842_vm2, %v3345_v39  ;;  %v2432_v43 = vadd.f32 %v3753_v40, %v4454_v23  ;;  %v3755_v44 = vadd.f32 %v3682_v60, %v4421_v8  ;;  %v2127_v45 = vpop.f32.mrb[23].mxu0 }
 0x15f   : > { %2860 = vst.msk [vmem:[%s4462_s5 + $0x44] sm:$0xf] %vm2842_vm2, %v3343_v5  ;;  %v2430_v6 = vadd.f32 %v3754_v42, %v4454_v23  ;;  %v3756_v46 = vadd.f32 %v2127_v45, %v4423_v9 }
 0x160   : > { %v2504_v61 = vmax.f32 %v2432_v43, 0.0  ;;  %v2433_v47 = vadd.f32 %v3755_v44, %v4454_v23 }
 0x161   : > { %v2502_v7 = vmax.f32 %v2430_v6, 0.0  ;;  %v2431_v48 = vadd.f32 %v3756_v46, %v4454_v23 }
 0x162   : > { %v3348_v49 = vpack.c.bf16 %v2504_v61, %v2504_v61  ;;  %v2505_v50 = vmax.f32 %v2433_v47, 0.0 }
 0x163   : > { %v3346_v51 = vpack.c.bf16 %v2502_v7, %v2502_v7  ;;  %v2503_v8 = vmax.f32 %v2431_v48, 0.0  ;;  %v3685_v62 = vpop.f32.mrb[24].mxu0 }
 0x164   : > { %2865 = vst.msk [vmem:[%s4462_s5 + $0x58] sm:$0xf] %vm2842_vm2, %v3348_v49  ;;  %v3349_v52 = vpack.c.bf16 %v2505_v50, %v2505_v50  ;;  %v3757_v53 = vadd.f32 %v3685_v62, %v4425_v10  ;;  %v2140_v54 = vpop.f32.mrb[25].mxu0 }
 0x165   : > { %2863 = vst.msk [vmem:[%s4462_s5 + $0x50] sm:$0xf] %vm2842_vm2, %v3346_v51  ;;  %v3347_v9 = vpack.c.bf16 %v2503_v8, %v2503_v8  ;;  %v3758_v63 = vadd.f32 %v2140_v54, %v4427_v11  ;;  %v3686_v55 = vpop.f32.mrb[26].mxu0 }
 0x166   : > { %2866 = vst.msk [vmem:[%s4462_s5 + $0x5c] sm:$0xf] %vm2842_vm2, %v3349_v52  ;;  %v2436_v22 = vadd.f32 %v3757_v53, %v4454_v23  ;;  %v3759_v24 = vadd.f32 %v3686_v55, %v4429_v12  ;;  %v2143_v25 = vpop.f32.mrb[27].mxu0 }
 0x167   : > { %2864 = vst.msk [vmem:[%s4462_s5 + $0x54] sm:$0xf] %vm2842_vm2, %v3347_v9  ;;  %v2434_v10 = vadd.f32 %v3758_v63, %v4454_v23  ;;  %v3760_v0 = vadd.f32 %v2143_v25, %v4431_v13 }
 0x168   : > { %v2508_v26 = vmax.f32 %v2436_v22, 0.0  ;;  %v2437_v56 = vadd.f32 %v3759_v24, %v4454_v23 }
 0x169   : > { %v2506_v11 = vmax.f32 %v2434_v10, 0.0  ;;  %v2435_v27 = vadd.f32 %v3760_v0, %v4454_v23 }
 0x16a   : > { %v3352_v28 = vpack.c.bf16 %v2508_v26, %v2508_v26  ;;  %v2509_v1 = vmax.f32 %v2437_v56, 0.0 }
 0x16b   : > { %v3350_v29 = vpack.c.bf16 %v2506_v11, %v2506_v11  ;;  %v2507_v12 = vmax.f32 %v2435_v27, 0.0  ;;  %v3689_v30 = vpop.f32.mrb[28].mxu0 }
 0x16c   : > { %2869 = vst.msk [vmem:[%s4462_s5 + $0x68] sm:$0xf] %vm2842_vm2, %v3352_v28  ;;  %v3353_v57 = vpack.c.bf16 %v2509_v1, %v2509_v1  ;;  %v3761_v31 = vadd.f32 %v3689_v30, %v4433_v14  ;;  %v2156_v32 = vpop.f32.mrb[29].mxu0 }
 0x16d   : > { %2867 = vst.msk [vmem:[%s4462_s5 + $0x60] sm:$0xf] %vm2842_vm2, %v3350_v29  ;;  %v3351_v13 = vpack.c.bf16 %v2507_v12, %v2507_v12  ;;  %v3762_v2 = vadd.f32 %v2156_v32, %v4435_v15  ;;  %v3690_v33 = vpop.f32.mrb[30].mxu0 }
 0x16e   : > { %2870 = vst.msk [vmem:[%s4462_s5 + $0x6c] sm:$0xf] %vm2842_vm2, %v3353_v57  ;;  %v2440_v34 = vadd.f32 %v3761_v31, %v4454_v23  ;;  %v3763_v35 = vadd.f32 %v3690_v33, %v4437_v16  ;;  %v2159_v3 = vpop.f32.mrb[31].mxu0 }
 0x16f   : > { %2868 = vst.msk [vmem:[%s4462_s5 + $0x64] sm:$0xf] %vm2842_vm2, %v3351_v13  ;;  %v2438_v14 = vadd.f32 %v3762_v2, %v4454_v23  ;;  %v3764_v58 = vadd.f32 %v2159_v3, %v4439_v17 }
 0x170   : > { %v2512_v36 = vmax.f32 %v2440_v34, 0.0  ;;  %v2441_v37 = vadd.f32 %v3763_v35, %v4454_v23 }
 0x171   : > { %v2510_v15 = vmax.f32 %v2438_v14, 0.0  ;;  %v2439_v38 = vadd.f32 %v3764_v58, %v4454_v23 }
 0x172   : > { %v3356_v4 = vpack.c.bf16 %v2512_v36, %v2512_v36  ;;  %v2513_v59 = vmax.f32 %v2441_v37, 0.0 }
 0x173   : > { %v3354_v39 = vpack.c.bf16 %v2510_v15, %v2510_v15  ;;  %v2511_v16 = vmax.f32 %v2439_v38, 0.0  ;;  %v3693_v40 = vpop.f32.mrb[32].mxu0 }
 0x174   : > { %2873 = vst.msk [vmem:[%s4462_s5 + $0x78] sm:$0xf] %vm2842_vm2, %v3356_v4  ;;  %v3357_v41 = vpack.c.bf16 %v2513_v59, %v2513_v59  ;;  %v3765_v5 = vadd.f32 %v3693_v40, %v4442_v18  ;;  %v2172_v42 = vpop.f32.mrb[33].mxu0 }
 0x175   : > { %2871 = vst.msk [vmem:[%s4462_s5 + $0x70] sm:$0xf] %vm2842_vm2, %v3354_v39  ;;  %v3355_v17 = vpack.c.bf16 %v2511_v16, %v2511_v16  ;;  %v3766_v60 = vadd.f32 %v2172_v42, %v4444_v19  ;;  %v3694_v43 = vpop.f32.mrb[34].mxu0 }
 0x176   : > { %2874 = vst.msk [vmem:[%s4462_s5 + $0x7c] sm:$0xf] %vm2842_vm2, %v3357_v41  ;;  %v2444_v44 = vadd.f32 %v3765_v5, %v4454_v23  ;;  %v3767_v45 = vadd.f32 %v3694_v43, %v4446_v20  ;;  %v2175_v6 = vpop.f32.mrb[35].mxu0 }
 0x177   : > { %2872 = vst.msk [vmem:[%s4462_s5 + $0x74] sm:$0xf] %vm2842_vm2, %v3355_v17  ;;  %v2442_v46 = vadd.f32 %v3766_v60, %v4454_v23  ;;  %v3768_v18 = vadd.f32 %v2175_v6, %v4448_v21 }
 0x178   : > { %v2516_v61 = vmax.f32 %v2444_v44, 0.0  ;;  %v2445_v47 = vadd.f32 %v3767_v45, %v4454_v23 }
 0x179   : > { %v2514_v19 = vmax.f32 %v2442_v46, 0.0  ;;  %v2443_v7 = vadd.f32 %v3768_v18, %v4454_v23 }
 0x17a   : > { %v3360_v48 = vpack.c.bf16 %v2516_v61, %v2516_v61  ;;  %v2517_v49 = vmax.f32 %v2445_v47, 0.0  ;;  %v3623_v50 = vpop.f32.mrb[36].mxu1 }
 0x17b   : > { %v3358_v20 = vpack.c.bf16 %v2514_v19, %v2514_v19  ;;  %v2515_v51 = vmax.f32 %v2443_v7, 0.0  ;;  %v3697_v8 = vpop.f32.mrb[36].mxu0  ;;  %v1568_v62 = vpop.f32.mrb[37].mxu1 }
 0x17c   : > { %2877 = vst.msk [vmem:[%s4462_s5 + $0x88] sm:$0xf] %vm2842_vm2, %v3360_v48  ;;  %v3361_v52 = vpack.c.bf16 %v2517_v49, %v2517_v49  ;;  %v3769_v21 = vadd.f32 %v3697_v8, %v3623_v50  ;;  %v2188_v53 = vpop.f32.mrb[37].mxu0  ;;  %v3624_v54 = vpop.f32.mrb[38].mxu1 }
 0x17d   : > { %2875 = vst.msk [vmem:[%s4462_s5 + $0x80] sm:$0xf] %vm2842_vm2, %v3358_v20  ;;  %v3359_v9 = vpack.c.bf16 %v2515_v51, %v2515_v51  ;;  %v3770_v63 = vadd.f32 %v2188_v53, %v1568_v62  ;;  %v3698_v55 = vpop.f32.mrb[38].mxu0  ;;  %v1571_v22 = vpop.f32.mrb[39].mxu1 }
 0x17e   : > { %2878 = vst.msk [vmem:[%s4462_s5 + $0x8c] sm:$0xf] %vm2842_vm2, %v3361_v52  ;;  %v2448_v24 = vadd.f32 %v3769_v21, %v4454_v23  ;;  %v3771_v25 = vadd.f32 %v3698_v55, %v3624_v54  ;;  %v2191_v10 = vpop.f32.mrb[39].mxu0 }
 0x17f   : > { %2876 = vst.msk [vmem:[%s4462_s5 + $0x84] sm:$0xf] %vm2842_vm2, %v3359_v9  ;;  %v2446_v0 = vadd.f32 %v3770_v63, %v4454_v23  ;;  %v3772_v26 = vadd.f32 %v2191_v10, %v1571_v22 }
 0x180   : > { %v2520_v56 = vmax.f32 %v2448_v24, 0.0  ;;  %v2449_v11 = vadd.f32 %v3771_v25, %v4454_v23 }
 0x181   : > { %v2518_v27 = vmax.f32 %v2446_v0, 0.0  ;;  %v2447_v28 = vadd.f32 %v3772_v26, %v4454_v23 }
 0x182   : > { %v3364_v1 = vpack.c.bf16 %v2520_v56, %v2520_v56  ;;  %v2521_v29 = vmax.f32 %v2449_v11, 0.0  ;;  %v3627_v12 = vpop.f32.mrb[40].mxu1 }
 0x183   : > { %v3362_v30 = vpack.c.bf16 %v2518_v27, %v2518_v27  ;;  %v2519_v57 = vmax.f32 %v2447_v28, 0.0  ;;  %v3701_v31 = vpop.f32.mrb[40].mxu0  ;;  %v1584_v32 = vpop.f32.mrb[41].mxu1 }
 0x184   : > { %2881 = vst.msk [vmem:[%s4462_s5 + $0x98] sm:$0xf] %vm2842_vm2, %v3364_v1  ;;  %v3365_v13 = vpack.c.bf16 %v2521_v29, %v2521_v29  ;;  %v3773_v2 = vadd.f32 %v3701_v31, %v3627_v12  ;;  %v2204_v33 = vpop.f32.mrb[41].mxu0  ;;  %v3628_v34 = vpop.f32.mrb[42].mxu1 }
 0x185   : > { %2879 = vst.msk [vmem:[%s4462_s5 + $0x90] sm:$0xf] %vm2842_vm2, %v3362_v30  ;;  %v3363_v35 = vpack.c.bf16 %v2519_v57, %v2519_v57  ;;  %v3774_v3 = vadd.f32 %v2204_v33, %v1584_v32  ;;  %v3702_v14 = vpop.f32.mrb[42].mxu0  ;;  %v1587_v58 = vpop.f32.mrb[43].mxu1 }
 0x186   : > { %2882 = vst.msk [vmem:[%s4462_s5 + $0x9c] sm:$0xf] %vm2842_vm2, %v3365_v13  ;;  %v2452_v36 = vadd.f32 %v3773_v2, %v4454_v23  ;;  %v3775_v37 = vadd.f32 %v3702_v14, %v3628_v34  ;;  %v2207_v15 = vpop.f32.mrb[43].mxu0 }
 0x187   : > { %2880 = vst.msk [vmem:[%s4462_s5 + $0x94] sm:$0xf] %vm2842_vm2, %v3363_v35  ;;  %v2450_v38 = vadd.f32 %v3774_v3, %v4454_v23  ;;  %v3776_v4 = vadd.f32 %v2207_v15, %v1587_v58 }
 0x188   : > { %v2524_v59 = vmax.f32 %v2452_v36, 0.0  ;;  %v2453_v39 = vadd.f32 %v3775_v37, %v4454_v23 }
 0x189   : > { %v2522_v16 = vmax.f32 %v2450_v38, 0.0  ;;  %v2451_v40 = vadd.f32 %v3776_v4, %v4454_v23 }
 0x18a   : > { %v3368_v41 = vpack.c.bf16 %v2524_v59, %v2524_v59  ;;  %v2525_v5 = vmax.f32 %v2453_v39, 0.0  ;;  %v3631_v42 = vpop.f32.mrb[44].mxu1 }
 0x18b   : > { %v3366_v17 = vpack.c.bf16 %v2522_v16, %v2522_v16  ;;  %v2523_v60 = vmax.f32 %v2451_v40, 0.0  ;;  %v3705_v43 = vpop.f32.mrb[44].mxu0  ;;  %v1600_v44 = vpop.f32.mrb[45].mxu1 }
 0x18c   : > { %2885 = vst.msk [vmem:[%s4462_s5 + $0xa8] sm:$0xf] %vm2842_vm2, %v3368_v41  ;;  %v3369_v45 = vpack.c.bf16 %v2525_v5, %v2525_v5  ;;  %v3777_v6 = vadd.f32 %v3705_v43, %v3631_v42  ;;  %v2220_v46 = vpop.f32.mrb[45].mxu0  ;;  %v3632_v18 = vpop.f32.mrb[46].mxu1 }
 0x18d   : > { %2883 = vst.msk [vmem:[%s4462_s5 + $0xa0] sm:$0xf] %vm2842_vm2, %v3366_v17  ;;  %v3367_v61 = vpack.c.bf16 %v2523_v60, %v2523_v60  ;;  %v3778_v47 = vadd.f32 %v2220_v46, %v1600_v44  ;;  %v3706_v19 = vpop.f32.mrb[46].mxu0  ;;  %v1603_v7 = vpop.f32.mrb[47].mxu1 }
 0x18e   : > { %2886 = vst.msk [vmem:[%s4462_s5 + $0xac] sm:$0xf] %vm2842_vm2, %v3369_v45  ;;  %v2456_v48 = vadd.f32 %v3777_v6, %v4454_v23  ;;  %v3779_v49 = vadd.f32 %v3706_v19, %v3632_v18  ;;  %v2223_v50 = vpop.f32.mrb[47].mxu0 }
 0x18f   : > { %2884 = vst.msk [vmem:[%s4462_s5 + $0xa4] sm:$0xf] %vm2842_vm2, %v3367_v61  ;;  %v2454_v20 = vadd.f32 %v3778_v47, %v4454_v23  ;;  %v3780_v51 = vadd.f32 %v2223_v50, %v1603_v7 }
 0x190   : > { %v2528_v8 = vmax.f32 %v2456_v48, 0.0  ;;  %v2457_v62 = vadd.f32 %v3779_v49, %v4454_v23 }
 0x191   : > { %v2526_v52 = vmax.f32 %v2454_v20, 0.0  ;;  %v2455_v21 = vadd.f32 %v3780_v51, %v4454_v23 }
 0x192   : > { %v3372_v53 = vpack.c.bf16 %v2528_v8, %v2528_v8  ;;  %v2529_v54 = vmax.f32 %v2457_v62, 0.0  ;;  %v3635_v9 = vpop.f32.mrb[48].mxu1 }
 0x193   : > { %v3370_v63 = vpack.c.bf16 %v2526_v52, %v2526_v52  ;;  %v2527_v55 = vmax.f32 %v2455_v21, 0.0  ;;  %v3709_v22 = vpop.f32.mrb[48].mxu0  ;;  %v1616_v24 = vpop.f32.mrb[49].mxu1 }
 0x194   : > { %2889 = vst.msk [vmem:[%s4462_s5 + $0xb8] sm:$0xf] %vm2842_vm2, %v3372_v53  ;;  %v3373_v25 = vpack.c.bf16 %v2529_v54, %v2529_v54  ;;  %v3781_v10 = vadd.f32 %v3709_v22, %v3635_v9  ;;  %v2236_v0 = vpop.f32.mrb[49].mxu0  ;;  %v3636_v26 = vpop.f32.mrb[50].mxu1 }
 0x195   : > { %2887 = vst.msk [vmem:[%s4462_s5 + $0xb0] sm:$0xf] %vm2842_vm2, %v3370_v63  ;;  %v3371_v56 = vpack.c.bf16 %v2527_v55, %v2527_v55  ;;  %v3782_v11 = vadd.f32 %v2236_v0, %v1616_v24  ;;  %v3710_v27 = vpop.f32.mrb[50].mxu0  ;;  %v1619_v28 = vpop.f32.mrb[51].mxu1 }
 0x196   : > { %2890 = vst.msk [vmem:[%s4462_s5 + $0xbc] sm:$0xf] %vm2842_vm2, %v3373_v25  ;;  %v2460_v1 = vadd.f32 %v3781_v10, %v4454_v23  ;;  %v3783_v29 = vadd.f32 %v3710_v27, %v3636_v26  ;;  %v2239_v12 = vpop.f32.mrb[51].mxu0 }
 0x197   : > { %2888 = vst.msk [vmem:[%s4462_s5 + $0xb4] sm:$0xf] %vm2842_vm2, %v3371_v56  ;;  %v2458_v30 = vadd.f32 %v3782_v11, %v4454_v23  ;;  %v3784_v57 = vadd.f32 %v2239_v12, %v1619_v28 }
 0x198   : > { %v2532_v31 = vmax.f32 %v2460_v1, 0.0  ;;  %v2461_v32 = vadd.f32 %v3783_v29, %v4454_v23 }
 0x199   : > { %v2530_v13 = vmax.f32 %v2458_v30, 0.0  ;;  %v2459_v2 = vadd.f32 %v3784_v57, %v4454_v23 }
 0x19a   : > { %v3376_v33 = vpack.c.bf16 %v2532_v31, %v2532_v31  ;;  %v2533_v34 = vmax.f32 %v2461_v32, 0.0  ;;  %v3639_v35 = vpop.f32.mrb[52].mxu1 }
 0x19b   : > { %v3374_v3 = vpack.c.bf16 %v2530_v13, %v2530_v13  ;;  %v2531_v14 = vmax.f32 %v2459_v2, 0.0  ;;  %v3713_v58 = vpop.f32.mrb[52].mxu0  ;;  %v1632_v36 = vpop.f32.mrb[53].mxu1 }
 0x19c   : > { %2893 = vst.msk [vmem:[%s4462_s5 + $0xc8] sm:$0xf] %vm2842_vm2, %v3376_v33  ;;  %v3377_v37 = vpack.c.bf16 %v2533_v34, %v2533_v34  ;;  %v3785_v15 = vadd.f32 %v3713_v58, %v3639_v35  ;;  %v2252_v38 = vpop.f32.mrb[53].mxu0  ;;  %v3640_v4 = vpop.f32.mrb[54].mxu1 }
 0x19d   : > { %2891 = vst.msk [vmem:[%s4462_s5 + $0xc0] sm:$0xf] %vm2842_vm2, %v3374_v3  ;;  %v3375_v59 = vpack.c.bf16 %v2531_v14, %v2531_v14  ;;  %v3786_v39 = vadd.f32 %v2252_v38, %v1632_v36  ;;  %v3714_v16 = vpop.f32.mrb[54].mxu0  ;;  %v1635_v40 = vpop.f32.mrb[55].mxu1 }
 0x19e   : > { %2894 = vst.msk [vmem:[%s4462_s5 + $0xcc] sm:$0xf] %vm2842_vm2, %v3377_v37  ;;  %v2464_v41 = vadd.f32 %v3785_v15, %v4454_v23  ;;  %v3787_v5 = vadd.f32 %v3714_v16, %v3640_v4  ;;  %v2255_v42 = vpop.f32.mrb[55].mxu0 }
 0x19f   : > { %2892 = vst.msk [vmem:[%s4462_s5 + $0xc4] sm:$0xf] %vm2842_vm2, %v3375_v59  ;;  %v2462_v17 = vadd.f32 %v3786_v39, %v4454_v23  ;;  %v3788_v60 = vadd.f32 %v2255_v42, %v1635_v40 }
 0x1a0   : > { %v2536_v43 = vmax.f32 %v2464_v41, 0.0  ;;  %v2465_v44 = vadd.f32 %v3787_v5, %v4454_v23 }
 0x1a1   : > { %v2534_v45 = vmax.f32 %v2462_v17, 0.0  ;;  %v2463_v6 = vadd.f32 %v3788_v60, %v4454_v23 }
 0x1a2   : > { %v3380_v46 = vpack.c.bf16 %v2536_v43, %v2536_v43  ;;  %v2537_v18 = vmax.f32 %v2465_v44, 0.0  ;;  %v3643_v61 = vpop.f32.mrb[56].mxu1 }
 0x1a3   : > { %v3378_v47 = vpack.c.bf16 %v2534_v45, %v2534_v45  ;;  %v2535_v19 = vmax.f32 %v2463_v6, 0.0  ;;  %v3717_v7 = vpop.f32.mrb[56].mxu0  ;;  %v1648_v48 = vpop.f32.mrb[57].mxu1 }
 0x1a4   : > { %2897 = vst.msk [vmem:[%s4462_s5 + $0xd8] sm:$0xf] %vm2842_vm2, %v3380_v46  ;;  %v3381_v49 = vpack.c.bf16 %v2537_v18, %v2537_v18  ;;  %v3789_v50 = vadd.f32 %v3717_v7, %v3643_v61  ;;  %v2268_v20 = vpop.f32.mrb[57].mxu0  ;;  %v3644_v51 = vpop.f32.mrb[58].mxu1 }
 0x1a5   : > { %2895 = vst.msk [vmem:[%s4462_s5 + $0xd0] sm:$0xf] %vm2842_vm2, %v3378_v47  ;;  %v3379_v8 = vpack.c.bf16 %v2535_v19, %v2535_v19  ;;  %v3790_v62 = vadd.f32 %v2268_v20, %v1648_v48  ;;  %v3718_v52 = vpop.f32.mrb[58].mxu0  ;;  %v1651_v21 = vpop.f32.mrb[59].mxu1 }
 0x1a6   : > { %2898 = vst.msk [vmem:[%s4462_s5 + $0xdc] sm:$0xf] %vm2842_vm2, %v3381_v49  ;;  %v2468_v53 = vadd.f32 %v3789_v50, %v4454_v23  ;;  %v3791_v54 = vadd.f32 %v3718_v52, %v3644_v51  ;;  %v2271_v9 = vpop.f32.mrb[59].mxu0 }
 0x1a7   : > { %2896 = vst.msk [vmem:[%s4462_s5 + $0xd4] sm:$0xf] %vm2842_vm2, %v3379_v8  ;;  %v2466_v63 = vadd.f32 %v3790_v62, %v4454_v23  ;;  %v3792_v55 = vadd.f32 %v2271_v9, %v1651_v21 }
 0x1a8   : > { %v2540_v22 = vmax.f32 %v2468_v53, 0.0  ;;  %v2469_v24 = vadd.f32 %v3791_v54, %v4454_v23 }
 0x1a9   : > { %v2538_v25 = vmax.f32 %v2466_v63, 0.0  ;;  %v2467_v10 = vadd.f32 %v3792_v55, %v4454_v23 }
 0x1aa   : > { %v3384_v0 = vpack.c.bf16 %v2540_v22, %v2540_v22  ;;  %v2541_v26 = vmax.f32 %v2469_v24, 0.0  ;;  %v3647_v56 = vpop.f32.mrb[60].mxu1 }
 0x1ab   : > { %v3382_v11 = vpack.c.bf16 %v2538_v25, %v2538_v25  ;;  %v2539_v27 = vmax.f32 %v2467_v10, 0.0  ;;  %v3721_v28 = vpop.f32.mrb[60].mxu0  ;;  %v1664_v1 = vpop.f32.mrb[61].mxu1 }
 0x1ac   : > { %2901 = vst.msk [vmem:[%s4462_s5 + $0xe8] sm:$0xf] %vm2842_vm2, %v3384_v0  ;;  %v3385_v29 = vpack.c.bf16 %v2541_v26, %v2541_v26  ;;  %v3793_v12 = vadd.f32 %v3721_v28, %v3647_v56  ;;  %v2284_v30 = vpop.f32.mrb[61].mxu0  ;;  %v3648_v57 = vpop.f32.mrb[62].mxu1 }
 0x1ad   : > { %2899 = vst.msk [vmem:[%s4462_s5 + $0xe0] sm:$0xf] %vm2842_vm2, %v3382_v11  ;;  %v3383_v31 = vpack.c.bf16 %v2539_v27, %v2539_v27  ;;  %v3794_v32 = vadd.f32 %v2284_v30, %v1664_v1  ;;  %v3722_v13 = vpop.f32.mrb[62].mxu0  ;;  %v1667_v2 = vpop.f32.mrb[63].mxu1 }
 0x1ae   : > { %2902 = vst.msk [vmem:[%s4462_s5 + $0xec] sm:$0xf] %vm2842_vm2, %v3385_v29  ;;  %v2472_v33 = vadd.f32 %v3793_v12, %v4454_v23  ;;  %v3795_v34 = vadd.f32 %v3722_v13, %v3648_v57  ;;  %v2287_v35 = vpop.f32.mrb[63].mxu0 }
 0x1af   : > { %2900 = vst.msk [vmem:[%s4462_s5 + $0xe4] sm:$0xf] %vm2842_vm2, %v3383_v31  ;;  %v2470_v3 = vadd.f32 %v3794_v32, %v4454_v23  ;;  %v3796_v14 = vadd.f32 %v2287_v35, %v1667_v2 }
 0x1b0   : > { %v2544_v58 = vmax.f32 %v2472_v33, 0.0  ;;  %v2473_v36 = vadd.f32 %v3795_v34, %v4454_v23 }
 0x1b1   : > { %v2542_v37 = vmax.f32 %v2470_v3, 0.0  ;;  %v2471_v15 = vadd.f32 %v3796_v14, %v4454_v23 }
 0x1b2   : > { %v3388_v38 = vpack.c.bf16 %v2544_v58, %v2544_v58  ;;  %v2545_v4 = vmax.f32 %v2473_v36, 0.0  ;;  %v3651_v59 = vpop.f32.mrb[64].mxu1 }
 0x1b3   : > { %v3386_v39 = vpack.c.bf16 %v2542_v37, %v2542_v37  ;;  %v2543_v16 = vmax.f32 %v2471_v15, 0.0  ;;  %v3725_v40 = vpop.f32.mrb[64].mxu0  ;;  %v1680_v41 = vpop.f32.mrb[65].mxu1 }
 0x1b4   : > { %2905 = vst.msk [vmem:[%s4462_s5 + $0xf8] sm:$0xf] %vm2842_vm2, %v3388_v38  ;;  %v3389_v5 = vpack.c.bf16 %v2545_v4, %v2545_v4  ;;  %v3797_v42 = vadd.f32 %v3725_v40, %v3651_v59  ;;  %v2300_v17 = vpop.f32.mrb[65].mxu0  ;;  %v3652_v60 = vpop.f32.mrb[66].mxu1 }
 0x1b5   : > { %2903 = vst.msk [vmem:[%s4462_s5 + $0xf0] sm:$0xf] %vm2842_vm2, %v3386_v39  ;;  %v3387_v43 = vpack.c.bf16 %v2543_v16, %v2543_v16  ;;  %v3798_v44 = vadd.f32 %v2300_v17, %v1680_v41  ;;  %v3726_v45 = vpop.f32.mrb[66].mxu0  ;;  %v1683_v6 = vpop.f32.mrb[67].mxu1 }
 0x1b6   : > { %2906 = vst.msk [vmem:[%s4462_s5 + $0xfc] sm:$0xf] %vm2842_vm2, %v3389_v5  ;;  %v2476_v46 = vadd.f32 %v3797_v42, %v4454_v23  ;;  %v3799_v18 = vadd.f32 %v3726_v45, %v3652_v60  ;;  %v2303_v61 = vpop.f32.mrb[67].mxu0 }
 0x1b7   : > { %2904 = vst.msk [vmem:[%s4462_s5 + $0xf4] sm:$0xf] %vm2842_vm2, %v3387_v43  ;;  %v2474_v47 = vadd.f32 %v3798_v44, %v4454_v23  ;;  %v3800_v19 = vadd.f32 %v2303_v61, %v1683_v6 }
 0x1b8   : > { %v2548_v7 = vmax.f32 %v2476_v46, 0.0  ;;  %v2477_v48 = vadd.f32 %v3799_v18, %v4454_v23 }
 0x1b9   : > { %v2546_v49 = vmax.f32 %v2474_v47, 0.0  ;;  %v2475_v50 = vadd.f32 %v3800_v19, %v4454_v23 }
 0x1ba   : > { %v3392_v20 = vpack.c.bf16 %v2548_v7, %v2548_v7  ;;  %v2549_v51 = vmax.f32 %v2477_v48, 0.0  ;;  %v3655_v8 = vpop.f32.mrb[68].mxu1 }
 0x1bb   : > { %v3390_v62 = vpack.c.bf16 %v2546_v49, %v2546_v49  ;;  %v2547_v52 = vmax.f32 %v2475_v50, 0.0  ;;  %v3729_v21 = vpop.f32.mrb[68].mxu0  ;;  %v1696_v53 = vpop.f32.mrb[69].mxu1 }
 0x1bc   : > { %2909 = vst.msk [vmem:[%s4462_s5 + $0x108] sm:$0xf] %vm2842_vm2, %v3392_v20  ;;  %v3393_v54 = vpack.c.bf16 %v2549_v51, %v2549_v51  ;;  %v3801_v9 = vadd.f32 %v3729_v21, %v3655_v8  ;;  %v2316_v63 = vpop.f32.mrb[69].mxu0  ;;  %v3656_v55 = vpop.f32.mrb[70].mxu1 }
 0x1bd   : > { %2907 = vst.msk [vmem:[%s4462_s5 + $0x100] sm:$0xf] %vm2842_vm2, %v3390_v62  ;;  %v3391_v22 = vpack.c.bf16 %v2547_v52, %v2547_v52  ;;  %v3802_v24 = vadd.f32 %v2316_v63, %v1696_v53  ;;  %v3730_v25 = vpop.f32.mrb[70].mxu0  ;;  %v1699_v10 = vpop.f32.mrb[71].mxu1 }
 0x1be   : > { %2910 = vst.msk [vmem:[%s4462_s5 + $0x10c] sm:$0xf] %vm2842_vm2, %v3393_v54  ;;  %v2480_v0 = vadd.f32 %v3801_v9, %v4454_v23  ;;  %v3803_v26 = vadd.f32 %v3730_v25, %v3656_v55  ;;  %v2319_v56 = vpop.f32.mrb[71].mxu0 }
 0x1bf   : > { %2908 = vst.msk [vmem:[%s4462_s5 + $0x104] sm:$0xf] %vm2842_vm2, %v3391_v22  ;;  %v2478_v11 = vadd.f32 %v3802_v24, %v4454_v23  ;;  %v3804_v27 = vadd.f32 %v2319_v56, %v1699_v10 }
 0x1c0   : > { %v2552_v28 = vmax.f32 %v2480_v0, 0.0  ;;  %v2481_v1 = vadd.f32 %v3803_v26, %v4454_v23 }
 0x1c1   : > { %v2550_v29 = vmax.f32 %v2478_v11, 0.0  ;;  %v2479_v12 = vadd.f32 %v3804_v27, %v4454_v23 }
 0x1c2   : > { %v3396_v30 = vpack.c.bf16 %v2552_v28, %v2552_v28  ;;  %v2553_v57 = vmax.f32 %v2481_v1, 0.0 }
 0x1c3   : > { %v3394_v31 = vpack.c.bf16 %v2550_v29, %v2550_v29  ;;  %v2551_v32 = vmax.f32 %v2479_v12, 0.0 }
 0x1c4   : > { %2913 = vst.msk [vmem:[%s4462_s5 + $0x118] sm:$0xf] %vm2842_vm2, %v3396_v30  ;;  %v3397_v13 = vpack.c.bf16 %v2553_v57, %v2553_v57 }
 0x1c5   : > { %2911 = vst.msk [vmem:[%s4462_s5 + $0x110] sm:$0xf] %vm2842_vm2, %v3394_v31  ;;  %v3395_v2 = vpack.c.bf16 %v2551_v32, %v2551_v32 }
 0x1c6   : > { %2914 = vst.msk [vmem:[%s4462_s5 + $0x11c] sm:$0xf] %vm2842_vm2, %v3397_v13 }
 0x1c7   : > { %2912 = vst.msk [vmem:[%s4462_s5 + $0x114] sm:$0xf] %vm2842_vm2, %v3395_v2 }
 0x1c8 PF: > { %s14_s19 = sadd.s32 1, %s4072_s19   ;;  %s4728_s15 = smov %s4064_s17 }
 0x1c9   : > { %p11_p7 = scmp.ge.s32.totalorder %s14_s19, 10   ;;  %s4729_s16 = smov %s4068_s18 }
 0x1ca   : > { %s4730_s17 = smov %s4733_s20  ;;  %s4731_s18 = smov %s4737_s21 }
 0x1cb   :  { %13 = sbr.rel (!%p11_p7) target bundleno = 3 (0x3), region = 74 }

// kernel: actor_net_forward.6
= control target key start
LH: loop header
LB: loop body
LE: loop exit
PB: predicated region body
PF: predicated region fallthrough
CT: control target
= control target key end

     0   :  { %s4050_s15 = smov 0   ;;  %s4052_s16 = smov 0   ;;  %s4887_s0 = inlined_call_operand.vmem [shape: bf16[2,600,96], index: 0, kind: input, shape index: {}]   ;;  %s4888_s1 = inlined_call_operand.vmem [shape: bf16[2,600,96], index: 1, kind: input, shape index: {}]   ;;  %s4889_s2 = inlined_call_operand.vmem [shape: bf16[3,96,32], index: 2, kind: input, shape index: {}]   ;;  %s4890_s3 = inlined_call_operand.vmem [shape: f32[1,32], index: 3, kind: input, shape index: {}]   ;;  %s4891_s4 = inlined_call_operand.vmem [shape: bf16[2,576,32], index: 4, kind: output, shape index: {}]  }
   0x1   :  { %s4054_s17 = smov 0  }
   0x2 LB: > { %s26_s18 = sadd.s32 1, %s4019_s16  ;;  %p2906_p0 = scmp.ge.s32.totalorder %s4023_s17, 1  ;;  %s4023_s17 = sphi %s4054_s17, %s14_s17   ;;  %s4019_s16 = sphi %s4052_s16, %s4893_s16   ;;  %s4015_s15 = sphi %s4050_s15, %s4892_s15  }
   0x3   : > { %p28_p1 = scmp.ge.s32.totalorder %s26_s18, 2  ;;  %p186_p2 = scmp.lt.s32.totalorder %s4023_s17, 3 }
   0x5   : > { %s4895_s18 = smov (%p28_p1, %s26_s18), 0  ;;  %p187_p3 = pnand %p2906_p0, %p186_p2 }
   0x6   : > { %v3875_v0 = vld [vmem:[%s4889_s2 + $0x30] sm:$0xff] (!%p187_p3)   ;;  %p221_p4 = scmp.lt.s32.totalorder (!%p187_p3), %s4015_s15, 1  ;;  %v4074_v1 = vld [vmem:[%s4889_s2] sm:$0xff] (!%p187_p3)   ;;  %v3877_v2 = vld [vmem:[%s4889_s2 + $0x38] sm:$0xff] (!%p187_p3)   ;;  %vm630_vm0 = vcmask (!%p187_p3), 785408   ;;  %vm2736_vm1 = vcmask (!%p187_p3), 257024  }
   0x7   : > { %190 = sbr.rel (%p187_p3) target bundleno = 464 (0x1d0), region = 36  ;;  %3441 = vmatprep.subr.bf16.mxu1 (!%p187_p3), %v3875_v0  ;;  %3525 = vmatprep.subr.bf16.mxu0 (!%p187_p3), %v4074_v1  ;;  %v4085_v3 = vld [vmem:[%s4889_s2 + $0x8] sm:$0xff] (!%p187_p3)   ;;  %v3879_v4 = vld [vmem:[%s4889_s2 + $0x40] sm:$0xff] (!%p187_p3)   ;;  %v4095_v5 = vld [vmem:[%s4889_s2 + $0x10] sm:$0xff] (!%p187_p3)  }
   0x8   : > { %3442 = vmatpush3.bf16.msra.mxu1 (!%p187_p3), %v3875_v0  ;;  %3526 = vmatpush3.bf16.msra.mxu0 (!%p187_p3), %v4074_v1  ;;  %v3881_v6 = vld [vmem:[%s4889_s2 + $0x48] sm:$0xff] (!%p187_p3)   ;;  %v4106_v7 = vld [vmem:[%s4889_s2 + $0x18] sm:$0xff] (!%p187_p3)   ;;  %v3883_v8 = vld [vmem:[%s4889_s2 + $0x50] sm:$0xff] (!%p187_p3)  }
   0x9   : > { %3443 = vmatprep.subr.bf16.mxu1 (!%p187_p3), %v3877_v2  ;;  %3527 = vmatprep.subr.bf16.mxu0 (!%p187_p3), %v4085_v3  ;;  %v4124_v9 = vld [vmem:[%s4889_s2 + $0x20] sm:$0xff] (!%p187_p3)   ;;  %v3885_v12 = vld [vmem:[%s4889_s2 + $0x58] sm:$0xff] (!%p187_p3)   ;;  %v4140_v13 = vld [vmem:[%s4889_s2 + $0x28] sm:$0xff] (!%p187_p3)  }
   0xa   : > { %v3891_v19 = vld [vmem:[%s4889_s2 + $0x60] sm:$0xff] (!%p187_p3)   ;;  %v3897_v31 = vld [vmem:[%s4889_s2 + $0x68] sm:$0xff] (!%p187_p3)   ;;  %v3906_v39 = vld [vmem:[%s4889_s2 + $0x70] sm:$0xff] (!%p187_p3)  }
   0xb   : > { %v3911_v49 = vld [vmem:[%s4889_s2 + $0x78] sm:$0xff] (!%p187_p3)  }
   0xc   : > { %3444 = vmatpush3.bf16.msra.mxu1 (!%p187_p3), %v3877_v2  ;;  %3528 = vmatpush3.bf16.msra.mxu0 (!%p187_p3), %v4085_v3 }
   0xd   : > { %3445 = vmatprep.subr.bf16.mxu1 (!%p187_p3), %v3879_v4  ;;  %3529 = vmatprep.subr.bf16.mxu0 (!%p187_p3), %v4095_v5 }
   0xe   : > { %s4897_s15 = smov (!%p221_p4, %s4015_s15), 1 }
   0xf   : > { %s3849_s5 = smul.u32 300, %s4897_s15 }
  0x10   : > { %3446 = vmatpush3.bf16.msra.mxu1 %v3879_v4  ;;  %3530 = vmatpush3.bf16.msra.mxu0 %v4095_v5  ;;  %s3850_s20 = smul.u32 288, %s4897_s15 }
  0x11   : > { %s4111_s12 = scalar_lea.vmem %s4888_s1, %s3849_s5  ;;  %s4119_s21 = scalar_lea.vmem %s4887_s0, %s3849_s5  ;;  %3447 = vmatprep.subr.bf16.mxu1 %v3881_v6  ;;  %3531 = vmatprep.subr.bf16.mxu0 %v4106_v7 }
  0x12   : > { %v3887_v10 = vld [vmem:[%s4111_s12] sm:$0xff]   ;;  %v244_v14 = vld [vmem:[%s4119_s21 + $0x8] sm:$0xf]  ;;  %v4144_v15 = vld [vmem:[%s4119_s21 + $0xc] sm:$0xf]  ;;  %s4633_s23 = scalar_lea.vmem %s4891_s4, %s3850_s20 }
  0x13   : > { %v3888_v11 = vld [vmem:[%s4119_s21] sm:$0xff]   ;;  %3453 = vmatprep.mubr.msk.bf16.mxu1 %vm630_vm0, %v3887_v10  ;;  %v4147_v16 = vld [vmem:[%s4119_s21 + $0x14] sm:$0xf]  ;;  %v4150_v17 = vld [vmem:[%s4119_s21 + $0x18] sm:$0xf]  ;;  %v3001_v24 = vcombine.low %v244_v14, %v4144_v15 }
  0x14   : > { %3448 = vmatpush3.bf16.msra.mxu1 %v3881_v6  ;;  %3537 = vmatprep.mubr.msk.bf16.mxu0 %vm630_vm0, %v3888_v11  ;;  %v3889_v18 = vld [vmem:[%s4111_s12 + $0x8] sm:$0xff]   ;;  %v3091_v20 = vcombine.low %v4147_v16, %v4150_v17  ;;  %v4161_v21 = vld [vmem:[%s4119_s21 + $0x10] sm:$0xf]  ;;  %v4164_v22 = vld [vmem:[%s4119_s21 + $0x1c] sm:$0xf] }
  0x15   : > { %3532 = vmatpush3.bf16.msra.mxu0 %v4106_v7  ;;  %3449 = vmatprep.subr.bf16.mxu1 %v3883_v8  ;;  %v4167_v23 = vld [vmem:[%s4119_s21 + $0x20] sm:$0xf]  ;;  %v4171_v25 = vld [vmem:[%s4119_s21 + $0x24] sm:$0xf]  ;;  %v4174_v26 = vld [vmem:[%s4119_s21 + $0x28] sm:$0xf]  ;;  %v3002_v30 = vcombine.low %v4161_v21, %v4147_v16  ;;  %v3003_v43 = vcombine.low %v4150_v17, %v4164_v22 }
  0x16   : > { %3533 = vmatprep.subr.bf16.mxu0 %v4124_v9  ;;  %v3092_v27 = vcombine.low %v4164_v22, %v4167_v23  ;;  %v3892_v28 = vld [vmem:[%s4111_s12 + $0x10] sm:$0xff]   ;;  %v3093_v29 = vcombine.low %v4171_v25, %v4174_v26  ;;  %v4189_v32 = vld [vmem:[%s4119_s21 + $0x2c] sm:$0xf]  ;;  %v4203_v36 = vld [vmem:[%s4119_s21 + $0x38] sm:$0xf]  ;;  %v3004_v47 = vcombine.low %v4167_v23, %v4171_v25 }
  0x17   : > { %v4192_v33 = vld [vmem:[%s4119_s21 + $0x30] sm:$0xf]  ;;  %v4200_v35 = vld [vmem:[%s4119_s21 + $0x34] sm:$0xf]  ;;  %v4207_v37 = vld [vmem:[%s4119_s21 + $0x3c] sm:$0xf]  ;;  %v3005_v61 = vcombine.low %v4174_v26, %v4189_v32 }
  0x18   : > { %3450 = vmatpush3.bf16.msra.mxu1 %v3883_v8  ;;  %v3094_v34 = vcombine.low %v4189_v32, %v4192_v33  ;;  %v3095_v38 = vcombine.low %v4200_v35, %v4203_v36  ;;  %v4216_v40 = vld [vmem:[%s4119_s21 + $0x40] sm:$0xf]  ;;  %v3894_v41 = vld [vmem:[%s4111_s12 + $0x18] sm:$0xff]   ;;  %v4227_v45 = vld [vmem:[%s4119_s21 + $0x44] sm:$0xf]  ;;  %v3006_v0 = vcombine.low %v4192_v33, %v4200_v35 }
  0x19   : > { %3534 = vmatpush3.bf16.msra.mxu0 %v4124_v9  ;;  %3451 = vmatprep.subr.bf16.mxu1 %v3885_v12  ;;  %v3096_v42 = vcombine.low %v4207_v37, %v4216_v40  ;;  %v3898_v44 = vld [vmem:[%s4111_s12 + $0x20] sm:$0xff]   ;;  %v4230_v46 = vld [vmem:[%s4119_s21 + $0x48] sm:$0xf]  ;;  %v4242_v50 = vld [vmem:[%s4119_s21 + $0x4c] sm:$0xf] }
  0x1a   : > { %3535 = vmatprep.subr.bf16.mxu0 %v4140_v13  ;;  %v3097_v48 = vcombine.low %v4227_v45, %v4230_v46  ;;  %v4245_v51 = vld [vmem:[%s4119_s21 + $0x50] sm:$0xf]  ;;  %v4250_v52 = vld [vmem:[%s4119_s21 + $0x54] sm:$0xf]  ;;  %v4253_v53 = vld [vmem:[%s4119_s21 + $0x58] sm:$0xf] }
  0x1b   : > { %v3098_v54 = vcombine.low %v4242_v50, %v4245_v51  ;;  %v3099_v55 = vcombine.low %v4250_v52, %v4253_v53  ;;  %v3900_v56 = vld [vmem:[%s4111_s12 + $0x28] sm:$0xff]   ;;  %v4262_v57 = vld [vmem:[%s4119_s21 + $0x5c] sm:$0xf]  ;;  %v4265_v58 = vld [vmem:[%s4119_s21 + $0x60] sm:$0xf] }
  0x1c   : > { %3452 = vmatpush3.bf16.msra.mxu1 %v3885_v12  ;;  %v3902_v59 = vld [vmem:[%s4111_s12 + $0x30] sm:$0xff]   ;;  %v3100_v60 = vcombine.low %v4262_v57, %v4265_v58  ;;  %v4275_v62 = vld [vmem:[%s4119_s21 + $0x64] sm:$0xf]  ;;  %v4278_v63 = vld [vmem:[%s4119_s21 + $0x68] sm:$0xf] }
  0x1d   : > { %3536 = vmatpush3.bf16.msra.mxu0 %v4140_v13  ;;  %3693 = vmatprep.subr.bf16.mxu1 %v4074_v1  ;;  %v3101_v2 = vcombine.low %v4275_v62, %v4278_v63  ;;  %v4291_v4 = vld [vmem:[%s4119_s21 + $0x70] sm:$0xf]  ;;  %v4300_v6 = vld [vmem:[%s4119_s21 + $0x74] sm:$0xf]  ;;  %v4303_v8 = vld [vmem:[%s4119_s21 + $0x78] sm:$0xf] }
  0x1e   : > { %3609 = vmatprep.subr.bf16.mxu0 %v3891_v19  ;;  %v3925_v10 = vld [vmem:[%s4889_s2 + $0x88] sm:$0xff]   ;;  %v3103_v11 = vcombine.low %v4300_v6, %v4303_v8  ;;  %v3907_v12 = vld [vmem:[%s4111_s12 + $0x40] sm:$0xff]   ;;  %v4315_v14 = vld [vmem:[%s4119_s21 + $0x7c] sm:$0xf] }
  0x1f   : > { %3454 = vmatmul.mubr.msk.bf16.vlgmr.msra.gmra.mrb[0].mxu1 %vm630_vm0, %v3889_v18  ;;  %v4318_v18 = vld [vmem:[%s4119_s21 + $0x80] sm:$0xf]  ;;  %v3939_v16 = vld [vmem:[%s4111_s12 + $0xb8] sm:$0xff]   ;;  %v3945_v22 = vld [vmem:[%s4111_s12 + $0xd0] sm:$0xff]  }
  0x20   : > { %3538 = vmatmul.mubr.msk.bf16.vlgmr.msra.gmra.mrb[0].mxu0 %vm630_vm0, %v3001_v24  ;;  %3699 = vmatpush3.bf16.msra.mxu1 %v4074_v1  ;;  %v3920_v1 = vld [vmem:[%s4889_s2 + $0x80] sm:$0xff]   ;;  %v3947_v23 = vld [vmem:[%s4111_s12 + $0xd8] sm:$0xff]   ;;  %v3951_v26 = vld [vmem:[%s4111_s12 + $0xe8] sm:$0xff]  }
  0x21   : > { %3610 = vmatpush3.bf16.msra.mxu0 %v3891_v19  ;;  %3457 = vmatprep.mubr.msk.bf16.mxu1 %vm630_vm0, %v3892_v28  ;;  %v3007_v19 = vcombine.low %v4203_v36, %v4207_v37  ;;  %v4324_v24 = vld [vmem:[%s4119_s21 + $0x84] sm:$0xf]  ;;  %v4327_v28 = vld [vmem:[%s4119_s21 + $0x88] sm:$0xf]  ;;  %v278_v33 = vld [vmem:[%s4119_s21 + $0x90] sm:$0xf] }
  0x22   : > { %3541 = vmatprep.mubr.msk.bf16.mxu0 %vm630_vm0, %v3002_v30  ;;  %3611 = vmatprep.subr.bf16.mxu0 %v3897_v31  ;;  %v3104_v30 = vcombine.low %v4315_v14, %v4318_v18  ;;  %v3941_v17 = vld [vmem:[%s4111_s12 + $0xc0] sm:$0xff]   ;;  %v3961_v35 = vld [vmem:[%s4111_s12 + $0x110] sm:$0xff]  }
  0x23   : > { %3694 = vmatprep.subr.bf16.mxu1 %v4085_v3  ;;  %v3949_v25 = vld [vmem:[%s4111_s12 + $0xe0] sm:$0xff]   ;;  %v279_v37 = vld [vmem:[%s4119_s21 + $0x94] sm:$0xf] }
  0x24   : > { %3700 = vmatpush3.bf16.msra.mxu1 %v4085_v3  ;;  %v4288_v3 = vld [vmem:[%s4119_s21 + $0x6c] sm:$0xf]  ;;  %v3957_v32 = vld [vmem:[%s4111_s12 + $0x100] sm:$0xff]  }
  0x25   : > { %3612 = vmatpush3.bf16.msra.mxu0 %v3897_v31  ;;  %3695 = vmatprep.subr.bf16.mxu1 %v4095_v5  ;;  %v3008_v31 = vcombine.low %v4216_v40, %v4227_v45  ;;  %v281_v40 = vld [vmem:[%s4119_s21 + $0x9c] sm:$0xf] }
  0x26   : > { %3613 = vmatprep.subr.bf16.mxu0 %v3906_v39  ;;  %v3963_v45 = vld [vmem:[%s4111_s12 + $0x118] sm:$0xff]  }
  0x27   : > { %3458 = vmatmul.mubr.msk.bf16.gmra.mrb[4].mxu1 %vm630_vm0, %v3894_v41  ;;  %v3009_v41 = vcombine.low %v4230_v46, %v4242_v50 }
  0x28   : > { %3542 = vmatmul.mubr.msk.bf16.gmra.mrb[4].mxu0 %vm630_vm0, %v3003_v43  ;;  %3461 = vmatprep.mubr.msk.bf16.mxu1 %vm630_vm0, %v3898_v44  ;;  %v3912_v43 = vld [vmem:[%s4111_s12 + $0x50] sm:$0xff]   ;;  %v3010_v44 = vcombine.low %v4245_v51, %v4250_v52  ;;  %v283_v51 = vld [vmem:[%s4119_s21 + $0xa4] sm:$0xf]  ;;  %v284_v52 = vld [vmem:[%s4119_s21 + $0xa8] sm:$0xf] }
  0x29   : > { %3545 = vmatprep.mubr.msk.bf16.mxu0 %vm630_vm0, %v3004_v47  ;;  %3614 = vmatpush3.bf16.msra.mxu0 %v3906_v39  ;;  %v3909_v39 = vld [vmem:[%s4111_s12 + $0x48] sm:$0xff]   ;;  %v3914_v47 = vld [vmem:[%s4111_s12 + $0x58] sm:$0xff]  }
  0x2a   : > { %3615 = vmatprep.subr.bf16.mxu0 %v3911_v49  ;;  %3701 = vmatpush3.bf16.msra.mxu1 %v4095_v5  ;;  %v3102_v5 = vcombine.low %v4288_v3, %v4291_v4 }
  0x2b   : > { %3696 = vmatprep.subr.bf16.mxu1 %v4106_v7 }
  0x2d   : > { %3616 = vmatpush3.bf16.msra.mxu0 %v3911_v49  ;;  %v3916_v49 = vld [vmem:[%s4111_s12 + $0x60] sm:$0xff]  }
  0x2e   : > { %3702 = vmatpush3.bf16.msra.mxu1 %v4106_v7  ;;  %3617 = vmatprep.subr.bf16.mxu0 %v3920_v1  ;;  %v3904_v7 = vld [vmem:[%s4111_s12 + $0x38] sm:$0xff]  }
  0x2f   : > { %3462 = vmatmul.mubr.msk.bf16.gmra.mrb[8].mxu1 %vm630_vm0, %v3900_v56  ;;  %3697 = vmatprep.subr.bf16.mxu1 %v4124_v9  ;;  %v3012_v56 = vcombine.low %v4265_v58, %v4275_v62  ;;  %v287_v62 = vld [vmem:[%s4119_s21 + $0xb4] sm:$0xf] }
  0x30   : > { %3546 = vmatmul.mubr.msk.bf16.gmra.mrb[8].mxu0 %vm630_vm0, %v3005_v61  ;;  %3465 = vmatprep.mubr.msk.bf16.mxu1 %vm630_vm0, %v3902_v59  ;;  %v3918_v59 = vld [vmem:[%s4111_s12 + $0x68] sm:$0xff]   ;;  %v3013_v61 = vcombine.low %v4278_v63, %v4288_v3  ;;  %v288_v63 = vld [vmem:[%s4119_s21 + $0xb8] sm:$0xf]  ;;  %v290_v3 = vld [vmem:[%s4119_s21 + $0xc0] sm:$0xf] }
  0x31   : > { %3549 = vmatprep.mubr.msk.bf16.mxu0 %vm630_vm0, %v3006_v0  ;;  %3618 = vmatpush3.bf16.msra.mxu0 %v3920_v1  ;;  %v3921_v0 = vld [vmem:[%s4111_s12 + $0x70] sm:$0xff]   ;;  %v3014_v1 = vcombine.low %v4291_v4, %v4300_v6 }
  0x32   : > { %3619 = vmatprep.subr.bf16.mxu0 %v3925_v10  ;;  %3703 = vmatpush3.bf16.msra.mxu1 %v4124_v9  ;;  %v3105_v9 = vcombine.low %v4324_v24, %v4327_v28 }
  0x33   : > { %3698 = vmatprep.subr.bf16.mxu1 %v4140_v13 }
  0x35   : > { %3620 = vmatpush3.bf16.msra.mxu0 %v3925_v10  ;;  %v3015_v10 = vcombine.low %v4303_v8, %v4315_v14  ;;  %v292_v14 = vld [vmem:[%s4119_s21 + $0xc8] sm:$0xf] }
  0x36   : > { %3704 = vmatpush3.bf16.msra.mxu1 %v4140_v13  ;;  %v3011_v13 = vcombine.low %v4253_v53, %v4262_v57  ;;  %v285_v53 = vld [vmem:[%s4119_s21 + $0xac] sm:$0xf]  ;;  %v3109_v57 = vcombine.low %v283_v51, %v284_v52 }
  0x37   : > { %3466 = vmatmul.mubr.msk.bf16.gmra.mrb[12].mxu1 %vm630_vm0, %v3904_v7  ;;  %v3923_v7 = vld [vmem:[%s4111_s12 + $0x78] sm:$0xff]   ;;  %v3021_v4 = vcombine.low %v284_v52, %v285_v53  ;;  %v4000_v52 = vld [vmem:[%s4119_s21 + $0x124] sm:$0xff]  }
  0x38   : > { %3550 = vmatmul.mubr.msk.bf16.gmra.mrb[12].mxu0 %vm630_vm0, %v3007_v19  ;;  %3469 = vmatprep.mubr.msk.bf16.mxu1 %vm630_vm0, %v3907_v12  ;;  %v3926_v12 = vld [vmem:[%s4111_s12 + $0x80] sm:$0xff]   ;;  %v3016_v19 = vcombine.low %v4318_v18, %v4324_v24  ;;  %v293_v18 = vld [vmem:[%s4119_s21 + $0xcc] sm:$0xf]  ;;  %v294_v24 = vld [vmem:[%s4119_s21 + $0xd0] sm:$0xf] }
  0x39   : > { %3553 = vmatprep.mubr.msk.bf16.mxu0 %vm630_vm0, %v3008_v31  ;;  %v277_v31 = vld [vmem:[%s4119_s21 + $0x8c] sm:$0xf] }
  0x3a   : > { %v3106_v36 = vcombine.low %v277_v31, %v278_v33 }
  0x3f   : > { %3470 = vmatmul.mubr.msk.bf16.gmra.mrb[16].mxu1 %vm630_vm0, %v3909_v39  ;;  %v3928_v39 = vld [vmem:[%s4111_s12 + $0x88] sm:$0xff]  }
  0x40   : > { %3554 = vmatmul.mubr.msk.bf16.gmra.mrb[16].mxu0 %vm630_vm0, %v3009_v41  ;;  %3473 = vmatprep.mubr.msk.bf16.mxu1 %vm630_vm0, %v3912_v43  ;;  %v3017_v41 = vcombine.low %v4327_v28, %v277_v31  ;;  %v3930_v43 = vld [vmem:[%s4111_s12 + $0x90] sm:$0xff]   ;;  %v300_v31 = vld [vmem:[%s4119_s21 + $0xe8] sm:$0xf] }
  0x41   : > { %3557 = vmatprep.mubr.msk.bf16.mxu0 %vm630_vm0, %v3010_v44  ;;  %v3090_v44 = vcombine.low %v4144_v15, %v4161_v21  ;;  %v3935_v15 = vld [vmem:[%s4111_s12 + $0xa8] sm:$0xff]   ;;  %v3937_v21 = vld [vmem:[%s4111_s12 + $0xb0] sm:$0xff]  }
  0x47   : > { %3474 = vmatmul.mubr.msk.bf16.gmra.mrb[20].mxu1 %vm630_vm0, %v3914_v47  ;;  %v3932_v47 = vld [vmem:[%s4111_s12 + $0x98] sm:$0xff]  }
  0x48   : > { %3558 = vmatmul.mubr.msk.bf16.gmra.mrb[20].mxu0 %vm630_vm0, %v3011_v13  ;;  %3477 = vmatprep.mubr.msk.bf16.mxu1 %vm630_vm0, %v3916_v49  ;;  %v3933_v13 = vld [vmem:[%s4111_s12 + $0xa0] sm:$0xff]   ;;  %v3114_v49 = vcombine.low %v293_v18, %v294_v24 }
  0x49   : > { %3561 = vmatprep.mubr.msk.bf16.mxu0 %vm630_vm0, %v3012_v56  ;;  %v295_v56 = vld [vmem:[%s4119_s21 + $0xd4] sm:$0xf] }
  0x4f   : > { %3478 = vmatmul.mubr.msk.bf16.gmra.mrb[24].mxu1 %vm630_vm0, %v3918_v59  ;;  %v296_v59 = vld [vmem:[%s4119_s21 + $0xd8] sm:$0xf] }
  0x50   : > { %3562 = vmatmul.mubr.msk.bf16.gmra.mrb[24].mxu0 %vm630_vm0, %v3013_v61  ;;  %3481 = vmatprep.mubr.msk.bf16.mxu1 %vm630_vm0, %v3921_v0  ;;  %v297_v61 = vld [vmem:[%s4119_s21 + $0xdc] sm:$0xf]  ;;  %v298_v0 = vld [vmem:[%s4119_s21 + $0xe0] sm:$0xf] }
  0x51   : > { %3565 = vmatprep.mubr.msk.bf16.mxu0 %vm630_vm0, %v3014_v1  ;;  %v3025_v1 = vcombine.low %v292_v14, %v293_v18 }
  0x57   : > { %3482 = vmatmul.mubr.msk.bf16.gmra.mrb[28].mxu1 %vm630_vm0, %v3923_v7  ;;  %v3115_v7 = vcombine.low %v295_v56, %v296_v59 }
  0x58   : > { %3566 = vmatmul.mubr.msk.bf16.gmra.mrb[28].mxu0 %vm630_vm0, %v3015_v10  ;;  %3485 = vmatprep.mubr.msk.bf16.mxu1 %vm630_vm0, %v3926_v12  ;;  %v3026_v10 = vcombine.low %v294_v24, %v295_v56  ;;  %v3116_v12 = vcombine.low %v297_v61, %v298_v0 }
  0x59   : > { %3569 = vmatprep.mubr.msk.bf16.mxu0 %vm630_vm0, %v3016_v19  ;;  %v299_v19 = vld [vmem:[%s4119_s21 + $0xe4] sm:$0xf] }
  0x5f   : > { %3486 = vmatmul.mubr.msk.bf16.gmra.mrb[32].mxu1 %vm630_vm0, %v3928_v39  ;;  %v301_v39 = vld [vmem:[%s4119_s21 + $0xec] sm:$0xf] }
  0x60   : > { %3570 = vmatmul.mubr.msk.bf16.gmra.mrb[32].mxu0 %vm630_vm0, %v3017_v41  ;;  %3489 = vmatprep.mubr.msk.bf16.mxu1 %vm630_vm0, %v3930_v43  ;;  %v302_v41 = vld [vmem:[%s4119_s21 + $0xf0] sm:$0xf]  ;;  %v3027_v43 = vcombine.low %v296_v59, %v297_v61 }
  0x61   : > { %3621 = vmatprep.mubr.msk.bf16.mxu0 %vm630_vm0, %v3090_v44  ;;  %v3117_v44 = vcombine.low %v299_v19, %v300_v31 }
  0x67   : > { %3490 = vmatmul.mubr.msk.bf16.gmra.mrb[36].mxu1 %vm630_vm0, %v3932_v47  ;;  %v3028_v47 = vcombine.low %v298_v0, %v299_v19 }
  0x68   : > { %3622 = vmatmul.mubr.msk.bf16.vlgmr.msra.gmra.mrb[0].mxu0 %vm630_vm0, %v3091_v20  ;;  %3493 = vmatprep.mubr.msk.bf16.mxu1 %vm630_vm0, %v3933_v13  ;;  %v3943_v20 = vld [vmem:[%s4111_s12 + $0xc8] sm:$0xff]   ;;  %v3118_v13 = vcombine.low %v301_v39, %v302_v41 }
  0x69   : > { %3625 = vmatprep.mubr.msk.bf16.mxu0 %vm630_vm0, %v3092_v27  ;;  %v3953_v27 = vld [vmem:[%s4111_s12 + $0xf0] sm:$0xff]  }
  0x6f   : > { %3494 = vmatmul.mubr.msk.bf16.gmra.mrb[40].mxu1 %vm630_vm0, %v3935_v15  ;;  %v303_v15 = vld [vmem:[%s4119_s21 + $0xf4] sm:$0xf] }
  0x70   : > { %3626 = vmatmul.mubr.msk.bf16.gmra.mrb[4].mxu0 %vm630_vm0, %v3093_v29  ;;  %3497 = vmatprep.mubr.msk.bf16.mxu1 %vm630_vm0, %v3937_v21  ;;  %v3955_v29 = vld [vmem:[%s4111_s12 + $0xf8] sm:$0xff]  }
  0x71   : > { %3629 = vmatprep.mubr.msk.bf16.mxu0 %vm630_vm0, %v3094_v34  ;;  %v3959_v34 = vld [vmem:[%s4111_s12 + $0x108] sm:$0xff]   ;;  %v304_v21 = vld [vmem:[%s4119_s21 + $0xf8] sm:$0xf] }
  0x77   : > { %3498 = vmatmul.mubr.msk.bf16.gmra.mrb[44].mxu1 %vm630_vm0, %v3939_v16  ;;  %v305_v16 = vld [vmem:[%s4119_s21 + $0xfc] sm:$0xf] }
  0x78   : > { %3630 = vmatmul.mubr.msk.bf16.gmra.mrb[8].mxu0 %vm630_vm0, %v3095_v38  ;;  %3501 = vmatprep.mubr.msk.bf16.mxu1 %vm630_vm0, %v3941_v17  ;;  %v280_v38 = vld [vmem:[%s4119_s21 + $0x98] sm:$0xf]  ;;  %v306_v17 = vld [vmem:[%s4119_s21 + $0x100] sm:$0xf] }
  0x79   : > { %3633 = vmatprep.mubr.msk.bf16.mxu0 %vm630_vm0, %v3096_v42  ;;  %v282_v42 = vld [vmem:[%s4119_s21 + $0xa0] sm:$0xf]  ;;  %v3107_v46 = vcombine.low %v279_v37, %v280_v38 }
  0x7a   : > { %v3108_v50 = vcombine.low %v281_v40, %v282_v42  ;;  %v3020_v58 = vcombine.low %v282_v42, %v283_v51  ;;  %v386_v42 = vld [vmem:[%s4119_s21 + $0x120] sm:$0xf] }
  0x7f   : > { %3502 = vmatmul.mubr.msk.bf16.gmra.mrb[48].mxu1 %vm630_vm0, %v3943_v20  ;;  %v3029_v20 = vcombine.low %v300_v31, %v301_v39 }
  0x80   : > { %3634 = vmatmul.mubr.msk.bf16.gmra.mrb[12].mxu0 %vm630_vm0, %v3097_v48  ;;  %3505 = vmatprep.mubr.msk.bf16.mxu1 %vm630_vm0, %v3945_v22  ;;  %v3018_v48 = vcombine.low %v278_v33, %v279_v37  ;;  %v3119_v22 = vcombine.low %v303_v15, %v304_v21  ;;  %v3031_v33 = vcombine.low %v304_v21, %v305_v16  ;;  %v311_v37 = vld [vmem:[%s4119_s21 + $0x114] sm:$0xf] }
  0x81   : > { %3637 = vmatprep.mubr.msk.bf16.mxu0 %vm630_vm0, %v3098_v54  ;;  %v286_v54 = vld [vmem:[%s4119_s21 + $0xb0] sm:$0xf] }
  0x82   : > { %v3022_v6 = vcombine.low %v286_v54, %v287_v62 }
  0x87   : > { %3506 = vmatmul.mubr.msk.bf16.gmra.mrb[52].mxu1 %vm630_vm0, %v3947_v23  ;;  %v3030_v23 = vcombine.low %v302_v41, %v303_v15 }
  0x88   : > { %3638 = vmatmul.mubr.msk.bf16.gmra.mrb[16].mxu0 %vm630_vm0, %v3099_v55  ;;  %3509 = vmatprep.mubr.msk.bf16.mxu1 %vm630_vm0, %v3949_v25  ;;  %v3019_v55 = vcombine.low %v280_v38, %v281_v40  ;;  %v3120_v25 = vcombine.low %v305_v16, %v306_v17  ;;  %v312_v38 = vld [vmem:[%s4119_s21 + $0x118] sm:$0xf]  ;;  %v313_v40 = vld [vmem:[%s4119_s21 + $0x11c] sm:$0xf] }
  0x89   : > { %3641 = vmatprep.mubr.msk.bf16.mxu0 %vm630_vm0, %v3100_v60  ;;  %v3110_v60 = vcombine.low %v285_v53, %v286_v54  ;;  %v3035_v51 = vcombine.low %v312_v38, %v313_v40 }
  0x8f   : > { %3510 = vmatmul.mubr.msk.bf16.gmra.mrb[56].mxu1 %vm630_vm0, %v3951_v26  ;;  %v307_v26 = vld [vmem:[%s4119_s21 + $0x104] sm:$0xf] }
  0x90   : > { %3642 = vmatmul.mubr.msk.bf16.gmra.mrb[20].mxu0 %vm630_vm0, %v3101_v2  ;;  %3513 = vmatprep.mubr.msk.bf16.mxu1 %vm630_vm0, %v3953_v27  ;;  %v289_v2 = vld [vmem:[%s4119_s21 + $0xbc] sm:$0xf]  ;;  %v308_v27 = vld [vmem:[%s4119_s21 + $0x108] sm:$0xf] }
  0x91   : > { %3645 = vmatprep.mubr.msk.bf16.mxu0 %vm630_vm0, %v3102_v5  ;;  %v3111_v5 = vcombine.low %v287_v62, %v288_v63  ;;  %v3112_v8 = vcombine.low %v289_v2, %v290_v3  ;;  %v3023_v28 = vcombine.low %v288_v63, %v289_v2 }
  0x97   : > { %3514 = vmatmul.mubr.msk.bf16.gmra.mrb[60].mxu1 %vm630_vm0, %v3955_v29  ;;  %v309_v29 = vld [vmem:[%s4119_s21 + $0x10c] sm:$0xf] }
  0x98   : > { %3646 = vmatmul.mubr.msk.bf16.gmra.mrb[24].mxu0 %vm630_vm0, %v3103_v11  ;;  %3517 = vmatprep.mubr.msk.bf16.mxu1 %vm630_vm0, %v3957_v32  ;;  %v291_v11 = vld [vmem:[%s4119_s21 + $0xc4] sm:$0xf]  ;;  %v310_v32 = vld [vmem:[%s4119_s21 + $0x110] sm:$0xf] }
  0x99   : > { %3649 = vmatprep.mubr.msk.bf16.mxu0 %vm630_vm0, %v3104_v30  ;;  %v3113_v30 = vcombine.low %v291_v11, %v292_v14 }
  0x9f   : > { %3518 = vmatmul.mubr.msk.bf16.gmra.mrb[64].mxu1 %vm630_vm0, %v3959_v34  ;;  %v3121_v34 = vcombine.low %v307_v26, %v308_v27 }
  0xa0   : > { %3650 = vmatmul.mubr.msk.bf16.gmra.mrb[28].mxu0 %vm630_vm0, %v3105_v9  ;;  %3521 = vmatprep.mubr.msk.bf16.mxu1 %vm630_vm0, %v3961_v35  ;;  %v3024_v9 = vcombine.low %v290_v3, %v291_v11  ;;  %v3032_v35 = vcombine.low %v306_v17, %v307_v26 }
  0xa1   : > { %3653 = vmatprep.mubr.msk.bf16.mxu0 %vm630_vm0, %v3106_v36  ;;  %v3122_v36 = vcombine.low %v309_v29, %v310_v32 }
  0xa7   : > { %3522 = vmatmul.mubr.msk.bf16.gmra.mrb[68].mxu1 %vm630_vm0, %v3963_v45  ;;  %v3033_v45 = vcombine.low %v308_v27, %v309_v29 }
  0xa8   : > { %3654 = vmatmul.mubr.msk.bf16.gmra.mrb[32].mxu0 %vm630_vm0, %v3107_v46  ;;  %3573 = vmatprep.mubr.msk.bf16.mxu1 %vm630_vm0, %v3018_v48  ;;  %v3123_v46 = vcombine.low %v311_v37, %v312_v38  ;;  %v3034_v48 = vcombine.low %v310_v32, %v311_v37 }
  0xa9   : > { %3657 = vmatprep.mubr.msk.bf16.mxu0 %vm630_vm0, %v3108_v50  ;;  %v3124_v50 = vcombine.low %v313_v40, %v386_v42 }
  0xaf   : > { %3574 = vmatmul.mubr.msk.bf16.vlgmr.msra.gmra.mrb[36].mxu1 %vm630_vm0, %v3019_v55 }
  0xb0   : > { %3658 = vmatmul.mubr.msk.bf16.gmra.mrb[36].mxu0 %vm630_vm0, %v3109_v57  ;;  %3577 = vmatprep.mubr.msk.bf16.mxu1 %vm630_vm0, %v3020_v58 }
  0xb1   : > { %3661 = vmatprep.mubr.msk.bf16.mxu0 %vm630_vm0, %v3110_v60 }
  0xb7   : > { %3578 = vmatmul.mubr.msk.bf16.gmra.mrb[40].mxu1 %vm630_vm0, %v3021_v4 }
  0xb8   : > { %3662 = vmatmul.mubr.msk.bf16.gmra.mrb[40].mxu0 %vm630_vm0, %v3111_v5  ;;  %3581 = vmatprep.mubr.msk.bf16.mxu1 %vm630_vm0, %v3022_v6 }
  0xb9   : > { %3665 = vmatprep.mubr.msk.bf16.mxu0 %vm630_vm0, %v3112_v8 }
  0xbf   : > { %3582 = vmatmul.mubr.msk.bf16.gmra.mrb[44].mxu1 %vm630_vm0, %v3023_v28 }
  0xc0   : > { %3666 = vmatmul.mubr.msk.bf16.gmra.mrb[44].mxu0 %vm630_vm0, %v3113_v30  ;;  %3585 = vmatprep.mubr.msk.bf16.mxu1 %vm630_vm0, %v3024_v9 }
  0xc1   : > { %3669 = vmatprep.mubr.msk.bf16.mxu0 %vm630_vm0, %v3114_v49 }
  0xc7   : > { %3586 = vmatmul.mubr.msk.bf16.gmra.mrb[48].mxu1 %vm630_vm0, %v3025_v1 }
  0xc8   : > { %3670 = vmatmul.mubr.msk.bf16.gmra.mrb[48].mxu0 %vm630_vm0, %v3115_v7  ;;  %3589 = vmatprep.mubr.msk.bf16.mxu1 %vm630_vm0, %v3026_v10 }
  0xc9   : > { %3673 = vmatprep.mubr.msk.bf16.mxu0 %vm630_vm0, %v3116_v12 }
  0xcf   : > { %3590 = vmatmul.mubr.msk.bf16.gmra.mrb[52].mxu1 %vm630_vm0, %v3027_v43 }
  0xd0   : > { %3674 = vmatmul.mubr.msk.bf16.gmra.mrb[52].mxu0 %vm630_vm0, %v3117_v44  ;;  %3593 = vmatprep.mubr.msk.bf16.mxu1 %vm630_vm0, %v3028_v47 }
  0xd1   : > { %3677 = vmatprep.mubr.msk.bf16.mxu0 %vm630_vm0, %v3118_v13  ;;  %v4624_v13 = vld [vmem:[%s4890_s3] ss:$0 sm:$0xff] }
  0xd7   : > { %3594 = vmatmul.mubr.msk.bf16.gmra.mrb[56].mxu1 %vm630_vm0, %v3029_v20 }
  0xd8   : > { %3678 = vmatmul.mubr.msk.bf16.gmra.mrb[56].mxu0 %vm630_vm0, %v3119_v22  ;;  %3597 = vmatprep.mubr.msk.bf16.mxu1 %vm630_vm0, %v3030_v23 }
  0xd9   : > { %3681 = vmatprep.mubr.msk.bf16.mxu0 %vm630_vm0, %v3120_v25 }
  0xdf   : > { %3598 = vmatmul.mubr.msk.bf16.gmra.mrb[60].mxu1 %vm630_vm0, %v3031_v33 }
  0xe0   : > { %3682 = vmatmul.mubr.msk.bf16.gmra.mrb[60].mxu0 %vm630_vm0, %v3121_v34  ;;  %3601 = vmatprep.mubr.msk.bf16.mxu1 %vm630_vm0, %v3032_v35 }
  0xe1   : > { %3685 = vmatprep.mubr.msk.bf16.mxu0 %vm630_vm0, %v3122_v36 }
  0xe7   : > { %3602 = vmatmul.mubr.msk.bf16.gmra.mrb[64].mxu1 %vm630_vm0, %v3033_v45 }
  0xe8   : > { %3686 = vmatmul.mubr.msk.bf16.gmra.mrb[64].mxu0 %vm630_vm0, %v3123_v46  ;;  %3605 = vmatprep.mubr.msk.bf16.mxu1 %vm630_vm0, %v3034_v48 }
  0xe9   : > { %3689 = vmatprep.mubr.msk.bf16.mxu0 %vm630_vm0, %v3124_v50 }
  0xef   : > { %3606 = vmatmul.mubr.msk.bf16.gmra.mrb[68].mxu1 %vm630_vm0, %v3035_v51 }
  0xf0   : > { %3690 = vmatmul.mubr.msk.bf16.gmra.mrb[68].mxu0 %vm630_vm0, %v4000_v52 }
  0xf2   : > { %v3455_v53 = vpop.f32.mrb[0].mxu1 }
  0xf3   : > { %v773_v54 = vpop.f32.mrb[1].mxu1 }
  0xf4   : > { %v3456_v55 = vpop.f32.mrb[2].mxu1 }
  0xf5   : > { %v776_v57 = vpop.f32.mrb[3].mxu1 }
  0xfa   : > { %v3459_v58 = vpop.f32.mrb[4].mxu1 }
  0xfb   : > { %v789_v60 = vpop.f32.mrb[5].mxu1 }
  0xfc   : > { %v4561_v62 = vpop.f32.mrb[6].mxu1 }
  0xfd   : > { %v4563_v63 = vpop.f32.mrb[7].mxu1 }
 0x102   : > { %v4565_v2 = vpop.f32.mrb[8].mxu1 }
 0x103   : > { %v4567_v3 = vpop.f32.mrb[9].mxu1 }
 0x104   : > { %v4569_v4 = vpop.f32.mrb[10].mxu1 }
 0x105   : > { %v4571_v5 = vpop.f32.mrb[11].mxu1 }
 0x10a   : > { %v4573_v6 = vpop.f32.mrb[12].mxu1 }
 0x10b   : > { %v4575_v8 = vpop.f32.mrb[13].mxu1 }
 0x10c   : > { %v4577_v11 = vpop.f32.mrb[14].mxu1 }
 0x10d   : > { %v4579_v14 = vpop.f32.mrb[15].mxu1 }
 0x112   : > { %v4581_v18 = vpop.f32.mrb[16].mxu1 }
 0x113   : > { %v4583_v24 = vpop.f32.mrb[17].mxu1 }
 0x114   : > { %v4585_v28 = vpop.f32.mrb[18].mxu1 }
 0x115   : > { %v4587_v30 = vpop.f32.mrb[19].mxu1 }
 0x11a   : > { %v4589_v9 = vpop.f32.mrb[20].mxu1 }
 0x11b   : > { %v4591_v49 = vpop.f32.mrb[21].mxu1 }
 0x11c   : > { %v4593_v56 = vpop.f32.mrb[22].mxu1 }
 0x11d   : > { %v4595_v59 = vpop.f32.mrb[23].mxu1 }
 0x122   : > { %v4597_v61 = vpop.f32.mrb[24].mxu1 }
 0x123   : > { %v4599_v0 = vpop.f32.mrb[25].mxu1 }
 0x124   : > { %v4601_v1 = vpop.f32.mrb[26].mxu1 }
 0x125   : > { %v4603_v7 = vpop.f32.mrb[27].mxu1 }
 0x12a   : > { %v4605_v10 = vpop.f32.mrb[28].mxu1 }
 0x12b   : > { %v4607_v12 = vpop.f32.mrb[29].mxu1 }
 0x12c   : > { %v4609_v19 = vpop.f32.mrb[30].mxu1 }
 0x12d   : > { %v4611_v31 = vpop.f32.mrb[31].mxu1 }
 0x132   : > { %v4613_v39 = vpop.f32.mrb[32].mxu1 }
 0x133   : > { %v4615_v41 = vpop.f32.mrb[33].mxu1 }
 0x134   : > { %v4617_v43 = vpop.f32.mrb[34].mxu1 }
 0x135   : > { %v4619_v44 = vpop.f32.mrb[35].mxu1 }
 0x13b   : > { %v3623_v47 = vpop.f32.mrb[0].mxu0 }
 0x13c   : > { %v3705_v15 = vadd.f32 %v3623_v47, %v3455_v53  ;;  %v1938_v21 = vpop.f32.mrb[1].mxu0 }
 0x13d   : > { %v3706_v16 = vadd.f32 %v1938_v21, %v773_v54  ;;  %v3624_v17 = vpop.f32.mrb[2].mxu0 }
 0x13e   : > { %v2306_v20 = vadd.f32 %v3705_v15, %v4624_v13  ;;  %v3707_v22 = vadd.f32 %v3624_v17, %v3456_v55  ;;  %v1941_v23 = vpop.f32.mrb[3].mxu0 }
 0x13f   : > { %v2304_v25 = vadd.f32 %v3706_v16, %v4624_v13  ;;  %v3708_v26 = vadd.f32 %v1941_v23, %v776_v57 }
 0x140   : > { %v2378_v27 = vmax.f32 %v2306_v20, 0.0  ;;  %v2307_v29 = vadd.f32 %v3707_v22, %v4624_v13 }
 0x141   : > { %v2376_v32 = vmax.f32 %v2304_v25, 0.0  ;;  %v2305_v33 = vadd.f32 %v3708_v26, %v4624_v13 }
 0x142   : > { %v3245_v34 = vpack.c.bf16 %v2378_v27, %v2378_v27  ;;  %v2379_v35 = vmax.f32 %v2307_v29, 0.0 }
 0x143   : > { %v3243_v36 = vpack.c.bf16 %v2376_v32, %v2376_v32  ;;  %v2377_v37 = vmax.f32 %v2305_v33, 0.0  ;;  %v3627_v38 = vpop.f32.mrb[4].mxu0 }
 0x144   : > { %2739 = vst.msk [vmem:[%s4633_s23 + $0x8] sm:$0xf] %vm2736_vm1, %v3245_v34  ;;  %v3246_v40 = vpack.c.bf16 %v2379_v35, %v2379_v35  ;;  %v3709_v42 = vadd.f32 %v3627_v38, %v3459_v58  ;;  %v1954_v45 = vpop.f32.mrb[5].mxu0 }
 0x145   : > { %2737 = vst.msk [vmem:[%s4633_s23] sm:$0xf] %vm2736_vm1, %v3243_v36  ;;  %v3244_v46 = vpack.c.bf16 %v2377_v37, %v2377_v37  ;;  %v3710_v48 = vadd.f32 %v1954_v45, %v789_v60  ;;  %v3628_v50 = vpop.f32.mrb[6].mxu0 }
 0x146   : > { %2740 = vst.msk [vmem:[%s4633_s23 + $0xc] sm:$0xf] %vm2736_vm1, %v3246_v40  ;;  %v2310_v51 = vadd.f32 %v3709_v42, %v4624_v13  ;;  %v3711_v52 = vadd.f32 %v3628_v50, %v4561_v62  ;;  %v1957_v53 = vpop.f32.mrb[7].mxu0 }
 0x147   : > { %2738 = vst.msk [vmem:[%s4633_s23 + $0x4] sm:$0xf] %vm2736_vm1, %v3244_v46  ;;  %v2308_v54 = vadd.f32 %v3710_v48, %v4624_v13  ;;  %v3712_v55 = vadd.f32 %v1957_v53, %v4563_v63 }
 0x148   : > { %v2382_v57 = vmax.f32 %v2310_v51, 0.0  ;;  %v2311_v58 = vadd.f32 %v3711_v52, %v4624_v13 }
 0x149   : > { %v2380_v60 = vmax.f32 %v2308_v54, 0.0  ;;  %v2309_v47 = vadd.f32 %v3712_v55, %v4624_v13 }
 0x14a   : > { %v3249_v15 = vpack.c.bf16 %v2382_v57, %v2382_v57  ;;  %v2383_v21 = vmax.f32 %v2311_v58, 0.0 }
 0x14b   : > { %v3247_v16 = vpack.c.bf16 %v2380_v60, %v2380_v60  ;;  %v2381_v62 = vmax.f32 %v2309_v47, 0.0  ;;  %v3631_v17 = vpop.f32.mrb[8].mxu0 }
 0x14c   : > { %2743 = vst.msk [vmem:[%s4633_s23 + $0x18] sm:$0xf] %vm2736_vm1, %v3249_v15  ;;  %v3250_v20 = vpack.c.bf16 %v2383_v21, %v2383_v21  ;;  %v3713_v22 = vadd.f32 %v3631_v17, %v4565_v2  ;;  %v1970_v23 = vpop.f32.mrb[9].mxu0 }
 0x14d   : > { %2741 = vst.msk [vmem:[%s4633_s23 + $0x10] sm:$0xf] %vm2736_vm1, %v3247_v16  ;;  %v3248_v63 = vpack.c.bf16 %v2381_v62, %v2381_v62  ;;  %v3714_v25 = vadd.f32 %v1970_v23, %v4567_v3  ;;  %v3632_v26 = vpop.f32.mrb[10].mxu0 }
 0x14e   : > { %2744 = vst.msk [vmem:[%s4633_s23 + $0x1c] sm:$0xf] %vm2736_vm1, %v3250_v20  ;;  %v2314_v27 = vadd.f32 %v3713_v22, %v4624_v13  ;;  %v3715_v29 = vadd.f32 %v3632_v26, %v4569_v4  ;;  %v1973_v32 = vpop.f32.mrb[11].mxu0 }
 0x14f   : > { %2742 = vst.msk [vmem:[%s4633_s23 + $0x14] sm:$0xf] %vm2736_vm1, %v3248_v63  ;;  %v2312_v2 = vadd.f32 %v3714_v25, %v4624_v13  ;;  %v3716_v33 = vadd.f32 %v1973_v32, %v4571_v5 }
 0x150   : > { %v2386_v34 = vmax.f32 %v2314_v27, 0.0  ;;  %v2315_v35 = vadd.f32 %v3715_v29, %v4624_v13 }
 0x151   : > { %v2384_v3 = vmax.f32 %v2312_v2, 0.0  ;;  %v2313_v36 = vadd.f32 %v3716_v33, %v4624_v13 }
 0x152   : > { %v3253_v37 = vpack.c.bf16 %v2386_v34, %v2386_v34  ;;  %v2387_v38 = vmax.f32 %v2315_v35, 0.0 }
 0x153   : > { %v3251_v40 = vpack.c.bf16 %v2384_v3, %v2384_v3  ;;  %v2385_v4 = vmax.f32 %v2313_v36, 0.0  ;;  %v3635_v42 = vpop.f32.mrb[12].mxu0 }
 0x154   : > { %2747 = vst.msk [vmem:[%s4633_s23 + $0x28] sm:$0xf] %vm2736_vm1, %v3253_v37  ;;  %v3254_v45 = vpack.c.bf16 %v2387_v38, %v2387_v38  ;;  %v3717_v46 = vadd.f32 %v3635_v42, %v4573_v6  ;;  %v1986_v48 = vpop.f32.mrb[13].mxu0 }
 0x155   : > { %2745 = vst.msk [vmem:[%s4633_s23 + $0x20] sm:$0xf] %vm2736_vm1, %v3251_v40  ;;  %v3252_v5 = vpack.c.bf16 %v2385_v4, %v2385_v4  ;;  %v3718_v50 = vadd.f32 %v1986_v48, %v4575_v8  ;;  %v3636_v51 = vpop.f32.mrb[14].mxu0 }
 0x156   : > { %2748 = vst.msk [vmem:[%s4633_s23 + $0x2c] sm:$0xf] %vm2736_vm1, %v3254_v45  ;;  %v2318_v52 = vadd.f32 %v3717_v46, %v4624_v13  ;;  %v3719_v53 = vadd.f32 %v3636_v51, %v4577_v11  ;;  %v1989_v54 = vpop.f32.mrb[15].mxu0 }
 0x157   : > { %2746 = vst.msk [vmem:[%s4633_s23 + $0x24] sm:$0xf] %vm2736_vm1, %v3252_v5  ;;  %v2316_v6 = vadd.f32 %v3718_v50, %v4624_v13  ;;  %v3720_v55 = vadd.f32 %v1989_v54, %v4579_v14 }
 0x158   : > { %v2390_v57 = vmax.f32 %v2318_v52, 0.0  ;;  %v2319_v58 = vadd.f32 %v3719_v53, %v4624_v13 }
 0x159   : > { %v2388_v8 = vmax.f32 %v2316_v6, 0.0  ;;  %v2317_v60 = vadd.f32 %v3720_v55, %v4624_v13 }
 0x15a   : > { %v3257_v47 = vpack.c.bf16 %v2390_v57, %v2390_v57  ;;  %v2391_v15 = vmax.f32 %v2319_v58, 0.0 }
 0x15b   : > { %v3255_v21 = vpack.c.bf16 %v2388_v8, %v2388_v8  ;;  %v2389_v11 = vmax.f32 %v2317_v60, 0.0  ;;  %v3639_v16 = vpop.f32.mrb[16].mxu0 }
 0x15c   : > { %2751 = vst.msk [vmem:[%s4633_s23 + $0x38] sm:$0xf] %vm2736_vm1, %v3257_v47  ;;  %v3258_v62 = vpack.c.bf16 %v2391_v15, %v2391_v15  ;;  %v3721_v17 = vadd.f32 %v3639_v16, %v4581_v18  ;;  %v2002_v20 = vpop.f32.mrb[17].mxu0 }
 0x15d   : > { %2749 = vst.msk [vmem:[%s4633_s23 + $0x30] sm:$0xf] %vm2736_vm1, %v3255_v21  ;;  %v3256_v14 = vpack.c.bf16 %v2389_v11, %v2389_v11  ;;  %v3722_v22 = vadd.f32 %v2002_v20, %v4583_v24  ;;  %v3640_v23 = vpop.f32.mrb[18].mxu0 }
 0x15e   : > { %2752 = vst.msk [vmem:[%s4633_s23 + $0x3c] sm:$0xf] %vm2736_vm1, %v3258_v62  ;;  %v2322_v63 = vadd.f32 %v3721_v17, %v4624_v13  ;;  %v3723_v25 = vadd.f32 %v3640_v23, %v4585_v28  ;;  %v2005_v26 = vpop.f32.mrb[19].mxu0 }
 0x15f   : > { %2750 = vst.msk [vmem:[%s4633_s23 + $0x34] sm:$0xf] %vm2736_vm1, %v3256_v14  ;;  %v2320_v18 = vadd.f32 %v3722_v22, %v4624_v13  ;;  %v3724_v27 = vadd.f32 %v2005_v26, %v4587_v30 }
 0x160   : > { %v2394_v29 = vmax.f32 %v2322_v63, 0.0  ;;  %v2323_v32 = vadd.f32 %v3723_v25, %v4624_v13 }
 0x161   : > { %v2392_v24 = vmax.f32 %v2320_v18, 0.0  ;;  %v2321_v2 = vadd.f32 %v3724_v27, %v4624_v13 }
 0x162   : > { %v3261_v33 = vpack.c.bf16 %v2394_v29, %v2394_v29  ;;  %v2395_v34 = vmax.f32 %v2323_v32, 0.0 }
 0x163   : > { %v3259_v35 = vpack.c.bf16 %v2392_v24, %v2392_v24  ;;  %v2393_v28 = vmax.f32 %v2321_v2, 0.0  ;;  %v3643_v3 = vpop.f32.mrb[20].mxu0 }
 0x164   : > { %2755 = vst.msk [vmem:[%s4633_s23 + $0x48] sm:$0xf] %vm2736_vm1, %v3261_v33  ;;  %v3262_v36 = vpack.c.bf16 %v2395_v34, %v2395_v34  ;;  %v3725_v37 = vadd.f32 %v3643_v3, %v4589_v9  ;;  %v2018_v38 = vpop.f32.mrb[21].mxu0 }
 0x165   : > { %2753 = vst.msk [vmem:[%s4633_s23 + $0x40] sm:$0xf] %vm2736_vm1, %v3259_v35  ;;  %v3260_v30 = vpack.c.bf16 %v2393_v28, %v2393_v28  ;;  %v3726_v40 = vadd.f32 %v2018_v38, %v4591_v49  ;;  %v3644_v4 = vpop.f32.mrb[22].mxu0 }
 0x166   : > { %2756 = vst.msk [vmem:[%s4633_s23 + $0x4c] sm:$0xf] %vm2736_vm1, %v3262_v36  ;;  %v2326_v42 = vadd.f32 %v3725_v37, %v4624_v13  ;;  %v3727_v45 = vadd.f32 %v3644_v4, %v4593_v56  ;;  %v2021_v46 = vpop.f32.mrb[23].mxu0 }
 0x167   : > { %2754 = vst.msk [vmem:[%s4633_s23 + $0x44] sm:$0xf] %vm2736_vm1, %v3260_v30  ;;  %v2324_v9 = vadd.f32 %v3726_v40, %v4624_v13  ;;  %v3728_v48 = vadd.f32 %v2021_v46, %v4595_v59 }
 0x168   : > { %v2398_v5 = vmax.f32 %v2326_v42, 0.0  ;;  %v2327_v50 = vadd.f32 %v3727_v45, %v4624_v13 }
 0x169   : > { %v2396_v49 = vmax.f32 %v2324_v9, 0.0  ;;  %v2325_v51 = vadd.f32 %v3728_v48, %v4624_v13 }
 0x16a   : > { %v3265_v52 = vpack.c.bf16 %v2398_v5, %v2398_v5  ;;  %v2399_v53 = vmax.f32 %v2327_v50, 0.0 }
 0x16b   : > { %v3263_v54 = vpack.c.bf16 %v2396_v49, %v2396_v49  ;;  %v2397_v56 = vmax.f32 %v2325_v51, 0.0  ;;  %v3647_v6 = vpop.f32.mrb[24].mxu0 }
 0x16c   : > { %2759 = vst.msk [vmem:[%s4633_s23 + $0x58] sm:$0xf] %vm2736_vm1, %v3265_v52  ;;  %v3266_v55 = vpack.c.bf16 %v2399_v53, %v2399_v53  ;;  %v3729_v57 = vadd.f32 %v3647_v6, %v4597_v61  ;;  %v2034_v58 = vpop.f32.mrb[25].mxu0 }
 0x16d   : > { %2757 = vst.msk [vmem:[%s4633_s23 + $0x50] sm:$0xf] %vm2736_vm1, %v3263_v54  ;;  %v3264_v59 = vpack.c.bf16 %v2397_v56, %v2397_v56  ;;  %v3730_v8 = vadd.f32 %v2034_v58, %v4599_v0  ;;  %v3648_v60 = vpop.f32.mrb[26].mxu0 }
 0x16e   : > { %2760 = vst.msk [vmem:[%s4633_s23 + $0x5c] sm:$0xf] %vm2736_vm1, %v3266_v55  ;;  %v2330_v47 = vadd.f32 %v3729_v57, %v4624_v13  ;;  %v3731_v15 = vadd.f32 %v3648_v60, %v4601_v1  ;;  %v2037_v21 = vpop.f32.mrb[27].mxu0 }
 0x16f   : > { %2758 = vst.msk [vmem:[%s4633_s23 + $0x54] sm:$0xf] %vm2736_vm1, %v3264_v59  ;;  %v2328_v61 = vadd.f32 %v3730_v8, %v4624_v13  ;;  %v3732_v11 = vadd.f32 %v2037_v21, %v4603_v7 }
 0x170   : > { %v2402_v16 = vmax.f32 %v2330_v47, 0.0  ;;  %v2331_v62 = vadd.f32 %v3731_v15, %v4624_v13 }
 0x171   : > { %v2400_v0 = vmax.f32 %v2328_v61, 0.0  ;;  %v2329_v17 = vadd.f32 %v3732_v11, %v4624_v13 }
 0x172   : > { %v3269_v20 = vpack.c.bf16 %v2402_v16, %v2402_v16  ;;  %v2403_v14 = vmax.f32 %v2331_v62, 0.0 }
 0x173   : > { %v3267_v22 = vpack.c.bf16 %v2400_v0, %v2400_v0  ;;  %v2401_v1 = vmax.f32 %v2329_v17, 0.0  ;;  %v3651_v23 = vpop.f32.mrb[28].mxu0 }
 0x174   : > { %2763 = vst.msk [vmem:[%s4633_s23 + $0x68] sm:$0xf] %vm2736_vm1, %v3269_v20  ;;  %v3270_v63 = vpack.c.bf16 %v2403_v14, %v2403_v14  ;;  %v3733_v25 = vadd.f32 %v3651_v23, %v4605_v10  ;;  %v2050_v26 = vpop.f32.mrb[29].mxu0 }
 0x175   : > { %2761 = vst.msk [vmem:[%s4633_s23 + $0x60] sm:$0xf] %vm2736_vm1, %v3267_v22  ;;  %v3268_v7 = vpack.c.bf16 %v2401_v1, %v2401_v1  ;;  %v3734_v18 = vadd.f32 %v2050_v26, %v4607_v12  ;;  %v3652_v27 = vpop.f32.mrb[30].mxu0 }
 0x176   : > { %2764 = vst.msk [vmem:[%s4633_s23 + $0x6c] sm:$0xf] %vm2736_vm1, %v3270_v63  ;;  %v2334_v29 = vadd.f32 %v3733_v25, %v4624_v13  ;;  %v3735_v32 = vadd.f32 %v3652_v27, %v4609_v19  ;;  %v2053_v24 = vpop.f32.mrb[31].mxu0 }
 0x177   : > { %2762 = vst.msk [vmem:[%s4633_s23 + $0x64] sm:$0xf] %vm2736_vm1, %v3268_v7  ;;  %v2332_v10 = vadd.f32 %v3734_v18, %v4624_v13  ;;  %v3736_v2 = vadd.f32 %v2053_v24, %v4611_v31 }
 0x178   : > { %v2406_v33 = vmax.f32 %v2334_v29, 0.0  ;;  %v2335_v34 = vadd.f32 %v3735_v32, %v4624_v13 }
 0x179   : > { %v2404_v12 = vmax.f32 %v2332_v10, 0.0  ;;  %v2333_v35 = vadd.f32 %v3736_v2, %v4624_v13 }
 0x17a   : > { %v3273_v28 = vpack.c.bf16 %v2406_v33, %v2406_v33  ;;  %v2407_v3 = vmax.f32 %v2335_v34, 0.0 }
 0x17b   : > { %v3271_v36 = vpack.c.bf16 %v2404_v12, %v2404_v12  ;;  %v2405_v19 = vmax.f32 %v2333_v35, 0.0  ;;  %v3655_v37 = vpop.f32.mrb[32].mxu0 }
 0x17c   : > { %2767 = vst.msk [vmem:[%s4633_s23 + $0x78] sm:$0xf] %vm2736_vm1, %v3273_v28  ;;  %v3274_v38 = vpack.c.bf16 %v2407_v3, %v2407_v3  ;;  %v3737_v30 = vadd.f32 %v3655_v37, %v4613_v39  ;;  %v2066_v40 = vpop.f32.mrb[33].mxu0 }
 0x17d   : > { %2765 = vst.msk [vmem:[%s4633_s23 + $0x70] sm:$0xf] %vm2736_vm1, %v3271_v36  ;;  %v3272_v31 = vpack.c.bf16 %v2405_v19, %v2405_v19  ;;  %v3738_v4 = vadd.f32 %v2066_v40, %v4615_v41  ;;  %v3656_v42 = vpop.f32.mrb[34].mxu0 }
 0x17e   : > { %2768 = vst.msk [vmem:[%s4633_s23 + $0x7c] sm:$0xf] %vm2736_vm1, %v3274_v38  ;;  %v2338_v45 = vadd.f32 %v3737_v30, %v4624_v13  ;;  %v3739_v46 = vadd.f32 %v3656_v42, %v4617_v43  ;;  %v2069_v9 = vpop.f32.mrb[35].mxu0 }
 0x17f   : > { %2766 = vst.msk [vmem:[%s4633_s23 + $0x74] sm:$0xf] %vm2736_vm1, %v3272_v31  ;;  %v2336_v48 = vadd.f32 %v3738_v4, %v4624_v13  ;;  %v3740_v39 = vadd.f32 %v2069_v9, %v4619_v44 }
 0x180   : > { %v2410_v5 = vmax.f32 %v2338_v45, 0.0  ;;  %v2339_v50 = vadd.f32 %v3739_v46, %v4624_v13 }
 0x181   : > { %v2408_v41 = vmax.f32 %v2336_v48, 0.0  ;;  %v2337_v49 = vadd.f32 %v3740_v39, %v4624_v13 }
 0x182   : > { %v3277_v51 = vpack.c.bf16 %v2410_v5, %v2410_v5  ;;  %v2411_v52 = vmax.f32 %v2339_v50, 0.0  ;;  %v3575_v53 = vpop.f32.mrb[36].mxu1 }
 0x183   : > { %v3275_v43 = vpack.c.bf16 %v2408_v41, %v2408_v41  ;;  %v2409_v54 = vmax.f32 %v2337_v49, 0.0  ;;  %v3659_v56 = vpop.f32.mrb[36].mxu0  ;;  %v1562_v6 = vpop.f32.mrb[37].mxu1 }
 0x184   : > { %2771 = vst.msk [vmem:[%s4633_s23 + $0x88] sm:$0xf] %vm2736_vm1, %v3277_v51  ;;  %v3278_v55 = vpack.c.bf16 %v2411_v52, %v2411_v52  ;;  %v3741_v44 = vadd.f32 %v3659_v56, %v3575_v53  ;;  %v2082_v57 = vpop.f32.mrb[37].mxu0  ;;  %v3576_v58 = vpop.f32.mrb[38].mxu1 }
 0x185   : > { %2769 = vst.msk [vmem:[%s4633_s23 + $0x80] sm:$0xf] %vm2736_vm1, %v3275_v43  ;;  %v3276_v59 = vpack.c.bf16 %v2409_v54, %v2409_v54  ;;  %v3742_v8 = vadd.f32 %v2082_v57, %v1562_v6  ;;  %v3660_v60 = vpop.f32.mrb[38].mxu0  ;;  %v1565_v47 = vpop.f32.mrb[39].mxu1 }
 0x186   : > { %2772 = vst.msk [vmem:[%s4633_s23 + $0x8c] sm:$0xf] %vm2736_vm1, %v3278_v55  ;;  %v2342_v15 = vadd.f32 %v3741_v44, %v4624_v13  ;;  %v3743_v21 = vadd.f32 %v3660_v60, %v3576_v58  ;;  %v2085_v61 = vpop.f32.mrb[39].mxu0 }
 0x187   : > { %2770 = vst.msk [vmem:[%s4633_s23 + $0x84] sm:$0xf] %vm2736_vm1, %v3276_v59  ;;  %v2340_v11 = vadd.f32 %v3742_v8, %v4624_v13  ;;  %v3744_v16 = vadd.f32 %v2085_v61, %v1565_v47 }
 0x188   : > { %v2414_v62 = vmax.f32 %v2342_v15, 0.0  ;;  %v2343_v0 = vadd.f32 %v3743_v21, %v4624_v13 }
 0x189   : > { %v2412_v17 = vmax.f32 %v2340_v11, 0.0  ;;  %v2341_v20 = vadd.f32 %v3744_v16, %v4624_v13 }
 0x18a   : > { %v3281_v14 = vpack.c.bf16 %v2414_v62, %v2414_v62  ;;  %v2415_v22 = vmax.f32 %v2343_v0, 0.0  ;;  %v3579_v1 = vpop.f32.mrb[40].mxu1 }
 0x18b   : > { %v3279_v23 = vpack.c.bf16 %v2412_v17, %v2412_v17  ;;  %v2413_v63 = vmax.f32 %v2341_v20, 0.0  ;;  %v3663_v25 = vpop.f32.mrb[40].mxu0  ;;  %v1578_v26 = vpop.f32.mrb[41].mxu1 }
 0x18c   : > { %2775 = vst.msk [vmem:[%s4633_s23 + $0x98] sm:$0xf] %vm2736_vm1, %v3281_v14  ;;  %v3282_v7 = vpack.c.bf16 %v2415_v22, %v2415_v22  ;;  %v3745_v18 = vadd.f32 %v3663_v25, %v3579_v1  ;;  %v2098_v27 = vpop.f32.mrb[41].mxu0  ;;  %v3580_v29 = vpop.f32.mrb[42].mxu1 }
 0x18d   : > { %2773 = vst.msk [vmem:[%s4633_s23 + $0x90] sm:$0xf] %vm2736_vm1, %v3279_v23  ;;  %v3280_v32 = vpack.c.bf16 %v2413_v63, %v2413_v63  ;;  %v3746_v24 = vadd.f32 %v2098_v27, %v1578_v26  ;;  %v3664_v10 = vpop.f32.mrb[42].mxu0  ;;  %v1581_v2 = vpop.f32.mrb[43].mxu1 }
 0x18e   : > { %2776 = vst.msk [vmem:[%s4633_s23 + $0x9c] sm:$0xf] %vm2736_vm1, %v3282_v7  ;;  %v2346_v33 = vadd.f32 %v3745_v18, %v4624_v13  ;;  %v3747_v34 = vadd.f32 %v3664_v10, %v3580_v29  ;;  %v2101_v12 = vpop.f32.mrb[43].mxu0 }
 0x18f   : > { %2774 = vst.msk [vmem:[%s4633_s23 + $0x94] sm:$0xf] %vm2736_vm1, %v3280_v32  ;;  %v2344_v35 = vadd.f32 %v3746_v24, %v4624_v13  ;;  %v3748_v28 = vadd.f32 %v2101_v12, %v1581_v2 }
 0x190   : > { %v2418_v3 = vmax.f32 %v2346_v33, 0.0  ;;  %v2347_v36 = vadd.f32 %v3747_v34, %v4624_v13 }
 0x191   : > { %v2416_v19 = vmax.f32 %v2344_v35, 0.0  ;;  %v2345_v37 = vadd.f32 %v3748_v28, %v4624_v13 }
 0x192   : > { %v3285_v38 = vpack.c.bf16 %v2418_v3, %v2418_v3  ;;  %v2419_v30 = vmax.f32 %v2347_v36, 0.0  ;;  %v3583_v40 = vpop.f32.mrb[44].mxu1 }
 0x193   : > { %v3283_v31 = vpack.c.bf16 %v2416_v19, %v2416_v19  ;;  %v2417_v4 = vmax.f32 %v2345_v37, 0.0  ;;  %v3667_v42 = vpop.f32.mrb[44].mxu0  ;;  %v1594_v45 = vpop.f32.mrb[45].mxu1 }
 0x194   : > { %2779 = vst.msk [vmem:[%s4633_s23 + $0xa8] sm:$0xf] %vm2736_vm1, %v3285_v38  ;;  %v3286_v46 = vpack.c.bf16 %v2419_v30, %v2419_v30  ;;  %v3749_v9 = vadd.f32 %v3667_v42, %v3583_v40  ;;  %v2114_v48 = vpop.f32.mrb[45].mxu0  ;;  %v3584_v39 = vpop.f32.mrb[46].mxu1 }
 0x195   : > { %2777 = vst.msk [vmem:[%s4633_s23 + $0xa0] sm:$0xf] %vm2736_vm1, %v3283_v31  ;;  %v3284_v5 = vpack.c.bf16 %v2417_v4, %v2417_v4  ;;  %v3750_v50 = vadd.f32 %v2114_v48, %v1594_v45  ;;  %v3668_v41 = vpop.f32.mrb[46].mxu0  ;;  %v1597_v49 = vpop.f32.mrb[47].mxu1 }
 0x196   : > { %2780 = vst.msk [vmem:[%s4633_s23 + $0xac] sm:$0xf] %vm2736_vm1, %v3286_v46  ;;  %v2350_v51 = vadd.f32 %v3749_v9, %v4624_v13  ;;  %v3751_v52 = vadd.f32 %v3668_v41, %v3584_v39  ;;  %v2117_v53 = vpop.f32.mrb[47].mxu0 }
 0x197   : > { %2778 = vst.msk [vmem:[%s4633_s23 + $0xa4] sm:$0xf] %vm2736_vm1, %v3284_v5  ;;  %v2348_v43 = vadd.f32 %v3750_v50, %v4624_v13  ;;  %v3752_v54 = vadd.f32 %v2117_v53, %v1597_v49 }
 0x198   : > { %v2422_v56 = vmax.f32 %v2350_v51, 0.0  ;;  %v2351_v6 = vadd.f32 %v3751_v52, %v4624_v13 }
 0x199   : > { %v2420_v55 = vmax.f32 %v2348_v43, 0.0  ;;  %v2349_v44 = vadd.f32 %v3752_v54, %v4624_v13 }
 0x19a   : > { %v3289_v57 = vpack.c.bf16 %v2422_v56, %v2422_v56  ;;  %v2423_v58 = vmax.f32 %v2351_v6, 0.0  ;;  %v3587_v59 = vpop.f32.mrb[48].mxu1 }
 0x19b   : > { %v3287_v8 = vpack.c.bf16 %v2420_v55, %v2420_v55  ;;  %v2421_v60 = vmax.f32 %v2349_v44, 0.0  ;;  %v3671_v47 = vpop.f32.mrb[48].mxu0  ;;  %v1610_v15 = vpop.f32.mrb[49].mxu1 }
 0x19c   : > { %2783 = vst.msk [vmem:[%s4633_s23 + $0xb8] sm:$0xf] %vm2736_vm1, %v3289_v57  ;;  %v3290_v21 = vpack.c.bf16 %v2423_v58, %v2423_v58  ;;  %v3753_v61 = vadd.f32 %v3671_v47, %v3587_v59  ;;  %v2130_v11 = vpop.f32.mrb[49].mxu0  ;;  %v3588_v16 = vpop.f32.mrb[50].mxu1 }
 0x19d   : > { %2781 = vst.msk [vmem:[%s4633_s23 + $0xb0] sm:$0xf] %vm2736_vm1, %v3287_v8  ;;  %v3288_v62 = vpack.c.bf16 %v2421_v60, %v2421_v60  ;;  %v3754_v0 = vadd.f32 %v2130_v11, %v1610_v15  ;;  %v3672_v17 = vpop.f32.mrb[50].mxu0  ;;  %v1613_v20 = vpop.f32.mrb[51].mxu1 }
 0x19e   : > { %2784 = vst.msk [vmem:[%s4633_s23 + $0xbc] sm:$0xf] %vm2736_vm1, %v3290_v21  ;;  %v2354_v14 = vadd.f32 %v3753_v61, %v4624_v13  ;;  %v3755_v22 = vadd.f32 %v3672_v17, %v3588_v16  ;;  %v2133_v1 = vpop.f32.mrb[51].mxu0 }
 0x19f   : > { %2782 = vst.msk [vmem:[%s4633_s23 + $0xb4] sm:$0xf] %vm2736_vm1, %v3288_v62  ;;  %v2352_v23 = vadd.f32 %v3754_v0, %v4624_v13  ;;  %v3756_v63 = vadd.f32 %v2133_v1, %v1613_v20 }
 0x1a0   : > { %v2426_v25 = vmax.f32 %v2354_v14, 0.0  ;;  %v2355_v26 = vadd.f32 %v3755_v22, %v4624_v13 }
 0x1a1   : > { %v2424_v7 = vmax.f32 %v2352_v23, 0.0  ;;  %v2353_v18 = vadd.f32 %v3756_v63, %v4624_v13 }
 0x1a2   : > { %v3293_v27 = vpack.c.bf16 %v2426_v25, %v2426_v25  ;;  %v2427_v29 = vmax.f32 %v2355_v26, 0.0  ;;  %v3591_v32 = vpop.f32.mrb[52].mxu1 }
 0x1a3   : > { %v3291_v24 = vpack.c.bf16 %v2424_v7, %v2424_v7  ;;  %v2425_v10 = vmax.f32 %v2353_v18, 0.0  ;;  %v3675_v2 = vpop.f32.mrb[52].mxu0  ;;  %v1626_v33 = vpop.f32.mrb[53].mxu1 }
 0x1a4   : > { %2787 = vst.msk [vmem:[%s4633_s23 + $0xc8] sm:$0xf] %vm2736_vm1, %v3293_v27  ;;  %v3294_v34 = vpack.c.bf16 %v2427_v29, %v2427_v29  ;;  %v3757_v12 = vadd.f32 %v3675_v2, %v3591_v32  ;;  %v2146_v35 = vpop.f32.mrb[53].mxu0  ;;  %v3592_v28 = vpop.f32.mrb[54].mxu1 }
 0x1a5   : > { %2785 = vst.msk [vmem:[%s4633_s23 + $0xc0] sm:$0xf] %vm2736_vm1, %v3291_v24  ;;  %v3292_v3 = vpack.c.bf16 %v2425_v10, %v2425_v10  ;;  %v3758_v36 = vadd.f32 %v2146_v35, %v1626_v33  ;;  %v3676_v19 = vpop.f32.mrb[54].mxu0  ;;  %v1629_v37 = vpop.f32.mrb[55].mxu1 }
 0x1a6   : > { %2788 = vst.msk [vmem:[%s4633_s23 + $0xcc] sm:$0xf] %vm2736_vm1, %v3294_v34  ;;  %v2358_v38 = vadd.f32 %v3757_v12, %v4624_v13  ;;  %v3759_v30 = vadd.f32 %v3676_v19, %v3592_v28  ;;  %v2149_v40 = vpop.f32.mrb[55].mxu0 }
 0x1a7   : > { %2786 = vst.msk [vmem:[%s4633_s23 + $0xc4] sm:$0xf] %vm2736_vm1, %v3292_v3  ;;  %v2356_v31 = vadd.f32 %v3758_v36, %v4624_v13  ;;  %v3760_v4 = vadd.f32 %v2149_v40, %v1629_v37 }
 0x1a8   : > { %v2430_v42 = vmax.f32 %v2358_v38, 0.0  ;;  %v2359_v45 = vadd.f32 %v3759_v30, %v4624_v13 }
 0x1a9   : > { %v2428_v46 = vmax.f32 %v2356_v31, 0.0  ;;  %v2357_v9 = vadd.f32 %v3760_v4, %v4624_v13 }
 0x1aa   : > { %v3297_v48 = vpack.c.bf16 %v2430_v42, %v2430_v42  ;;  %v2431_v39 = vmax.f32 %v2359_v45, 0.0  ;;  %v3595_v5 = vpop.f32.mrb[56].mxu1 }
 0x1ab   : > { %v3295_v50 = vpack.c.bf16 %v2428_v46, %v2428_v46  ;;  %v2429_v41 = vmax.f32 %v2357_v9, 0.0  ;;  %v3679_v49 = vpop.f32.mrb[56].mxu0  ;;  %v1642_v51 = vpop.f32.mrb[57].mxu1 }
 0x1ac   : > { %2791 = vst.msk [vmem:[%s4633_s23 + $0xd8] sm:$0xf] %vm2736_vm1, %v3297_v48  ;;  %v3298_v52 = vpack.c.bf16 %v2431_v39, %v2431_v39  ;;  %v3761_v53 = vadd.f32 %v3679_v49, %v3595_v5  ;;  %v2162_v43 = vpop.f32.mrb[57].mxu0  ;;  %v3596_v54 = vpop.f32.mrb[58].mxu1 }
 0x1ad   : > { %2789 = vst.msk [vmem:[%s4633_s23 + $0xd0] sm:$0xf] %vm2736_vm1, %v3295_v50  ;;  %v3296_v56 = vpack.c.bf16 %v2429_v41, %v2429_v41  ;;  %v3762_v6 = vadd.f32 %v2162_v43, %v1642_v51  ;;  %v3680_v55 = vpop.f32.mrb[58].mxu0  ;;  %v1645_v44 = vpop.f32.mrb[59].mxu1 }
 0x1ae   : > { %2792 = vst.msk [vmem:[%s4633_s23 + $0xdc] sm:$0xf] %vm2736_vm1, %v3298_v52  ;;  %v2362_v57 = vadd.f32 %v3761_v53, %v4624_v13  ;;  %v3763_v58 = vadd.f32 %v3680_v55, %v3596_v54  ;;  %v2165_v59 = vpop.f32.mrb[59].mxu0 }
 0x1af   : > { %2790 = vst.msk [vmem:[%s4633_s23 + $0xd4] sm:$0xf] %vm2736_vm1, %v3296_v56  ;;  %v2360_v8 = vadd.f32 %v3762_v6, %v4624_v13  ;;  %v3764_v60 = vadd.f32 %v2165_v59, %v1645_v44 }
 0x1b0   : > { %v2434_v47 = vmax.f32 %v2362_v57, 0.0  ;;  %v2363_v15 = vadd.f32 %v3763_v58, %v4624_v13 }
 0x1b1   : > { %v2432_v21 = vmax.f32 %v2360_v8, 0.0  ;;  %v2361_v61 = vadd.f32 %v3764_v60, %v4624_v13 }
 0x1b2   : > { %v3301_v11 = vpack.c.bf16 %v2434_v47, %v2434_v47  ;;  %v2435_v16 = vmax.f32 %v2363_v15, 0.0  ;;  %v3599_v62 = vpop.f32.mrb[60].mxu1 }
 0x1b3   : > { %v3299_v0 = vpack.c.bf16 %v2432_v21, %v2432_v21  ;;  %v2433_v17 = vmax.f32 %v2361_v61, 0.0  ;;  %v3683_v20 = vpop.f32.mrb[60].mxu0  ;;  %v1658_v14 = vpop.f32.mrb[61].mxu1 }
 0x1b4   : > { %2795 = vst.msk [vmem:[%s4633_s23 + $0xe8] sm:$0xf] %vm2736_vm1, %v3301_v11  ;;  %v3302_v22 = vpack.c.bf16 %v2435_v16, %v2435_v16  ;;  %v3765_v1 = vadd.f32 %v3683_v20, %v3599_v62  ;;  %v2178_v23 = vpop.f32.mrb[61].mxu0  ;;  %v3600_v63 = vpop.f32.mrb[62].mxu1 }
 0x1b5   : > { %2793 = vst.msk [vmem:[%s4633_s23 + $0xe0] sm:$0xf] %vm2736_vm1, %v3299_v0  ;;  %v3300_v25 = vpack.c.bf16 %v2433_v17, %v2433_v17  ;;  %v3766_v26 = vadd.f32 %v2178_v23, %v1658_v14  ;;  %v3684_v7 = vpop.f32.mrb[62].mxu0  ;;  %v1661_v18 = vpop.f32.mrb[63].mxu1 }
 0x1b6   : > { %2796 = vst.msk [vmem:[%s4633_s23 + $0xec] sm:$0xf] %vm2736_vm1, %v3302_v22  ;;  %v2366_v27 = vadd.f32 %v3765_v1, %v4624_v13  ;;  %v3767_v29 = vadd.f32 %v3684_v7, %v3600_v63  ;;  %v2181_v32 = vpop.f32.mrb[63].mxu0 }
 0x1b7   : > { %2794 = vst.msk [vmem:[%s4633_s23 + $0xe4] sm:$0xf] %vm2736_vm1, %v3300_v25  ;;  %v2364_v24 = vadd.f32 %v3766_v26, %v4624_v13  ;;  %v3768_v10 = vadd.f32 %v2181_v32, %v1661_v18 }
 0x1b8   : > { %v2438_v2 = vmax.f32 %v2366_v27, 0.0  ;;  %v2367_v33 = vadd.f32 %v3767_v29, %v4624_v13 }
 0x1b9   : > { %v2436_v34 = vmax.f32 %v2364_v24, 0.0  ;;  %v2365_v12 = vadd.f32 %v3768_v10, %v4624_v13 }
 0x1ba   : > { %v3305_v35 = vpack.c.bf16 %v2438_v2, %v2438_v2  ;;  %v2439_v28 = vmax.f32 %v2367_v33, 0.0  ;;  %v3603_v3 = vpop.f32.mrb[64].mxu1 }
 0x1bb   : > { %v3303_v36 = vpack.c.bf16 %v2436_v34, %v2436_v34  ;;  %v2437_v19 = vmax.f32 %v2365_v12, 0.0  ;;  %v3687_v37 = vpop.f32.mrb[64].mxu0  ;;  %v1674_v38 = vpop.f32.mrb[65].mxu1 }
 0x1bc   : > { %2799 = vst.msk [vmem:[%s4633_s23 + $0xf8] sm:$0xf] %vm2736_vm1, %v3305_v35  ;;  %v3306_v30 = vpack.c.bf16 %v2439_v28, %v2439_v28  ;;  %v3769_v40 = vadd.f32 %v3687_v37, %v3603_v3  ;;  %v2194_v31 = vpop.f32.mrb[65].mxu0  ;;  %v3604_v4 = vpop.f32.mrb[66].mxu1 }
 0x1bd   : > { %2797 = vst.msk [vmem:[%s4633_s23 + $0xf0] sm:$0xf] %vm2736_vm1, %v3303_v36  ;;  %v3304_v42 = vpack.c.bf16 %v2437_v19, %v2437_v19  ;;  %v3770_v45 = vadd.f32 %v2194_v31, %v1674_v38  ;;  %v3688_v46 = vpop.f32.mrb[66].mxu0  ;;  %v1677_v9 = vpop.f32.mrb[67].mxu1 }
 0x1be   : > { %2800 = vst.msk [vmem:[%s4633_s23 + $0xfc] sm:$0xf] %vm2736_vm1, %v3306_v30  ;;  %v2370_v48 = vadd.f32 %v3769_v40, %v4624_v13  ;;  %v3771_v39 = vadd.f32 %v3688_v46, %v3604_v4  ;;  %v2197_v5 = vpop.f32.mrb[67].mxu0 }
 0x1bf   : > { %2798 = vst.msk [vmem:[%s4633_s23 + $0xf4] sm:$0xf] %vm2736_vm1, %v3304_v42  ;;  %v2368_v50 = vadd.f32 %v3770_v45, %v4624_v13  ;;  %v3772_v41 = vadd.f32 %v2197_v5, %v1677_v9 }
 0x1c0   : > { %v2442_v49 = vmax.f32 %v2370_v48, 0.0  ;;  %v2371_v51 = vadd.f32 %v3771_v39, %v4624_v13 }
 0x1c1   : > { %v2440_v52 = vmax.f32 %v2368_v50, 0.0  ;;  %v2369_v53 = vadd.f32 %v3772_v41, %v4624_v13 }
 0x1c2   : > { %v3309_v43 = vpack.c.bf16 %v2442_v49, %v2442_v49  ;;  %v2443_v54 = vmax.f32 %v2371_v51, 0.0  ;;  %v3607_v56 = vpop.f32.mrb[68].mxu1 }
 0x1c3   : > { %v3307_v6 = vpack.c.bf16 %v2440_v52, %v2440_v52  ;;  %v2441_v55 = vmax.f32 %v2369_v53, 0.0  ;;  %v3691_v44 = vpop.f32.mrb[68].mxu0  ;;  %v1690_v57 = vpop.f32.mrb[69].mxu1 }
 0x1c4   : > { %2803 = vst.msk [vmem:[%s4633_s23 + $0x108] sm:$0xf] %vm2736_vm1, %v3309_v43  ;;  %v3310_v58 = vpack.c.bf16 %v2443_v54, %v2443_v54  ;;  %v3773_v59 = vadd.f32 %v3691_v44, %v3607_v56  ;;  %v2210_v8 = vpop.f32.mrb[69].mxu0  ;;  %v3608_v60 = vpop.f32.mrb[70].mxu1 }
 0x1c5   : > { %2801 = vst.msk [vmem:[%s4633_s23 + $0x100] sm:$0xf] %vm2736_vm1, %v3307_v6  ;;  %v3308_v47 = vpack.c.bf16 %v2441_v55, %v2441_v55  ;;  %v3774_v15 = vadd.f32 %v2210_v8, %v1690_v57  ;;  %v3692_v21 = vpop.f32.mrb[70].mxu0  ;;  %v1693_v61 = vpop.f32.mrb[71].mxu1 }
 0x1c6   : > { %2804 = vst.msk [vmem:[%s4633_s23 + $0x10c] sm:$0xf] %vm2736_vm1, %v3310_v58  ;;  %v2374_v11 = vadd.f32 %v3773_v59, %v4624_v13  ;;  %v3775_v16 = vadd.f32 %v3692_v21, %v3608_v60  ;;  %v2213_v62 = vpop.f32.mrb[71].mxu0 }
 0x1c7   : > { %2802 = vst.msk [vmem:[%s4633_s23 + $0x104] sm:$0xf] %vm2736_vm1, %v3308_v47  ;;  %v2372_v0 = vadd.f32 %v3774_v15, %v4624_v13  ;;  %v3776_v17 = vadd.f32 %v2213_v62, %v1693_v61 }
 0x1c8   : > { %v2446_v20 = vmax.f32 %v2374_v11, 0.0  ;;  %v2375_v14 = vadd.f32 %v3775_v16, %v4624_v13 }
 0x1c9   : > { %v2444_v22 = vmax.f32 %v2372_v0, 0.0  ;;  %v2373_v1 = vadd.f32 %v3776_v17, %v4624_v13 }
 0x1ca   : > { %v3313_v23 = vpack.c.bf16 %v2446_v20, %v2446_v20  ;;  %v2447_v63 = vmax.f32 %v2375_v14, 0.0 }
 0x1cb   : > { %v3311_v25 = vpack.c.bf16 %v2444_v22, %v2444_v22  ;;  %v2445_v26 = vmax.f32 %v2373_v1, 0.0 }
 0x1cc   : > { %2807 = vst.msk [vmem:[%s4633_s23 + $0x118] sm:$0xf] %vm2736_vm1, %v3313_v23  ;;  %v3314_v7 = vpack.c.bf16 %v2447_v63, %v2447_v63 }
 0x1cd   : > { %2805 = vst.msk [vmem:[%s4633_s23 + $0x110] sm:$0xf] %vm2736_vm1, %v3311_v25  ;;  %v3312_v18 = vpack.c.bf16 %v2445_v26, %v2445_v26 }
 0x1ce   : > { %2808 = vst.msk [vmem:[%s4633_s23 + $0x11c] sm:$0xf] %vm2736_vm1, %v3314_v7 }
 0x1cf   : > { %2806 = vst.msk [vmem:[%s4633_s23 + $0x114] sm:$0xf] %vm2736_vm1, %v3312_v18 }
 0x1d0 PF: > { %s14_s17 = sadd.s32 1, %s4023_s17   ;;  %s4892_s15 = smov %s4019_s16 }
 0x1d1   : > { %p11_p5 = scmp.ge.s32.totalorder %s14_s17, 4   ;;  %s4893_s16 = smov %s4895_s18 }
 0x1d3   :  { %13 = sbr.rel (!%p11_p5) target bundleno = 2 (0x2), region = 71 }

// kernel: actor_net_forward.7
= control target key start
LH: loop header
LB: loop body
LE: loop exit
PB: predicated region body
PF: predicated region fallthrough
CT: control target
= control target key end

     0   :  { %s1665_s15 = smov 0   ;;  %s1667_s16 = smov 0   ;;  %s2014_s0 = inlined_call_operand.vmem [shape: bf16[2,156,96], index: 0, kind: input, shape index: {}]   ;;  %s2015_s1 = inlined_call_operand.vmem [shape: bf16[2,156,96], index: 1, kind: input, shape index: {}]   ;;  %s2016_s2 = inlined_call_operand.vmem [shape: bf16[3,96,32], index: 2, kind: input, shape index: {}]   ;;  %s2017_s3 = inlined_call_operand.vmem [shape: f32[1,32], index: 3, kind: input, shape index: {}]   ;;  %s2018_s4 = inlined_call_operand.vmem [shape: bf16[2,144,32], index: 4, kind: output, shape index: {}]  }
   0x1   :  { %s1669_s17 = smov 0  }
   0x2 LB: > { %s26_s18 = sadd.s32 1, %s1632_s16  ;;  %p1199_p0 = scmp.ge.s32.totalorder %s1636_s17, 1  ;;  %s1636_s17 = sphi %s1669_s17, %s14_s17   ;;  %s1632_s16 = sphi %s1667_s16, %s2020_s16   ;;  %s1628_s15 = sphi %s1665_s15, %s2019_s15  }
   0x3   : > { %p28_p1 = scmp.ge.s32.totalorder %s26_s18, 2  ;;  %p186_p2 = scmp.lt.s32.totalorder %s1636_s17, 3 }
   0x5   : > { %s2022_s18 = smov (%p28_p1, %s26_s18), 0  ;;  %p187_p3 = pnand %p1199_p0, %p186_p2 }
   0x6   : > { %v1568_v0 = vld [vmem:[%s2016_s2 + $0x30] sm:$0xff] (!%p187_p3)   ;;  %v1638_v1 = vmov (!%p187_p3), 0.0   ;;  %v1569_v2 = vld [vmem:[%s2016_s2 + $0x38] sm:$0xff] (!%p187_p3)   ;;  %p221_p4 = scmp.lt.s32.totalorder (!%p187_p3), %s1628_s15, 1  ;;  %vm1639_vm0 = vmmov (!%p187_p3), 0   ;;  %v1570_v3 = vld [vmem:[%s2016_s2 + $0x40] sm:$0xff] (!%p187_p3)  }
   0x7   : > { %190 = sbr.rel (%p187_p3) target bundleno = 358 (0x166), region = 36  ;;  %1384 = vmatprep.subr.bf16.mxu0 (!%p187_p3), %v1638_v1  ;;  %1528 = vmatprep.subr.bf16.mxu1 (!%p187_p3), %v1638_v1  ;;  %v1571_v4 = vld [vmem:[%s2016_s2 + $0x48] sm:$0xff] (!%p187_p3)   ;;  %v1572_v5 = vld [vmem:[%s2016_s2 + $0x50] sm:$0xff] (!%p187_p3)   ;;  %v1573_v6 = vld [vmem:[%s2016_s2 + $0x58] sm:$0xff] (!%p187_p3)   ;;  %vm387_vm1 = vcmask (!%p187_p3), 785408   ;;  %vm762_vm2 = vcmask (!%p187_p3), 1045504  }
   0x8   : > { %1385 = vmatpush3.bf16.msra.mxu0 (!%p187_p3), %v1568_v0  ;;  %1534 = vmatpush3.bf16.msra.mxu1 (!%p187_p3), %v1568_v0  ;;  %v1576_v9 = vld [vmem:[%s2016_s2 + $0x60] sm:$0xff] (!%p187_p3)   ;;  %v1580_v11 = vld [vmem:[%s2016_s2 + $0x68] sm:$0xff] (!%p187_p3)   ;;  %v1582_v15 = vld [vmem:[%s2016_s2 + $0x70] sm:$0xff] (!%p187_p3)   ;;  %vm1083_vm3 = vcmask (!%p187_p3), 257024  }
   0x9   : > { %1386 = vmatprep.subr.bf16.mxu0 (!%p187_p3), %v1638_v1  ;;  %1529 = vmatprep.subr.bf16.mxu1 (!%p187_p3), %v1638_v1  ;;  %v1577_v10 = vld [vmem:[%s2016_s2] sm:$0xff] (!%p187_p3)   ;;  %v1581_v12 = vld [vmem:[%s2016_s2 + $0x8] sm:$0xff] (!%p187_p3)   ;;  %v1585_v16 = vld [vmem:[%s2016_s2 + $0x10] sm:$0xff] (!%p187_p3)  }
   0xa   : > { %1396 = vmatprep.mubr.msk.bf16.mxu0 (!%p187_p3), %vm1639_vm0, %v1638_v1  ;;  %1416 = vmatprep.mubr.msk.bf16.mxu1 (!%p187_p3), %vm1639_vm0, %v1638_v1  ;;  %v1586_v17 = vld [vmem:[%s2016_s2 + $0x18] sm:$0xff] (!%p187_p3)   ;;  %v1590_v27 = vld [vmem:[%s2016_s2 + $0x20] sm:$0xff] (!%p187_p3)   ;;  %v1592_v30 = vld [vmem:[%s2016_s2 + $0x28] sm:$0xff] (!%p187_p3)  }
   0xb   : > { %v1587_v19 = vld [vmem:[%s2016_s2 + $0x78] sm:$0xff] (!%p187_p3)   ;;  %v1591_v28 = vld [vmem:[%s2016_s2 + $0x80] sm:$0xff] (!%p187_p3)   ;;  %v1595_v31 = vld [vmem:[%s2016_s2 + $0x88] sm:$0xff] (!%p187_p3)  }
   0xc   : > { %1387 = vmatpush3.bf16.msra.mxu0 (!%p187_p3), %v1569_v2  ;;  %1535 = vmatpush3.bf16.msra.mxu1 (!%p187_p3), %v1569_v2 }
   0xd   : > { %1388 = vmatprep.subr.bf16.mxu0 (!%p187_p3), %v1638_v1  ;;  %1530 = vmatprep.subr.bf16.mxu1 (!%p187_p3), %v1638_v1 }
   0xe   : > { %s2024_s15 = smov (!%p221_p4, %s1628_s15), 1 }
   0xf   : > { %s1540_s25 = smul.u32 80, %s2024_s15 }
  0x10   : > { %1389 = vmatpush3.bf16.msra.mxu0 %v1570_v3  ;;  %1536 = vmatpush3.bf16.msra.mxu1 %v1570_v3  ;;  %s1541_s20 = smul.u32 72, %s2024_s15 }
  0x11   : > { %s1708_s28 = scalar_lea.vmem %s2015_s1, %s1540_s25  ;;  %1390 = vmatprep.subr.bf16.mxu0 %v1638_v1  ;;  %1531 = vmatprep.subr.bf16.mxu1 %v1638_v1  ;;  %s1738_s19 = scalar_lea.vmem %s2014_s0, %s1540_s25 }
  0x12   : > { %v1574_v7 = vld [vmem:[%s1708_s28] sm:$0xff]   ;;  %v1575_v8 = vld [vmem:[%s1708_s28 + $0x28] sm:$0xff]   ;;  %v1579_v14 = vld [vmem:[%s1708_s28 + $0x30] sm:$0xff]   ;;  %s1939_s23 = scalar_lea.vmem %s2018_s4, %s1541_s20 }
  0x13   : > { %v1578_v13 = vld [vmem:[%s1708_s28 + $0x8] sm:$0xff]   ;;  %v1774_v18 = vld [vmem:[%s1738_s19 + $0x44] sm:$0xf]  ;;  %v1583_v23 = vld [vmem:[%s1708_s28 + $0x10] sm:$0xff]  }
  0x14   : > { %1391 = vmatpush3.bf16.msra.mxu0 %v1571_v4  ;;  %1537 = vmatpush3.bf16.msra.mxu1 %v1571_v4  ;;  %v279_v20 = vld [vmem:[%s1738_s19 + $0x48] sm:$0xf]  ;;  %v1613_v22 = vld [vmem:[%s1738_s19 + $0x4c] ss:$0 sps:$4 sm:$0x33]   ;;  %v1584_v24 = vld [vmem:[%s1708_s28 + $0x38] sm:$0xff]  }
  0x15   : > { %1392 = vmatprep.subr.bf16.mxu0 %v1638_v1  ;;  %1532 = vmatprep.subr.bf16.mxu1 %v1638_v1  ;;  %v1283_v21 = vcombine.low %v1774_v18, %v279_v20  ;;  %v780_v26 = vrot.slane %v1613_v22, 2  ;;  %v1588_v32 = vld [vmem:[%s1708_s28 + $0x18] sm:$0xff]   ;;  %v1589_v33 = vld [vmem:[%s1708_s28 + $0x40] sm:$0xff]   ;;  %v244_v34 = vld [vmem:[%s1738_s19 + $0x8] sm:$0xf] }
  0x16   : > { %v245_v35 = vld [vmem:[%s1738_s19 + $0xc] sm:$0xf]  ;;  %v246_v36 = vld [vmem:[%s1738_s19 + $0x10] sm:$0xf]  ;;  %v278_v37 = vld [vmem:[%s1738_s19 + $0x4] sm:$0xc] }
  0x17   : > { %v1786_v25 = vrot.slane %v1283_v21, 2  ;;  %v1593_v38 = vld [vmem:[%s1708_s28 + $0x20] sm:$0xff]   ;;  %v1275_v40 = vcombine.low %v278_v37, %v244_v34  ;;  %v1276_v41 = vcombine.low %v245_v35, %v246_v36  ;;  %v247_v44 = vld [vmem:[%s1738_s19 + $0x14] sm:$0xf]  ;;  %v248_v45 = vld [vmem:[%s1738_s19 + $0x18] sm:$0xf]  ;;  %v1240_v46 = vcombine.low %v244_v34, %v245_v35 }
  0x18   : > { %1393 = vmatpush3.bf16.msra.mxu0 %v1572_v5  ;;  %1538 = vmatpush3.bf16.msra.mxu1 %v1572_v5  ;;  %v1594_v39 = vld [vmem:[%s1738_s19] sm:$0xff]   ;;  %v1277_v48 = vcombine.low %v247_v44, %v248_v45  ;;  %v249_v50 = vld [vmem:[%s1738_s19 + $0x1c] sm:$0xf]  ;;  %v1241_v52 = vcombine.low %v246_v36, %v247_v44  ;;  %v252_v57 = vld [vmem:[%s1738_s19 + $0x28] sm:$0xf] }
  0x19   : > { %1394 = vmatprep.subr.bf16.mxu0 %v1638_v1  ;;  %1533 = vmatprep.subr.bf16.mxu1 %v1638_v1  ;;  %v1798_v29 = vsel %vm762_vm2, %v1786_v25, %v780_v26  ;;  %v763_v42 = vrot.slane %v1275_v40, 2  ;;  %v764_v43 = vrot.slane %v1276_v41, 2  ;;  %v250_v51 = vld [vmem:[%s1738_s19 + $0x20] sm:$0xf]  ;;  %v251_v56 = vld [vmem:[%s1738_s19 + $0x24] sm:$0xf]  ;;  %v1242_v58 = vcombine.low %v248_v45, %v249_v50 }
  0x1a   : > { %v766_v49 = vrot.slane %v1277_v48, 2  ;;  %v1278_v54 = vcombine.low %v249_v50, %v250_v51  ;;  %v1279_v60 = vcombine.low %v251_v56, %v252_v57  ;;  %v253_v62 = vld [vmem:[%s1738_s19 + $0x2c] sm:$0xf]  ;;  %v254_v63 = vld [vmem:[%s1738_s19 + $0x30] sm:$0xf]  ;;  %v1243_v0 = vcombine.low %v250_v51, %v251_v56 }
  0x1b   : > { %v765_v47 = vsel %vm762_vm2, %v763_v42, %v764_v43  ;;  %v1280_v3 = vcombine.low %v253_v62, %v254_v63  ;;  %v255_v5 = vld [vmem:[%s1738_s19 + $0x34] sm:$0xf] }
  0x1c   : > { %1395 = vmatpush3.bf16.msra.mxu0 %v1573_v6  ;;  %1539 = vmatpush3.bf16.msra.mxu1 %v1573_v6  ;;  %v767_v53 = vsel %vm762_vm2, %v764_v43, %v766_v49  ;;  %v768_v55 = vrot.slane %v1278_v54, 2  ;;  %v770_v61 = vrot.slane %v1279_v60, 2  ;;  %v256_v6 = vld [vmem:[%s1738_s19 + $0x38] sm:$0xf] }
  0x1d   : > { %1480 = vmatprep.subr.bf16.mxu0 %v1638_v1  ;;  %1432 = vmatprep.subr.bf16.mxu1 %v1638_v1  ;;  %v772_v4 = vrot.slane %v1280_v3, 2 }
  0x1e   : > { %v769_v59 = vsel %vm762_vm2, %v766_v49, %v768_v55  ;;  %v771_v2 = vsel %vm762_vm2, %v768_v55, %v770_v61 }
  0x1f   : > { %1397 = vmatmul.mubr.msk.bf16.vlgmr.msra.gmra.mrb[0].mxu0 %vm387_vm1, %v1574_v7  ;;  %1417 = vmatmul.mubr.msk.bf16.vlgmr.msra.gmra.mrb[0].mxu1 %vm387_vm1, %v1575_v8  ;;  %v1244_v7 = vcombine.low %v252_v57, %v253_v62  ;;  %v773_v8 = vsel %vm762_vm2, %v770_v61, %v772_v4 }
  0x20   : > { %1481 = vmatpush3.bf16.msra.mxu0 %v1576_v9  ;;  %1400 = vmatprep.mubr.msk.bf16.mxu0 %vm1639_vm0, %v1638_v1  ;;  %v1281_v9 = vcombine.low %v255_v5, %v256_v6 }
  0x21   : > { %1420 = vmatprep.mubr.msk.bf16.mxu1 %vm1639_vm0, %v1638_v1  ;;  %1433 = vmatpush3.bf16.msra.mxu1 %v1577_v10 }
  0x22   : > { %1482 = vmatprep.subr.bf16.mxu0 %v1638_v1  ;;  %1434 = vmatprep.subr.bf16.mxu1 %v1638_v1  ;;  %v774_v10 = vrot.slane %v1281_v9, 2 }
  0x24   : > { %1483 = vmatpush3.bf16.msra.mxu0 %v1580_v11  ;;  %v257_v11 = vld [vmem:[%s1738_s19 + $0x3c] sm:$0xf] }
  0x25   : > { %1435 = vmatpush3.bf16.msra.mxu1 %v1581_v12  ;;  %1484 = vmatprep.subr.bf16.mxu0 %v1638_v1  ;;  %v258_v12 = vld [vmem:[%s1738_s19 + $0x40] sm:$0xf] }
  0x26   : > { %1436 = vmatprep.subr.bf16.mxu1 %v1638_v1  ;;  %v1247_v20 = vcombine.low %v258_v12, %v1774_v18 }
  0x27   : > { %1401 = vmatmul.mubr.msk.bf16.gmra.mrb[4].mxu0 %vm387_vm1, %v1578_v13  ;;  %1421 = vmatmul.mubr.msk.bf16.gmra.mrb[4].mxu1 %vm387_vm1, %v1579_v14  ;;  %v1245_v13 = vcombine.low %v254_v63, %v255_v5  ;;  %v775_v14 = vsel %vm762_vm2, %v772_v4, %v774_v10 }
  0x28   : > { %1404 = vmatprep.mubr.msk.bf16.mxu0 %vm1639_vm0, %v1638_v1  ;;  %1424 = vmatprep.mubr.msk.bf16.mxu1 %vm1639_vm0, %v1638_v1 }
  0x29   : > { %1485 = vmatpush3.bf16.msra.mxu0 %v1582_v15  ;;  %1437 = vmatpush3.bf16.msra.mxu1 %v1585_v16  ;;  %v1282_v15 = vcombine.low %v257_v11, %v258_v12 }
  0x2a   : > { %1438 = vmatprep.subr.bf16.mxu1 %v1638_v1  ;;  %1486 = vmatprep.subr.bf16.mxu0 %v1638_v1 }
  0x2b   : > { %v776_v16 = vrot.slane %v1282_v15, 2 }
  0x2d   : > { %1439 = vmatpush3.bf16.msra.mxu1 %v1586_v17  ;;  %1487 = vmatpush3.bf16.msra.mxu0 %v1587_v19  ;;  %v1246_v17 = vcombine.low %v256_v6, %v257_v11  ;;  %v777_v19 = vsel %vm762_vm2, %v774_v10, %v776_v16  ;;  %v779_v21 = vsel %vm762_vm2, %v776_v16, %v1786_v25 }
  0x2e   : > { %1440 = vmatprep.subr.bf16.mxu1 %v1638_v1  ;;  %1488 = vmatprep.subr.bf16.mxu0 %v1638_v1 }
  0x2f   : > { %1405 = vmatmul.mubr.msk.bf16.gmra.mrb[8].mxu0 %vm387_vm1, %v1583_v23  ;;  %1425 = vmatmul.mubr.msk.bf16.gmra.mrb[8].mxu1 %vm387_vm1, %v1584_v24 }
  0x30   : > { %1408 = vmatprep.mubr.msk.bf16.mxu0 %vm1639_vm0, %v1638_v1  ;;  %1428 = vmatprep.mubr.msk.bf16.mxu1 %vm1639_vm0, %v1638_v1 }
  0x31   : > { %1441 = vmatpush3.bf16.msra.mxu1 %v1590_v27  ;;  %1489 = vmatpush3.bf16.msra.mxu0 %v1591_v28 }
  0x32   : > { %1442 = vmatprep.subr.bf16.mxu1 %v1638_v1  ;;  %1490 = vmatprep.subr.bf16.mxu0 %v1638_v1 }
  0x35   : > { %1443 = vmatpush3.bf16.msra.mxu1 %v1592_v30  ;;  %1491 = vmatpush3.bf16.msra.mxu0 %v1595_v31 }
  0x37   : > { %1409 = vmatmul.mubr.msk.bf16.gmra.mrb[12].mxu0 %vm387_vm1, %v1588_v32  ;;  %1429 = vmatmul.mubr.msk.bf16.gmra.mrb[12].mxu1 %vm387_vm1, %v1589_v33 }
  0x38   : > { %1412 = vmatprep.mubr.msk.bf16.mxu0 %vm1639_vm0, %v1638_v1  ;;  %1444 = vmatprep.mubr.msk.bf16.mxu1 %vm1639_vm0, %v1638_v1 }
  0x3f   : > { %1413 = vmatmul.mubr.msk.bf16.gmra.mrb[16].mxu0 %vm387_vm1, %v1593_v38  ;;  %1445 = vmatmul.mubr.msk.bf16.vlgmr.msra.gmra.mrb[16].mxu1 %vm387_vm1, %v1594_v39 }
  0x40   : > { %1448 = vmatprep.mubr.msk.bf16.mxu1 %vm1639_vm0, %v1638_v1  ;;  %1492 = vmatprep.mubr.msk.bf16.mxu0 %vm1639_vm0, %v1638_v1 }
  0x47   : > { %1449 = vmatmul.mubr.msk.bf16.gmra.mrb[20].mxu1 %vm387_vm1, %v1240_v46  ;;  %1493 = vmatmul.mubr.msk.bf16.vlgmr.msra.gmra.mrb[20].mxu0 %vm387_vm1, %v765_v47 }
  0x48   : > { %1452 = vmatprep.mubr.msk.bf16.mxu1 %vm1639_vm0, %v1638_v1  ;;  %1496 = vmatprep.mubr.msk.bf16.mxu0 %vm1639_vm0, %v1638_v1 }
  0x4f   : > { %1453 = vmatmul.mubr.msk.bf16.gmra.mrb[24].mxu1 %vm387_vm1, %v1241_v52  ;;  %1497 = vmatmul.mubr.msk.bf16.gmra.mrb[24].mxu0 %vm387_vm1, %v767_v53 }
  0x50   : > { %1456 = vmatprep.mubr.msk.bf16.mxu1 %vm1639_vm0, %v1638_v1  ;;  %1500 = vmatprep.mubr.msk.bf16.mxu0 %vm1639_vm0, %v1638_v1 }
  0x57   : > { %1457 = vmatmul.mubr.msk.bf16.gmra.mrb[28].mxu1 %vm387_vm1, %v1242_v58  ;;  %1501 = vmatmul.mubr.msk.bf16.gmra.mrb[28].mxu0 %vm387_vm1, %v769_v59 }
  0x58   : > { %1460 = vmatprep.mubr.msk.bf16.mxu1 %vm1639_vm0, %v1638_v1  ;;  %1504 = vmatprep.mubr.msk.bf16.mxu0 %vm1639_vm0, %v1638_v1 }
  0x5f   : > { %1461 = vmatmul.mubr.msk.bf16.gmra.mrb[32].mxu1 %vm387_vm1, %v1243_v0  ;;  %1505 = vmatmul.mubr.msk.bf16.gmra.mrb[32].mxu0 %vm387_vm1, %v771_v2  ;;  %v1931_v0 = vld [vmem:[%s2017_s3] ss:$0 sm:$0xff] }
  0x60   : > { %1464 = vmatprep.mubr.msk.bf16.mxu1 %vm1639_vm0, %v1638_v1  ;;  %1508 = vmatprep.mubr.msk.bf16.mxu0 %vm1639_vm0, %v1638_v1 }
  0x67   : > { %1465 = vmatmul.mubr.msk.bf16.gmra.mrb[36].mxu1 %vm387_vm1, %v1244_v7  ;;  %1509 = vmatmul.mubr.msk.bf16.gmra.mrb[36].mxu0 %vm387_vm1, %v773_v8 }
  0x68   : > { %1468 = vmatprep.mubr.msk.bf16.mxu1 %vm1639_vm0, %v1638_v1  ;;  %1512 = vmatprep.mubr.msk.bf16.mxu0 %vm1639_vm0, %v1638_v1 }
  0x6f   : > { %1469 = vmatmul.mubr.msk.bf16.gmra.mrb[40].mxu1 %vm387_vm1, %v1245_v13  ;;  %1513 = vmatmul.mubr.msk.bf16.gmra.mrb[40].mxu0 %vm387_vm1, %v775_v14 }
  0x70   : > { %1472 = vmatprep.mubr.msk.bf16.mxu1 %vm1639_vm0, %v1638_v1  ;;  %1516 = vmatprep.mubr.msk.bf16.mxu0 %vm1639_vm0, %v1638_v1 }
  0x77   : > { %1473 = vmatmul.mubr.msk.bf16.gmra.mrb[44].mxu1 %vm387_vm1, %v1246_v17  ;;  %1517 = vmatmul.mubr.msk.bf16.gmra.mrb[44].mxu0 %vm387_vm1, %v777_v19 }
  0x78   : > { %1476 = vmatprep.mubr.msk.bf16.mxu1 %vm1639_vm0, %v1638_v1  ;;  %1520 = vmatprep.mubr.msk.bf16.mxu0 %vm1639_vm0, %v1638_v1 }
  0x7f   : > { %1477 = vmatmul.mubr.msk.bf16.gmra.mrb[48].mxu1 %vm387_vm1, %v1247_v20  ;;  %1521 = vmatmul.mubr.msk.bf16.gmra.mrb[48].mxu0 %vm387_vm1, %v779_v21 }
  0x80   : > { %1524 = vmatprep.mubr.msk.bf16.mxu0 %vm1639_vm0, %v1638_v1 }
  0x87   : > { %1525 = vmatmul.mubr.msk.bf16.gmra.mrb[52].mxu0 %vm387_vm1, %v1798_v29 }
  0xf2   : > { %v449_v22 = vpop.f32.mrb[0].mxu0  ;;  %v1904_v23 = vpop.f32.mrb[0].mxu1 }
  0xf3   : > { %v1398_v24 = vpop.f32.mrb[1].mxu0  ;;  %v1418_v26 = vpop.f32.mrb[1].mxu1 }
  0xf4   : > { %v452_v27 = vpop.f32.mrb[2].mxu0  ;;  %v1906_v18 = vpop.f32.mrb[2].mxu1 }
  0xf5   : > { %v1399_v28 = vpop.f32.mrb[3].mxu0  ;;  %v1419_v25 = vpop.f32.mrb[3].mxu1 }
  0xfa   : > { %v457_v30 = vpop.f32.mrb[4].mxu0  ;;  %v1908_v31 = vpop.f32.mrb[4].mxu1 }
  0xfb   : > { %v1402_v32 = vpop.f32.mrb[5].mxu0  ;;  %v1422_v33 = vpop.f32.mrb[5].mxu1 }
  0xfc   : > { %v460_v34 = vpop.f32.mrb[6].mxu0  ;;  %v1910_v1 = vpop.f32.mrb[6].mxu1 }
  0xfd   : > { %v1403_v35 = vpop.f32.mrb[7].mxu0  ;;  %v1423_v29 = vpop.f32.mrb[7].mxu1 }
 0x102   : > { %v465_v36 = vpop.f32.mrb[8].mxu0  ;;  %v1912_v37 = vpop.f32.mrb[8].mxu1 }
 0x103   : > { %v1406_v38 = vpop.f32.mrb[9].mxu0  ;;  %v1426_v39 = vpop.f32.mrb[9].mxu1 }
 0x104   : > { %v468_v40 = vpop.f32.mrb[10].mxu0  ;;  %v1914_v41 = vpop.f32.mrb[10].mxu1 }
 0x105   : > { %v1407_v42 = vpop.f32.mrb[11].mxu0  ;;  %v1427_v43 = vpop.f32.mrb[11].mxu1 }
 0x10a   : > { %v1916_v44 = vpop.f32.mrb[12].mxu0  ;;  %v1918_v45 = vpop.f32.mrb[12].mxu1 }
 0x10b   : > { %v1410_v46 = vpop.f32.mrb[13].mxu0  ;;  %v1430_v47 = vpop.f32.mrb[13].mxu1 }
 0x10c   : > { %v1920_v48 = vpop.f32.mrb[14].mxu0  ;;  %v1922_v49 = vpop.f32.mrb[14].mxu1 }
 0x10d   : > { %v1411_v50 = vpop.f32.mrb[15].mxu0  ;;  %v1431_v51 = vpop.f32.mrb[15].mxu1 }
 0x112   : > { %v1924_v52 = vpop.f32.mrb[16].mxu0  ;;  %v662_v53 = vpop.f32.mrb[16].mxu1 }
 0x113   : > { %v663_v54 = vadd.f32 %v662_v53, %v449_v22  ;;  %v1414_v55 = vpop.f32.mrb[17].mxu0  ;;  %v1446_v56 = vpop.f32.mrb[17].mxu1 }
 0x114   : > { %v1926_v57 = vpop.f32.mrb[18].mxu0  ;;  %v665_v58 = vpop.f32.mrb[18].mxu1 }
 0x115   : > { %v666_v59 = vadd.f32 %v665_v58, %v452_v27  ;;  %v1415_v60 = vpop.f32.mrb[19].mxu0  ;;  %v1447_v61 = vpop.f32.mrb[19].mxu1 }
 0x11a   : > { %v670_v62 = vpop.f32.mrb[20].mxu1  ;;  %v879_v63 = vpop.f32.mrb[20].mxu0 }
 0x11b   : > { %v671_v2 = vadd.f32 %v670_v62, %v457_v30  ;;  %v950_v3 = vadd.f32 %v879_v63, %v663_v54  ;;  %v1450_v4 = vpop.f32.mrb[21].mxu1  ;;  %v1494_v5 = vpop.f32.mrb[21].mxu0 }
 0x11c   : > { %v673_v6 = vpop.f32.mrb[22].mxu1  ;;  %v882_v7 = vpop.f32.mrb[22].mxu0 }
 0x11d   : > { %v975_v8 = vadd.f32 %v1931_v0, %v950_v3  ;;  %v674_v9 = vadd.f32 %v673_v6, %v460_v34  ;;  %v951_v10 = vadd.f32 %v882_v7, %v666_v59  ;;  %v1495_v11 = vpop.f32.mrb[23].mxu0  ;;  %v1451_v12 = vpop.f32.mrb[23].mxu1 }
 0x11f   : > { %v993_v13 = vmax.f32 %v975_v8, 0.0  ;;  %v976_v14 = vadd.f32 %v1931_v0, %v951_v10 }
 0x121   : > { %v1321_v15 = vpack.c.bf16 %v993_v13, %v993_v13  ;;  %v994_v16 = vmax.f32 %v976_v14, 0.0 }
 0x122   : > { %v678_v17 = vpop.f32.mrb[24].mxu1  ;;  %v887_v19 = vpop.f32.mrb[24].mxu0 }
 0x123   : > { %1084 = vst.msk [vmem:[%s1939_s23] sm:$0xf] %vm1083_vm3, %v1321_v15  ;;  %v1322_v20 = vpack.c.bf16 %v994_v16, %v994_v16  ;;  %v679_v21 = vadd.f32 %v678_v17, %v465_v36  ;;  %v952_v22 = vadd.f32 %v887_v19, %v671_v2  ;;  %v1454_v24 = vpop.f32.mrb[25].mxu1  ;;  %v1498_v26 = vpop.f32.mrb[25].mxu0 }
 0x124   : > { %v681_v27 = vpop.f32.mrb[26].mxu1  ;;  %v890_v28 = vpop.f32.mrb[26].mxu0 }
 0x125   : > { %1085 = vst.msk [vmem:[%s1939_s23 + $0x4] sm:$0xf] %vm1083_vm3, %v1322_v20  ;;  %v977_v25 = vadd.f32 %v1931_v0, %v952_v22  ;;  %v682_v30 = vadd.f32 %v681_v27, %v468_v40  ;;  %v953_v32 = vadd.f32 %v890_v28, %v674_v9  ;;  %v1499_v33 = vpop.f32.mrb[27].mxu0  ;;  %v1455_v34 = vpop.f32.mrb[27].mxu1 }
 0x127   : > { %v995_v35 = vmax.f32 %v977_v25, 0.0  ;;  %v978_v29 = vadd.f32 %v1931_v0, %v953_v32 }
 0x129   : > { %v1323_v38 = vpack.c.bf16 %v995_v35, %v995_v35  ;;  %v996_v36 = vmax.f32 %v978_v29, 0.0 }
 0x12a   : > { %v686_v39 = vpop.f32.mrb[28].mxu1  ;;  %v895_v42 = vpop.f32.mrb[28].mxu0 }
 0x12b   : > { %1086 = vst.msk [vmem:[%s1939_s23 + $0x8] sm:$0xf] %vm1083_vm3, %v1323_v38  ;;  %v1324_v43 = vpack.c.bf16 %v996_v36, %v996_v36  ;;  %v687_v46 = vadd.f32 %v686_v39, %v1916_v44  ;;  %v954_v47 = vadd.f32 %v895_v42, %v679_v21  ;;  %v1458_v50 = vpop.f32.mrb[29].mxu1  ;;  %v1502_v40 = vpop.f32.mrb[29].mxu0 }
 0x12c   : > { %v689_v51 = vpop.f32.mrb[30].mxu1  ;;  %v898_v53 = vpop.f32.mrb[30].mxu0 }
 0x12d   : > { %1087 = vst.msk [vmem:[%s1939_s23 + $0xc] sm:$0xf] %vm1083_vm3, %v1324_v43  ;;  %v979_v54 = vadd.f32 %v1931_v0, %v954_v47  ;;  %v690_v55 = vadd.f32 %v689_v51, %v1920_v48  ;;  %v955_v56 = vadd.f32 %v898_v53, %v682_v30  ;;  %v1503_v58 = vpop.f32.mrb[31].mxu0  ;;  %v1459_v59 = vpop.f32.mrb[31].mxu1 }
 0x12f   : > { %v997_v60 = vmax.f32 %v979_v54, 0.0  ;;  %v980_v61 = vadd.f32 %v1931_v0, %v955_v56 }
 0x131   : > { %v1325_v44 = vpack.c.bf16 %v997_v60, %v997_v60  ;;  %v998_v62 = vmax.f32 %v980_v61, 0.0 }
 0x132   : > { %v694_v63 = vpop.f32.mrb[32].mxu1  ;;  %v903_v2 = vpop.f32.mrb[32].mxu0 }
 0x133   : > { %1088 = vst.msk [vmem:[%s1939_s23 + $0x10] sm:$0xf] %vm1083_vm3, %v1325_v44  ;;  %v1326_v3 = vpack.c.bf16 %v998_v62, %v998_v62  ;;  %v695_v4 = vadd.f32 %v694_v63, %v1924_v52  ;;  %v956_v5 = vadd.f32 %v903_v2, %v687_v46  ;;  %v1462_v6 = vpop.f32.mrb[33].mxu1  ;;  %v1506_v48 = vpop.f32.mrb[33].mxu0 }
 0x134   : > { %v697_v7 = vpop.f32.mrb[34].mxu1  ;;  %v906_v8 = vpop.f32.mrb[34].mxu0 }
 0x135   : > { %1089 = vst.msk [vmem:[%s1939_s23 + $0x14] sm:$0xf] %vm1083_vm3, %v1326_v3  ;;  %v981_v9 = vadd.f32 %v1931_v0, %v956_v5  ;;  %v698_v10 = vadd.f32 %v697_v7, %v1926_v57  ;;  %v957_v11 = vadd.f32 %v906_v8, %v690_v55  ;;  %v1507_v12 = vpop.f32.mrb[35].mxu0  ;;  %v1463_v13 = vpop.f32.mrb[35].mxu1 }
 0x137   : > { %v999_v14 = vmax.f32 %v981_v9, 0.0  ;;  %v982_v15 = vadd.f32 %v1931_v0, %v957_v11 }
 0x139   : > { %v1327_v52 = vpack.c.bf16 %v999_v14, %v999_v14  ;;  %v1000_v16 = vmax.f32 %v982_v15, 0.0 }
 0x13a   : > { %v702_v17 = vpop.f32.mrb[36].mxu1  ;;  %v911_v19 = vpop.f32.mrb[36].mxu0 }
 0x13b   : > { %1090 = vst.msk [vmem:[%s1939_s23 + $0x18] sm:$0xf] %vm1083_vm3, %v1327_v52  ;;  %v1328_v20 = vpack.c.bf16 %v1000_v16, %v1000_v16  ;;  %v703_v21 = vadd.f32 %v702_v17, %v1904_v23  ;;  %v958_v22 = vadd.f32 %v911_v19, %v695_v4  ;;  %v1466_v24 = vpop.f32.mrb[37].mxu1  ;;  %v1510_v57 = vpop.f32.mrb[37].mxu0 }
 0x13c   : > { %v705_v26 = vpop.f32.mrb[38].mxu1  ;;  %v914_v27 = vpop.f32.mrb[38].mxu0 }
 0x13d   : > { %1091 = vst.msk [vmem:[%s1939_s23 + $0x1c] sm:$0xf] %vm1083_vm3, %v1328_v20  ;;  %v983_v28 = vadd.f32 %v1931_v0, %v958_v22  ;;  %v706_v25 = vadd.f32 %v705_v26, %v1906_v18  ;;  %v959_v30 = vadd.f32 %v914_v27, %v698_v10  ;;  %v1511_v32 = vpop.f32.mrb[39].mxu0  ;;  %v1467_v33 = vpop.f32.mrb[39].mxu1 }
 0x13f   : > { %v1001_v34 = vmax.f32 %v983_v28, 0.0  ;;  %v984_v35 = vadd.f32 %v1931_v0, %v959_v30 }
 0x141   : > { %v1329_v23 = vpack.c.bf16 %v1001_v34, %v1001_v34  ;;  %v1002_v29 = vmax.f32 %v984_v35, 0.0 }
 0x142   : > { %v710_v38 = vpop.f32.mrb[40].mxu1  ;;  %v919_v36 = vpop.f32.mrb[40].mxu0 }
 0x143   : > { %1092 = vst.msk [vmem:[%s1939_s23 + $0x20] sm:$0xf] %vm1083_vm3, %v1329_v23  ;;  %v1330_v39 = vpack.c.bf16 %v1002_v29, %v1002_v29  ;;  %v711_v42 = vadd.f32 %v710_v38, %v1908_v31  ;;  %v960_v43 = vadd.f32 %v919_v36, %v703_v21  ;;  %v1470_v46 = vpop.f32.mrb[41].mxu1  ;;  %v1514_v18 = vpop.f32.mrb[41].mxu0 }
 0x144   : > { %v713_v47 = vpop.f32.mrb[42].mxu1  ;;  %v922_v50 = vpop.f32.mrb[42].mxu0 }
 0x145   : > { %1093 = vst.msk [vmem:[%s1939_s23 + $0x24] sm:$0xf] %vm1083_vm3, %v1330_v39  ;;  %v985_v40 = vadd.f32 %v1931_v0, %v960_v43  ;;  %v714_v51 = vadd.f32 %v713_v47, %v1910_v1  ;;  %v961_v53 = vadd.f32 %v922_v50, %v706_v25  ;;  %v1515_v54 = vpop.f32.mrb[43].mxu0  ;;  %v1471_v55 = vpop.f32.mrb[43].mxu1 }
 0x147   : > { %v1003_v56 = vmax.f32 %v985_v40, 0.0  ;;  %v986_v58 = vadd.f32 %v1931_v0, %v961_v53 }
 0x149   : > { %v1331_v31 = vpack.c.bf16 %v1003_v56, %v1003_v56  ;;  %v1004_v59 = vmax.f32 %v986_v58, 0.0 }
 0x14a   : > { %v718_v60 = vpop.f32.mrb[44].mxu1  ;;  %v927_v61 = vpop.f32.mrb[44].mxu0 }
 0x14b   : > { %1094 = vst.msk [vmem:[%s1939_s23 + $0x28] sm:$0xf] %vm1083_vm3, %v1331_v31  ;;  %v1332_v44 = vpack.c.bf16 %v1004_v59, %v1004_v59  ;;  %v719_v62 = vadd.f32 %v718_v60, %v1912_v37  ;;  %v962_v63 = vadd.f32 %v927_v61, %v711_v42  ;;  %v1474_v2 = vpop.f32.mrb[45].mxu1  ;;  %v1518_v1 = vpop.f32.mrb[45].mxu0 }
 0x14c   : > { %v721_v3 = vpop.f32.mrb[46].mxu1  ;;  %v930_v4 = vpop.f32.mrb[46].mxu0 }
 0x14d   : > { %1095 = vst.msk [vmem:[%s1939_s23 + $0x2c] sm:$0xf] %vm1083_vm3, %v1332_v44  ;;  %v987_v5 = vadd.f32 %v1931_v0, %v962_v63  ;;  %v722_v6 = vadd.f32 %v721_v3, %v1914_v41  ;;  %v963_v48 = vadd.f32 %v930_v4, %v714_v51  ;;  %v1519_v7 = vpop.f32.mrb[47].mxu0  ;;  %v1475_v8 = vpop.f32.mrb[47].mxu1 }
 0x14f   : > { %v1005_v9 = vmax.f32 %v987_v5, 0.0  ;;  %v988_v10 = vadd.f32 %v1931_v0, %v963_v48 }
 0x151   : > { %v1333_v37 = vpack.c.bf16 %v1005_v9, %v1005_v9  ;;  %v1006_v11 = vmax.f32 %v988_v10, 0.0 }
 0x152   : > { %v726_v12 = vpop.f32.mrb[48].mxu1  ;;  %v935_v13 = vpop.f32.mrb[48].mxu0 }
 0x153   : > { %1096 = vst.msk [vmem:[%s1939_s23 + $0x30] sm:$0xf] %vm1083_vm3, %v1333_v37  ;;  %v1334_v14 = vpack.c.bf16 %v1006_v11, %v1006_v11  ;;  %v727_v15 = vadd.f32 %v726_v12, %v1918_v45  ;;  %v964_v52 = vadd.f32 %v935_v13, %v719_v62  ;;  %v1478_v16 = vpop.f32.mrb[49].mxu1  ;;  %v1522_v41 = vpop.f32.mrb[49].mxu0 }
 0x154   : > { %v729_v17 = vpop.f32.mrb[50].mxu1  ;;  %v938_v19 = vpop.f32.mrb[50].mxu0 }
 0x155   : > { %1097 = vst.msk [vmem:[%s1939_s23 + $0x34] sm:$0xf] %vm1083_vm3, %v1334_v14  ;;  %v989_v20 = vadd.f32 %v1931_v0, %v964_v52  ;;  %v730_v21 = vadd.f32 %v729_v17, %v1922_v49  ;;  %v965_v22 = vadd.f32 %v938_v19, %v722_v6  ;;  %v1523_v24 = vpop.f32.mrb[51].mxu0  ;;  %v1479_v57 = vpop.f32.mrb[51].mxu1 }
 0x157   : > { %v1007_v26 = vmax.f32 %v989_v20, 0.0  ;;  %v990_v27 = vadd.f32 %v1931_v0, %v965_v22 }
 0x159   : > { %v1335_v45 = vpack.c.bf16 %v1007_v26, %v1007_v26  ;;  %v1008_v28 = vmax.f32 %v990_v27, 0.0 }
 0x15a   : > { %v943_v25 = vpop.f32.mrb[52].mxu0 }
 0x15b   : > { %1098 = vst.msk [vmem:[%s1939_s23 + $0x38] sm:$0xf] %vm1083_vm3, %v1335_v45  ;;  %v1336_v30 = vpack.c.bf16 %v1008_v28, %v1008_v28  ;;  %v966_v32 = vadd.f32 %v943_v25, %v727_v15  ;;  %v1526_v33 = vpop.f32.mrb[53].mxu0 }
 0x15c   : > { %v946_v34 = vpop.f32.mrb[54].mxu0 }
 0x15d   : > { %1099 = vst.msk [vmem:[%s1939_s23 + $0x3c] sm:$0xf] %vm1083_vm3, %v1336_v30  ;;  %v991_v49 = vadd.f32 %v1931_v0, %v966_v32  ;;  %v967_v35 = vadd.f32 %v946_v34, %v730_v21  ;;  %v1527_v23 = vpop.f32.mrb[55].mxu0 }
 0x15f   : > { %v1009_v29 = vmax.f32 %v991_v49, 0.0  ;;  %v992_v38 = vadd.f32 %v1931_v0, %v967_v35 }
 0x161   : > { %v1337_v36 = vpack.c.bf16 %v1009_v29, %v1009_v29  ;;  %v1010_v39 = vmax.f32 %v992_v38, 0.0 }
 0x163   : > { %1100 = vst.msk [vmem:[%s1939_s23 + $0x40] sm:$0xf] %vm1083_vm3, %v1337_v36  ;;  %v1338_v42 = vpack.c.bf16 %v1010_v39, %v1010_v39 }
 0x165   : > { %1101 = vst.msk [vmem:[%s1939_s23 + $0x44] sm:$0xf] %vm1083_vm3, %v1338_v42 }
 0x166 PF: > { %s14_s17 = sadd.s32 1, %s1636_s17   ;;  %s2019_s15 = smov %s1632_s16 }
 0x167   : > { %p11_p5 = scmp.ge.s32.totalorder %s14_s17, 4   ;;  %s2020_s16 = smov %s2022_s18 }
 0x169   :  { %13 = sbr.rel (!%p11_p5) target bundleno = 2 (0x2), region = 71 }

// kernel: actor_net_forward.8
= control target key start
LH: loop header
LB: loop body
LE: loop exit
PB: predicated region body
PF: predicated region fallthrough
CT: control target
= control target key end

     0   :  { %s1076_s15 = smov 0   ;;  %s1078_s16 = smov 0   ;;  %s1241_s0 = inlined_call_operand.vmem [shape: bf16[2,42,96], index: 0, kind: input, shape index: {}]   ;;  %s1242_s1 = inlined_call_operand.vmem [shape: bf16[2,42,96], index: 1, kind: input, shape index: {}]   ;;  %s1243_s2 = inlined_call_operand.vmem [shape: bf16[3,96,32], index: 2, kind: input, shape index: {}]   ;;  %s1244_s3 = inlined_call_operand.vmem [shape: f32[1,32], index: 3, kind: input, shape index: {}]   ;;  %s1245_s4 = inlined_call_operand.vmem [shape: bf16[2,36,32], index: 4, kind: output, shape index: {}]  }
   0x1   :  { %s1080_s17 = smov 0  }
   0x2 LB: > { %s26_s18 = sadd.s32 1, %s1043_s16  ;;  %p784_p0 = scmp.ge.s32.totalorder %s1047_s17, 1  ;;  %s1047_s17 = sphi %s1080_s17, %s14_s17   ;;  %s1043_s16 = sphi %s1078_s16, %s1247_s16   ;;  %s1039_s15 = sphi %s1076_s15, %s1246_s15  }
   0x3   : > { %p28_p1 = scmp.ge.s32.totalorder %s26_s18, 2  ;;  %p186_p2 = scmp.lt.s32.totalorder %s1047_s17, 3 }
   0x5   : > { %s1249_s18 = smov (%p28_p1, %s26_s18), 0  ;;  %p187_p3 = pnand %p784_p0, %p186_p2 }
   0x6   : > { %v999_v0 = vld [vmem:[%s1243_s2 + $0x30] sm:$0xff] (!%p187_p3)   ;;  %v1049_v1 = vmov (!%p187_p3), 0.0   ;;  %v1000_v2 = vld [vmem:[%s1243_s2] sm:$0xff] (!%p187_p3)   ;;  %v1001_v3 = vld [vmem:[%s1243_s2 + $0x38] sm:$0xff] (!%p187_p3)   ;;  %vm1050_vm0 = vmmov (!%p187_p3), 0   ;;  %p221_p4 = scmp.lt.s32.totalorder (!%p187_p3), %s1039_s15, 1 }
   0x7   : > { %190 = sbr.rel (%p187_p3) target bundleno = 285 (0x11d), region = 36  ;;  %887 = vmatprep.subr.bf16.mxu0 (!%p187_p3), %v1049_v1  ;;  %911 = vmatprep.subr.bf16.mxu1 (!%p187_p3), %v1049_v1  ;;  %v1002_v4 = vld [vmem:[%s1243_s2 + $0x8] sm:$0xff] (!%p187_p3)   ;;  %v1003_v5 = vld [vmem:[%s1243_s2 + $0x40] sm:$0xff] (!%p187_p3)   ;;  %v1004_v6 = vld [vmem:[%s1243_s2 + $0x10] sm:$0xff] (!%p187_p3)   ;;  %vm329_vm1 = vcmask (!%p187_p3), 785408   ;;  %vm530_vm2 = vcmask (!%p187_p3), 1044480  }
   0x8   : > { %888 = vmatpush3.bf16.msra.mxu0 (!%p187_p3), %v999_v0  ;;  %899 = vmatprep.mubr.msk.bf16.mxu0 (!%p187_p3), %vm1050_vm0, %v1049_v1  ;;  %v1005_v7 = vld [vmem:[%s1243_s2 + $0x48] sm:$0xff] (!%p187_p3)   ;;  %v1006_v8 = vld [vmem:[%s1243_s2 + $0x18] sm:$0xff] (!%p187_p3)   ;;  %v1007_v9 = vld [vmem:[%s1243_s2 + $0x50] sm:$0xff] (!%p187_p3)   ;;  %vm680_vm3 = vcmask (!%p187_p3), 257024   ;;  %vm685_vm4 = vcmask (!%p187_p3), 254976  }
   0x9   : > { %912 = vmatpush3.bf16.msra.mxu1 (!%p187_p3), %v1000_v2  ;;  %889 = vmatprep.subr.bf16.mxu0 (!%p187_p3), %v1049_v1  ;;  %v1008_v10 = vld [vmem:[%s1243_s2 + $0x20] sm:$0xff] (!%p187_p3)   ;;  %v1009_v11 = vld [vmem:[%s1243_s2 + $0x58] sm:$0xff] (!%p187_p3)   ;;  %v1010_v12 = vld [vmem:[%s1243_s2 + $0x28] sm:$0xff] (!%p187_p3)  }
   0xa   : > { %913 = vmatprep.subr.bf16.mxu1 (!%p187_p3), %v1049_v1  ;;  %923 = vmatprep.mubr.msk.bf16.mxu1 (!%p187_p3), %vm1050_vm0, %v1049_v1  ;;  %v1014_v16 = vld [vmem:[%s1243_s2 + $0x60] sm:$0xff] (!%p187_p3)   ;;  %v1015_v18 = vld [vmem:[%s1243_s2 + $0x68] sm:$0xff] (!%p187_p3)   ;;  %v1018_v21 = vld [vmem:[%s1243_s2 + $0x70] sm:$0xff] (!%p187_p3)  }
   0xb   : > { %v1019_v22 = vld [vmem:[%s1243_s2 + $0x78] sm:$0xff] (!%p187_p3)   ;;  %v1022_v27 = vld [vmem:[%s1243_s2 + $0x80] sm:$0xff] (!%p187_p3)   ;;  %v1023_v31 = vld [vmem:[%s1243_s2 + $0x88] sm:$0xff] (!%p187_p3)  }
   0xc   : > { %890 = vmatpush3.bf16.msra.mxu0 (!%p187_p3), %v1001_v3 }
   0xd   : > { %914 = vmatpush3.bf16.msra.mxu1 (!%p187_p3), %v1002_v4  ;;  %891 = vmatprep.subr.bf16.mxu0 (!%p187_p3), %v1049_v1 }
   0xe   : > { %s1251_s15 = smov (!%p221_p4, %s1039_s15), 1  ;;  %915 = vmatprep.subr.bf16.mxu1 %v1049_v1 }
   0xf   : > { %s971_s5 = smul.u32 24, %s1251_s15 }
  0x10   : > { %892 = vmatpush3.bf16.msra.mxu0 %v1003_v5  ;;  %s972_s20 = smul.u32 20, %s1251_s15 }
  0x11   : > { %916 = vmatpush3.bf16.msra.mxu1 %v1004_v6  ;;  %893 = vmatprep.subr.bf16.mxu0 %v1049_v1  ;;  %s1135_s12 = scalar_lea.vmem %s1242_s1, %s971_s5  ;;  %s1148_s23 = scalar_lea.vmem %s1241_s0, %s971_s5 }
  0x12   : > { %917 = vmatprep.subr.bf16.mxu1 %v1049_v1  ;;  %v242_v13 = vld [vmem:[%s1148_s23] sm:$0xf]  ;;  %v243_v14 = vld [vmem:[%s1148_s23 + $0x4] sm:$0xf]  ;;  %v1016_v19 = vld [vmem:[%s1135_s12 + $0x8] sm:$0xff]  }
  0x13   : > { %v1011_v15 = vld [vmem:[%s1135_s12] sm:$0xff]   ;;  %v812_v17 = vcombine.low %v242_v13, %v243_v14  ;;  %v1017_v20 = vld [vmem:[%s1148_s23 + $0x8] sm:$0xff]   ;;  %v1020_v24 = vld [vmem:[%s1135_s12 + $0x10] ss:$0 sps:$4 sm:$0x33]  }
  0x14   : > { %894 = vmatpush3.bf16.msra.mxu0 %v1005_v7  ;;  %v252_v23 = vld [vmem:[%s1148_s23] sm:$0x8]  ;;  %v1021_v26 = vld [vmem:[%s1148_s23 + $0x10] ss:$0 sps:$4 sm:$0x33]   ;;  %v532_v30 = vrot.slane %v1017_v20, 3 }
  0x15   : > { %918 = vmatpush3.bf16.msra.mxu1 %v1006_v8  ;;  %895 = vmatprep.subr.bf16.mxu0 %v1049_v1  ;;  %v836_v25 = vcombine.low %v252_v23, %v243_v14  ;;  %v1024_v28 = vld [vmem:[%s1148_s23 + $0x10] sm:$0x1f]   ;;  %s239_s23 = scalar_lea.vmem %s1245_s4, %s972_s20 }
  0x16   : > { %919 = vmatprep.subr.bf16.mxu1 %v1049_v1  ;;  %v534_v32 = vrot.slane %v1024_v28, 3 }
  0x17   : > { %v531_v29 = vrot.slane %v836_v25, 3 }
  0x18   : > { %896 = vmatpush3.bf16.msra.mxu0 %v1007_v9  ;;  %v535_v34 = vsel %vm530_vm2, %v532_v30, %v534_v32 }
  0x19   : > { %920 = vmatpush3.bf16.msra.mxu1 %v1008_v10  ;;  %897 = vmatprep.subr.bf16.mxu0 %v1049_v1  ;;  %v533_v33 = vsel %vm530_vm2, %v531_v29, %v532_v30 }
  0x1a   : > { %921 = vmatprep.subr.bf16.mxu1 %v1049_v1 }
  0x1c   : > { %898 = vmatpush3.bf16.msra.mxu0 %v1009_v11 }
  0x1d   : > { %922 = vmatpush3.bf16.msra.mxu1 %v1010_v12  ;;  %935 = vmatprep.subr.bf16.mxu0 %v1049_v1 }
  0x1e   : > { %959 = vmatprep.subr.bf16.mxu1 %v1049_v1 }
  0x1f   : > { %900 = vmatmul.mubr.msk.bf16.vlgmr.msra.gmra.mrb[0].mxu0 %vm329_vm1, %v1011_v15 }
  0x20   : > { %924 = vmatmul.mubr.msk.bf16.vlgmr.msra.gmra.mrb[0].mxu1 %vm329_vm1, %v812_v17  ;;  %936 = vmatpush3.bf16.msra.mxu0 %v1014_v16 }
  0x21   : > { %965 = vmatpush3.bf16.msra.mxu1 %v1014_v16  ;;  %937 = vmatprep.subr.bf16.mxu0 %v1049_v1 }
  0x22   : > { %960 = vmatprep.subr.bf16.mxu1 %v1049_v1  ;;  %903 = vmatprep.mubr.msk.bf16.mxu0 %vm1050_vm0, %v1049_v1 }
  0x23   : > { %927 = vmatprep.mubr.msk.bf16.mxu1 %vm1050_vm0, %v1049_v1 }
  0x24   : > { %938 = vmatpush3.bf16.msra.mxu0 %v1015_v18 }
  0x25   : > { %966 = vmatpush3.bf16.msra.mxu1 %v1015_v18  ;;  %939 = vmatprep.subr.bf16.mxu0 %v1049_v1 }
  0x26   : > { %961 = vmatprep.subr.bf16.mxu1 %v1049_v1 }
  0x27   : > { %904 = vmatmul.mubr.msk.bf16.gmra.mrb[4].mxu0 %vm329_vm1, %v1016_v19 }
  0x28   : > { %928 = vmatmul.mubr.msk.bf16.gmra.mrb[4].mxu1 %vm329_vm1, %v1017_v20  ;;  %940 = vmatpush3.bf16.msra.mxu0 %v1018_v21 }
  0x29   : > { %967 = vmatpush3.bf16.msra.mxu1 %v1018_v21  ;;  %941 = vmatprep.subr.bf16.mxu0 %v1049_v1 }
  0x2a   : > { %962 = vmatprep.subr.bf16.mxu1 %v1049_v1  ;;  %907 = vmatprep.mubr.msk.bf16.mxu0 %vm1050_vm0, %v1049_v1 }
  0x2b   : > { %931 = vmatprep.mubr.msk.bf16.mxu1 %vm1050_vm0, %v1049_v1 }
  0x2c   : > { %942 = vmatpush3.bf16.msra.mxu0 %v1019_v22 }
  0x2d   : > { %968 = vmatpush3.bf16.msra.mxu1 %v1019_v22  ;;  %943 = vmatprep.subr.bf16.mxu0 %v1049_v1 }
  0x2e   : > { %963 = vmatprep.subr.bf16.mxu1 %v1049_v1 }
  0x2f   : > { %908 = vmatmul.mubr.msk.bf16.gmra.mrb[8].mxu0 %vm329_vm1, %v1020_v24 }
  0x30   : > { %932 = vmatmul.mubr.msk.bf16.gmra.mrb[8].mxu1 %vm329_vm1, %v1021_v26  ;;  %944 = vmatpush3.bf16.msra.mxu0 %v1022_v27 }
  0x31   : > { %969 = vmatpush3.bf16.msra.mxu1 %v1022_v27  ;;  %945 = vmatprep.subr.bf16.mxu0 %v1049_v1 }
  0x32   : > { %964 = vmatprep.subr.bf16.mxu1 %v1049_v1  ;;  %947 = vmatprep.mubr.msk.bf16.mxu0 %vm1050_vm0, %v1049_v1 }
  0x33   : > { %951 = vmatprep.mubr.msk.bf16.mxu1 %vm1050_vm0, %v1049_v1 }
  0x34   : > { %946 = vmatpush3.bf16.msra.mxu0 %v1023_v31 }
  0x35   : > { %970 = vmatpush3.bf16.msra.mxu1 %v1023_v31 }
  0x37   : > { %948 = vmatmul.mubr.msk.bf16.vlgmr.msra.gmra.mrb[12].mxu0 %vm329_vm1, %v533_v33 }
  0x38   : > { %952 = vmatmul.mubr.msk.bf16.vlgmr.msra.gmra.mrb[12].mxu1 %vm329_vm1, %v535_v34 }
  0x39   : > { %955 = vmatprep.mubr.msk.bf16.mxu1 %vm1050_vm0, %v1049_v1  ;;  %v847_v1 = vld [vmem:[%s1244_s3] ss:$0 sm:$0xff] }
  0x40   : > { %956 = vmatmul.mubr.msk.bf16.gmra.mrb[16].mxu1 %vm329_vm1, %v534_v32 }
  0xf2   : > { %v373_v35 = vpop.f32.mrb[0].mxu0 }
  0xf3   : > { %v487_v36 = vpop.f32.mrb[0].mxu1  ;;  %v901_v37 = vpop.f32.mrb[1].mxu0 }
  0xf4   : > { %v488_v38 = vadd.f32 %v487_v36, %v373_v35  ;;  %v925_v39 = vpop.f32.mrb[1].mxu1  ;;  %v376_v40 = vpop.f32.mrb[2].mxu0 }
  0xf5   : > { %v490_v41 = vpop.f32.mrb[2].mxu1  ;;  %v902_v42 = vpop.f32.mrb[3].mxu0 }
  0xf6   : > { %v491_v43 = vadd.f32 %v490_v41, %v376_v40  ;;  %v926_v44 = vpop.f32.mrb[3].mxu1 }
  0xfa   : > { %v381_v45 = vpop.f32.mrb[4].mxu0 }
  0xfb   : > { %v495_v46 = vpop.f32.mrb[4].mxu1  ;;  %v905_v47 = vpop.f32.mrb[5].mxu0 }
  0xfc   : > { %v496_v48 = vadd.f32 %v495_v46, %v381_v45  ;;  %v929_v49 = vpop.f32.mrb[5].mxu1  ;;  %v384_v50 = vpop.f32.mrb[6].mxu0 }
  0xfd   : > { %v498_v51 = vpop.f32.mrb[6].mxu1  ;;  %v906_v52 = vpop.f32.mrb[7].mxu0 }
  0xfe   : > { %v499_v53 = vadd.f32 %v498_v51, %v384_v50  ;;  %v930_v54 = vpop.f32.mrb[7].mxu1 }
 0x102   : > { %v389_v55 = vpop.f32.mrb[8].mxu0 }
 0x103   : > { %v503_v56 = vpop.f32.mrb[8].mxu1  ;;  %v909_v57 = vpop.f32.mrb[9].mxu0 }
 0x104   : > { %v504_v58 = vadd.f32 %v503_v56, %v389_v55  ;;  %v933_v59 = vpop.f32.mrb[9].mxu1  ;;  %v392_v60 = vpop.f32.mrb[10].mxu0 }
 0x105   : > { %v506_v61 = vpop.f32.mrb[10].mxu1  ;;  %v910_v62 = vpop.f32.mrb[11].mxu0 }
 0x106   : > { %v934_v63 = vpop.f32.mrb[11].mxu1 }
 0x10a   : > { %v615_v0 = vpop.f32.mrb[12].mxu0 }
 0x10b   : > { %v637_v2 = vadd.f32 %v615_v0, %v488_v38  ;;  %v623_v3 = vpop.f32.mrb[12].mxu1  ;;  %v949_v4 = vpop.f32.mrb[13].mxu0 }
 0x10c   : > { %v639_v5 = vadd.f32 %v623_v3, %v496_v48  ;;  %v953_v6 = vpop.f32.mrb[13].mxu1  ;;  %v618_v7 = vpop.f32.mrb[14].mxu0 }
 0x10d   : > { %v649_v8 = vadd.f32 %v847_v1, %v637_v2  ;;  %v638_v9 = vadd.f32 %v618_v7, %v491_v43  ;;  %v626_v10 = vpop.f32.mrb[14].mxu1  ;;  %v950_v11 = vpop.f32.mrb[15].mxu0 }
 0x10e   : > { %v651_v12 = vadd.f32 %v847_v1, %v639_v5  ;;  %v640_v13 = vadd.f32 %v626_v10, %v499_v53  ;;  %v954_v14 = vpop.f32.mrb[15].mxu1 }
 0x10f   : > { %v654_v15 = vmax.f32 %v649_v8, 0.0  ;;  %v650_v16 = vadd.f32 %v847_v1, %v638_v9 }
 0x110   : > { %v656_v17 = vmax.f32 %v651_v12, 0.0  ;;  %v652_v18 = vadd.f32 %v847_v1, %v640_v13 }
 0x111   : > { %v855_v19 = vpack.c.bf16 %v654_v15, %v654_v15  ;;  %v655_v20 = vmax.f32 %v650_v16, 0.0 }
 0x112   : > { %v857_v21 = vpack.c.bf16 %v656_v17, %v656_v17  ;;  %v657_v22 = vmax.f32 %v652_v18, 0.0 }
 0x113   : > { %681 = vst.msk [vmem:[%s239_s23] sm:$0xf] %vm680_vm3, %v855_v19  ;;  %v856_v23 = vpack.c.bf16 %v655_v20, %v655_v20  ;;  %v631_v24 = vpop.f32.mrb[16].mxu1 }
 0x114   : > { %683 = vst.msk [vmem:[%s239_s23 + $0x8] sm:$0xf] %vm680_vm3, %v857_v21  ;;  %v858_v25 = vpack.c.bf16 %v657_v22, %v657_v22  ;;  %v641_v26 = vadd.f32 %v631_v24, %v504_v58  ;;  %v957_v27 = vpop.f32.mrb[17].mxu1 }
 0x115   : > { %682 = vst.msk [vmem:[%s239_s23 + $0x4] sm:$0xf] %vm680_vm3, %v856_v23  ;;  %v634_v28 = vpop.f32.mrb[18].mxu1 }
 0x116   : > { %684 = vst.msk [vmem:[%s239_s23 + $0xc] sm:$0xf] %vm680_vm3, %v858_v25  ;;  %v653_v29 = vadd.f32 %v847_v1, %v641_v26  ;;  %v958_v30 = vpop.f32.mrb[19].mxu1 }
 0x118   : > { %v658_v31 = vmax.f32 %v653_v29, 0.0 }
 0x11a   : > { %v859_v32 = vpack.c.bf16 %v658_v31, %v658_v31 }
 0x11c   : > { %686 = vst.msk [vmem:[%s239_s23 + $0x10] sm:$0x3] %vm685_vm4, %v859_v32 }
 0x11d PF: > { %s14_s17 = sadd.s32 1, %s1047_s17   ;;  %s1246_s15 = smov %s1043_s16 }
 0x11e   : > { %p11_p5 = scmp.ge.s32.totalorder %s14_s17, 4   ;;  %s1247_s16 = smov %s1249_s18 }
 0x120   :  { %13 = sbr.rel (!%p11_p5) target bundleno = 2 (0x2), region = 71 }

// kernel: actor_net_forward.9
= control target key start
LH: loop header
LB: loop body
LE: loop exit
PB: predicated region body
PF: predicated region fallthrough
CT: control target
= control target key end

     0   :  { %v170_v36 = vlaneseq  ;;  %v1847_v37 = vmov 1966171168   ;;  %s2411_s0 = inlined_call_operand.vmem [shape: bf16[2,1152], index: 0, kind: input, shape index: {}]   ;;  %s2412_s1 = inlined_call_operand.vmem [shape: bf16[1152,256], index: 1, kind: input, shape index: {}]   ;;  %s2413_s2 = inlined_call_operand.vmem [shape: f32[1,256], index: 2, kind: input, shape index: {}]   ;;  %s2414_s3 = inlined_call_operand.vmem [shape: bf16[256,8], index: 3, kind: input, shape index: {}]   ;;  %s2415_s4 = inlined_call_operand.vmem [shape: f32[1,8], index: 4, kind: input, shape index: {}]   ;;  %s2416_s5 = inlined_call_operand.hbm [shape: f32[2,8], index: 5, kind: output, shape index: {}]  }
   0x1   :  { %v1586_v0 = vld [vmem:[%s2412_s1 + $0x4] ss:$8 sps:$4 sm:$0xff]   ;;  %v1590_v2 = vld [vmem:[%s2412_s1] ss:$8 sps:$4 sm:$0xff]   ;;  %v1592_v4 = vld [vmem:[%s2412_s1 + $0x14] ss:$8 sps:$4 sm:$0xff]   ;;  %v184_v38 = vunpack.c.l.s4 %v1847_v37 }
   0x2   :  { %v1588_v1 = vld [vmem:[%s2412_s1 + $0x204] ss:$8 sps:$4 sm:$0xff]   ;;  %974 = vmatprep.subr.bf16.mxu1 %v1586_v0  ;;  %v1591_v3 = vld [vmem:[%s2412_s1 + $0x200] ss:$8 sps:$4 sm:$0xff]   ;;  %v1594_v5 = vld [vmem:[%s2412_s1 + $0x214] ss:$8 sps:$4 sm:$0xff]  }
   0x3   :  { %1056 = vmatprep.subr.bf16.mxu0 %v1588_v1  ;;  %975 = vmatpush1.bf16.msra.mxu1 %v1590_v2  ;;  %v1596_v6 = vld [vmem:[%s2412_s1 + $0x10] ss:$8 sps:$4 sm:$0xff]   ;;  %v1598_v8 = vld [vmem:[%s2412_s1 + $0x24] ss:$8 sps:$4 sm:$0xff]   ;;  %v1602_v10 = vld [vmem:[%s2412_s1 + $0x20] ss:$8 sps:$4 sm:$0xff]   ;;  %v185_v43 = vunpack.c.0.s8 %v184_v38 }
   0x4   :  { %1057 = vmatpush1.bf16.msra.mxu0 %v1591_v3  ;;  %976 = vmatprep.subr.bf16.mxu1 %v1592_v4  ;;  %v1597_v7 = vld [vmem:[%s2412_s1 + $0x210] ss:$8 sps:$4 sm:$0xff]   ;;  %v1600_v9 = vld [vmem:[%s2412_s1 + $0x224] ss:$8 sps:$4 sm:$0xff]   ;;  %v1603_v11 = vld [vmem:[%s2412_s1 + $0x220] ss:$8 sps:$4 sm:$0xff]  }
   0x5   :  { %1058 = vmatprep.subr.bf16.mxu0 %v1594_v5  ;;  %v1604_v12 = vld [vmem:[%s2412_s1 + $0x34] ss:$8 sps:$4 sm:$0xff]   ;;  %v1608_v14 = vld [vmem:[%s2412_s1 + $0x30] ss:$8 sps:$4 sm:$0xff]   ;;  %v1610_v16 = vld [vmem:[%s2412_s1 + $0x44] ss:$8 sps:$4 sm:$0xff]  }
   0x6   :  { %v1606_v13 = vld [vmem:[%s2412_s1 + $0x234] ss:$8 sps:$4 sm:$0xff]   ;;  %v1609_v15 = vld [vmem:[%s2412_s1 + $0x230] ss:$8 sps:$4 sm:$0xff]   ;;  %v1612_v17 = vld [vmem:[%s2412_s1 + $0x244] ss:$8 sps:$4 sm:$0xff]  }
   0x7   :  { %977 = vmatpush1.bf16.msra.mxu1 %v1596_v6  ;;  %v1614_v18 = vld [vmem:[%s2412_s1 + $0x40] ss:$8 sps:$4 sm:$0xff]   ;;  %v1616_v20 = vld [vmem:[%s2412_s1 + $0x54] ss:$8 sps:$4 sm:$0xff]   ;;  %v1620_v22 = vld [vmem:[%s2412_s1 + $0x50] ss:$8 sps:$4 sm:$0xff]  }
   0x8   :  { %1059 = vmatpush1.bf16.msra.mxu0 %v1597_v7  ;;  %978 = vmatprep.subr.bf16.mxu1 %v1598_v8  ;;  %v1615_v19 = vld [vmem:[%s2412_s1 + $0x240] ss:$8 sps:$4 sm:$0xff]   ;;  %v1618_v21 = vld [vmem:[%s2412_s1 + $0x254] ss:$8 sps:$4 sm:$0xff]   ;;  %v1621_v23 = vld [vmem:[%s2412_s1 + $0x250] ss:$8 sps:$4 sm:$0xff]  }
   0x9   :  { %1060 = vmatprep.subr.bf16.mxu0 %v1600_v9  ;;  %v1622_v24 = vld [vmem:[%s2412_s1 + $0x64] ss:$8 sps:$4 sm:$0xff]   ;;  %v1626_v26 = vld [vmem:[%s2412_s1 + $0x60] ss:$8 sps:$4 sm:$0xff]   ;;  %v1628_v28 = vld [vmem:[%s2412_s1 + $0x74] ss:$8 sps:$4 sm:$0xff]  }
   0xa   :  { %v1624_v25 = vld [vmem:[%s2412_s1 + $0x264] ss:$8 sps:$4 sm:$0xff]   ;;  %v1627_v27 = vld [vmem:[%s2412_s1 + $0x260] ss:$8 sps:$4 sm:$0xff]   ;;  %v1630_v29 = vld [vmem:[%s2412_s1 + $0x274] ss:$8 sps:$4 sm:$0xff]  }
   0xb   :  { %979 = vmatpush1.bf16.msra.mxu1 %v1602_v10  ;;  %v1632_v30 = vld [vmem:[%s2412_s1 + $0x70] ss:$8 sps:$4 sm:$0xff]   ;;  %v1634_v32 = vld [vmem:[%s2412_s1 + $0x84] ss:$8 sps:$4 sm:$0xff]   ;;  %v1638_v34 = vld [vmem:[%s2412_s1 + $0x80] ss:$8 sps:$4 sm:$0xff]  }
   0xc   :  { %1061 = vmatpush1.bf16.msra.mxu0 %v1603_v11  ;;  %980 = vmatprep.subr.bf16.mxu1 %v1604_v12  ;;  %v1633_v31 = vld [vmem:[%s2412_s1 + $0x270] ss:$8 sps:$4 sm:$0xff]   ;;  %v1636_v33 = vld [vmem:[%s2412_s1 + $0x284] ss:$8 sps:$4 sm:$0xff]   ;;  %v1639_v35 = vld [vmem:[%s2412_s1 + $0x280] ss:$8 sps:$4 sm:$0xff]  }
   0xd   :  { %1062 = vmatprep.subr.bf16.mxu0 %v1606_v13  ;;  %v1640_v39 = vld [vmem:[%s2412_s1 + $0x94] ss:$8 sps:$4 sm:$0xff]   ;;  %v1644_v41 = vld [vmem:[%s2412_s1 + $0x90] ss:$8 sps:$4 sm:$0xff]   ;;  %v1997_v42 = vshrl.u32 %v170_v36, 7  ;;  %v22_v52 = vld [vmem:[%s2411_s0] sm:$0xff] }
   0xe   :  { %v1642_v40 = vld [vmem:[%s2412_s1 + $0x294] ss:$8 sps:$4 sm:$0xff]   ;;  %v1645_v44 = vld [vmem:[%s2412_s1 + $0x290] ss:$8 sps:$4 sm:$0xff]   ;;  %v1646_v45 = vld [vmem:[%s2412_s1 + $0xa4] ss:$8 sps:$4 sm:$0xff]   ;;  %v182_v55 = vcombine.high %v22_v52, %v22_v52 }
   0xf   :  { %981 = vmatpush1.bf16.msra.mxu1 %v1608_v14  ;;  %v1648_v46 = vld [vmem:[%s2412_s1 + $0x2a4] ss:$8 sps:$4 sm:$0xff]   ;;  %v1650_v47 = vld [vmem:[%s2412_s1 + $0xa0] ss:$8 sps:$4 sm:$0xff]   ;;  %v2015_v49 = vsub.s32 %v185_v43, %v1997_v42  ;;  %v1652_v50 = vld [vmem:[%s2412_s1 + $0xb4] ss:$8 sps:$4 sm:$0xff]  }
  0x10   :  { %1063 = vmatpush1.bf16.msra.mxu0 %v1609_v15  ;;  %982 = vmatprep.subr.bf16.mxu1 %v1610_v16  ;;  %v1651_v48 = vld [vmem:[%s2412_s1 + $0x2a0] ss:$8 sps:$4 sm:$0xff]   ;;  %v1654_v51 = vld [vmem:[%s2412_s1 + $0x2b4] ss:$8 sps:$4 sm:$0xff]   ;;  %v1656_v53 = vld [vmem:[%s2412_s1 + $0xb0] ss:$8 sps:$4 sm:$0xff]  }
  0x11   :  { %1064 = vmatprep.subr.bf16.mxu0 %v1612_v17  ;;  %v189_v54 = vrot.slane %v22_v52, %v2015_v49  ;;  %v1657_v56 = vld [vmem:[%s2412_s1 + $0x2b0] ss:$8 sps:$4 sm:$0xff]   ;;  %v1658_v57 = vld [vmem:[%s2412_s1 + $0xc4] ss:$8 sps:$4 sm:$0xff]   ;;  %v196_v60 = vrot.slane %v182_v55, %v2015_v49  ;;  %v1662_v61 = vld [vmem:[%s2412_s1 + $0xc0] ss:$8 sps:$4 sm:$0xff]  }
  0x12   :  { %v1660_v58 = vld [vmem:[%s2412_s1 + $0x2c4] ss:$8 sps:$4 sm:$0xff]   ;;  %v1663_v0 = vld [vmem:[%s2412_s1 + $0x2c0] ss:$8 sps:$4 sm:$0xff]   ;;  %v1664_v1 = vld [vmem:[%s2412_s1 + $0xd4] ss:$8 sps:$4 sm:$0xff]  }
  0x13   :  { %983 = vmatpush1.bf16.msra.mxu1 %v1614_v18  ;;  %v197_v59 = vcombine.high %v189_v54, %v189_v54  ;;  %v198_v63 = vcombine.high %v196_v60, %v196_v60  ;;  %v1666_v2 = vld [vmem:[%s2412_s1 + $0x2d4] ss:$8 sps:$4 sm:$0xff]   ;;  %v1668_v4 = vld [vmem:[%s2412_s1 + $0xd0] ss:$8 sps:$4 sm:$0xff]   ;;  %v1670_v6 = vld [vmem:[%s2412_s1 + $0xe4] ss:$8 sps:$4 sm:$0xff]   ;;  %v2094_v17 = vrot.slane %v189_v54, %v2015_v49  ;;  %v2097_v18 = vrot.slane %v196_v60, %v2015_v49 }
  0x14   :  { %1065 = vmatpush1.bf16.msra.mxu0 %v1615_v19  ;;  %984 = vmatprep.subr.bf16.mxu1 %v1616_v20  ;;  %v1669_v5 = vld [vmem:[%s2412_s1 + $0x2d0] ss:$8 sps:$4 sm:$0xff]   ;;  %v1672_v7 = vld [vmem:[%s2412_s1 + $0x2e4] ss:$8 sps:$4 sm:$0xff]   ;;  %v1674_v8 = vld [vmem:[%s2412_s1 + $0xe0] ss:$8 sps:$4 sm:$0xff]  }
  0x15   :  { %1066 = vmatprep.subr.bf16.mxu0 %v1618_v21  ;;  %v219_v62 = vrot.slane %v197_v59, %v2015_v49  ;;  %v226_v3 = vrot.slane %v198_v63, %v2015_v49  ;;  %v1675_v9 = vld [vmem:[%s2412_s1 + $0x2e0] ss:$8 sps:$4 sm:$0xff]   ;;  %v1676_v10 = vld [vmem:[%s2412_s1 + $0xf4] ss:$8 sps:$4 sm:$0xff]   ;;  %v1680_v12 = vld [vmem:[%s2412_s1 + $0xf0] ss:$8 sps:$4 sm:$0xff]  }
  0x16   :  { %v1678_v11 = vld [vmem:[%s2412_s1 + $0x2f4] ss:$8 sps:$4 sm:$0xff]   ;;  %v1681_v13 = vld [vmem:[%s2412_s1 + $0x2f0] ss:$8 sps:$4 sm:$0xff]   ;;  %v1684_v14 = vld [vmem:[%s2412_s1 + $0x104] ss:$8 sps:$4 sm:$0xff]  }
  0x17   :  { %985 = vmatpush1.bf16.msra.mxu1 %v1620_v22  ;;  %1006 = vmatprep.mubr.bf16.mxu1 %v219_v62  ;;  %v1688_v15 = vld [vmem:[%s2412_s1 + $0x304] ss:$8 sps:$4 sm:$0xff]   ;;  %v1682_v16 = vld [vmem:[%s2412_s1 + $0x100] ss:$8 sps:$4 sm:$0xff]   ;;  %v1691_v20 = vld [vmem:[%s2412_s1 + $0x114] ss:$8 sps:$4 sm:$0xff]   ;;  %v229_v22 = vcombine.high %v219_v62, %v219_v62 }
  0x18   :  { %1067 = vmatpush1.bf16.msra.mxu0 %v1621_v23  ;;  %986 = vmatprep.subr.bf16.mxu1 %v1622_v24  ;;  %v1686_v19 = vld [vmem:[%s2412_s1 + $0x300] ss:$8 sps:$4 sm:$0xff]   ;;  %v1694_v21 = vld [vmem:[%s2412_s1 + $0x314] ss:$8 sps:$4 sm:$0xff]   ;;  %v230_v23 = vcombine.high %v226_v3, %v226_v3  ;;  %v1689_v24 = vld [vmem:[%s2412_s1 + $0x110] ss:$8 sps:$4 sm:$0xff]  }
  0x19   :  { %1068 = vmatprep.subr.bf16.mxu0 %v1624_v25  ;;  %1088 = vmatprep.mubr.bf16.mxu0 %v226_v3  ;;  %v1692_v25 = vld [vmem:[%s2412_s1 + $0x310] ss:$8 sps:$4 sm:$0xff]   ;;  %v1707_v36 = vld [vmem:[%s2412_s1 + $0x140] ss:$8 sps:$4 sm:$0xff]   ;;  %v1715_v38 = vld [vmem:[%s2412_s1 + $0x154] ss:$8 sps:$4 sm:$0xff]  }
  0x1a   :  { %v1710_v37 = vld [vmem:[%s2412_s1 + $0x340] ss:$8 sps:$4 sm:$0xff]   ;;  %v1721_v43 = vld [vmem:[%s2412_s1 + $0x164] ss:$8 sps:$4 sm:$0xff]   ;;  %v1740_v59 = vld [vmem:[%s2412_s1 + $0x390] ss:$8 sps:$4 sm:$0xff]  }
  0x1b   :  { %987 = vmatpush1.bf16.msra.mxu1 %v1626_v26  ;;  %v1697_v26 = vld [vmem:[%s2412_s1 + $0x124] ss:$8 sps:$4 sm:$0xff]   ;;  %v1731_v54 = vld [vmem:[%s2412_s1 + $0x180] ss:$8 sps:$4 sm:$0xff]   ;;  %v1752_v3 = vld [vmem:[%s2412_s1 + $0x3b0] ss:$8 sps:$4 sm:$0xff]  }
  0x1c   :  { %1069 = vmatpush1.bf16.msra.mxu0 %v1627_v27  ;;  %988 = vmatprep.subr.bf16.mxu1 %v1628_v28  ;;  %v1700_v27 = vld [vmem:[%s2412_s1 + $0x324] ss:$8 sps:$4 sm:$0xff]   ;;  %v1695_v28 = vld [vmem:[%s2412_s1 + $0x120] ss:$8 sps:$4 sm:$0xff]  }
  0x1d   :  { %1070 = vmatprep.subr.bf16.mxu0 %v1630_v29  ;;  %v1698_v29 = vld [vmem:[%s2412_s1 + $0x320] ss:$8 sps:$4 sm:$0xff]   ;;  %v1733_v52 = vld [vmem:[%s2412_s1 + $0x184] ss:$8 sps:$4 sm:$0xff]  }
  0x1e   :  { %v1734_v55 = vld [vmem:[%s2412_s1 + $0x380] ss:$8 sps:$4 sm:$0xff]   ;;  %v1745_v60 = vld [vmem:[%s2412_s1 + $0x1a4] ss:$8 sps:$4 sm:$0xff]  }
  0x1f   :  { %989 = vmatpush1.bf16.msra.mxu1 %v1632_v30  ;;  %v1703_v30 = vld [vmem:[%s2412_s1 + $0x134] ss:$8 sps:$4 sm:$0xff]   ;;  %v1743_v62 = vld [vmem:[%s2412_s1 + $0x1a0] ss:$8 sps:$4 sm:$0xff]  }
  0x20   :  { %1071 = vmatpush1.bf16.msra.mxu0 %v1633_v31  ;;  %990 = vmatprep.subr.bf16.mxu1 %v1634_v32  ;;  %v1706_v31 = vld [vmem:[%s2412_s1 + $0x334] ss:$8 sps:$4 sm:$0xff]   ;;  %v1701_v32 = vld [vmem:[%s2412_s1 + $0x130] ss:$8 sps:$4 sm:$0xff]   ;;  %v1746_v63 = vld [vmem:[%s2412_s1 + $0x3a0] ss:$8 sps:$4 sm:$0xff]  }
  0x21   :  { %1072 = vmatprep.subr.bf16.mxu0 %v1636_v33  ;;  %v1704_v33 = vld [vmem:[%s2412_s1 + $0x330] ss:$8 sps:$4 sm:$0xff]  }
  0x23   :  { %991 = vmatpush1.bf16.msra.mxu1 %v1638_v34  ;;  %v1709_v34 = vld [vmem:[%s2412_s1 + $0x144] ss:$8 sps:$4 sm:$0xff]  }
  0x24   :  { %1073 = vmatpush1.bf16.msra.mxu0 %v1639_v35  ;;  %992 = vmatprep.subr.bf16.mxu1 %v1640_v39  ;;  %v1712_v35 = vld [vmem:[%s2412_s1 + $0x344] ss:$8 sps:$4 sm:$0xff]   ;;  %v1718_v39 = vld [vmem:[%s2412_s1 + $0x354] ss:$8 sps:$4 sm:$0xff]  }
  0x25   :  { %1074 = vmatprep.subr.bf16.mxu0 %v1642_v40  ;;  %v1713_v40 = vld [vmem:[%s2412_s1 + $0x150] ss:$8 sps:$4 sm:$0xff]  }
  0x27   :  { %993 = vmatpush1.bf16.msra.mxu1 %v1644_v41  ;;  %v1716_v41 = vld [vmem:[%s2412_s1 + $0x350] ss:$8 sps:$4 sm:$0xff]  }
  0x28   :  { %1075 = vmatpush1.bf16.msra.mxu0 %v1645_v44  ;;  %994 = vmatprep.subr.bf16.mxu1 %v1646_v45  ;;  %v1724_v44 = vld [vmem:[%s2412_s1 + $0x364] ss:$8 sps:$4 sm:$0xff]   ;;  %v1719_v45 = vld [vmem:[%s2412_s1 + $0x160] ss:$8 sps:$4 sm:$0xff]  }
  0x29   :  { %1076 = vmatprep.subr.bf16.mxu0 %v1648_v46  ;;  %v1722_v46 = vld [vmem:[%s2412_s1 + $0x360] ss:$8 sps:$4 sm:$0xff]  }
  0x2b   :  { %995 = vmatpush1.bf16.msra.mxu1 %v1650_v47  ;;  %v1727_v47 = vld [vmem:[%s2412_s1 + $0x174] ss:$8 sps:$4 sm:$0xff]  }
  0x2c   :  { %1077 = vmatpush1.bf16.msra.mxu0 %v1651_v48  ;;  %996 = vmatprep.subr.bf16.mxu1 %v1652_v50  ;;  %v1730_v48 = vld [vmem:[%s2412_s1 + $0x374] ss:$8 sps:$4 sm:$0xff]   ;;  %v1725_v50 = vld [vmem:[%s2412_s1 + $0x170] ss:$8 sps:$4 sm:$0xff]  }
  0x2d   :  { %1078 = vmatprep.subr.bf16.mxu0 %v1654_v51  ;;  %v1728_v51 = vld [vmem:[%s2412_s1 + $0x370] ss:$8 sps:$4 sm:$0xff]  }
  0x2f   :  { %997 = vmatpush1.bf16.msra.mxu1 %v1656_v53  ;;  %v1736_v53 = vld [vmem:[%s2412_s1 + $0x384] ss:$8 sps:$4 sm:$0xff]  }
  0x30   :  { %1079 = vmatpush1.bf16.msra.mxu0 %v1657_v56  ;;  %998 = vmatprep.subr.bf16.mxu1 %v1658_v57  ;;  %v1739_v56 = vld [vmem:[%s2412_s1 + $0x194] ss:$8 sps:$4 sm:$0xff]  }
  0x31   :  { %1080 = vmatprep.subr.bf16.mxu0 %v1660_v58  ;;  %v1742_v57 = vld [vmem:[%s2412_s1 + $0x394] ss:$8 sps:$4 sm:$0xff]   ;;  %v1737_v58 = vld [vmem:[%s2412_s1 + $0x190] ss:$8 sps:$4 sm:$0xff]  }
  0x33   :  { %999 = vmatpush1.bf16.msra.mxu1 %v1662_v61  ;;  %v1748_v61 = vld [vmem:[%s2412_s1 + $0x3a4] ss:$8 sps:$4 sm:$0xff]  }
  0x34   :  { %1081 = vmatpush1.bf16.msra.mxu0 %v1663_v0  ;;  %1000 = vmatprep.subr.bf16.mxu1 %v1664_v1  ;;  %v1751_v0 = vld [vmem:[%s2412_s1 + $0x1b4] ss:$8 sps:$4 sm:$0xff]  }
  0x35   :  { %1082 = vmatprep.subr.bf16.mxu0 %v1666_v2  ;;  %v1754_v1 = vld [vmem:[%s2412_s1 + $0x3b4] ss:$8 sps:$4 sm:$0xff]   ;;  %v1749_v2 = vld [vmem:[%s2412_s1 + $0x1b0] ss:$8 sps:$4 sm:$0xff]  }
  0x37   :  { %1001 = vmatpush1.bf16.msra.mxu1 %v1668_v4 }
  0x38   :  { %1083 = vmatpush1.bf16.msra.mxu0 %v1669_v5  ;;  %1002 = vmatprep.subr.bf16.mxu1 %v1670_v6 }
  0x39   :  { %1084 = vmatprep.subr.bf16.mxu0 %v1672_v7 }
  0x3b   :  { %1003 = vmatpush1.bf16.msra.mxu1 %v1674_v8 }
  0x3c   :  { %1085 = vmatpush1.bf16.msra.mxu0 %v1675_v9  ;;  %1004 = vmatprep.subr.bf16.mxu1 %v1676_v10 }
  0x3d   :  { %1086 = vmatprep.subr.bf16.mxu0 %v1678_v11 }
  0x3f   :  { %1005 = vmatpush1.bf16.msra.mxu1 %v1680_v12 }
  0x40   :  { %1087 = vmatpush1.bf16.msra.mxu0 %v1681_v13  ;;  %1015 = vmatprep.subr.bf16.mxu1 %v1684_v14 }
  0x41   :  { %1097 = vmatprep.subr.bf16.mxu0 %v1688_v15 }
  0x42   :  { %1007 = vmatmul.mubr.bf16.vlgmr.msra.gmra.mrb[0].mxu1 %v2094_v17 }
  0x43   :  { %1089 = vmatmul.mubr.bf16.vlgmr.msra.gmra.mrb[0].mxu0 %v2097_v18  ;;  %1016 = vmatpush1.bf16.msra.mxu1 %v1682_v16 }
  0x44   :  { %1098 = vmatpush1.bf16.msra.mxu0 %v1686_v19  ;;  %1017 = vmatprep.subr.bf16.mxu1 %v1691_v20 }
  0x45   :  { %1099 = vmatprep.subr.bf16.mxu0 %v1694_v21  ;;  %1047 = vmatprep.mubr.bf16.mxu1 %v229_v22 }
  0x46   :  { %1129 = vmatprep.mubr.bf16.mxu0 %v230_v23 }
  0x47   :  { %1018 = vmatpush1.bf16.msra.mxu1 %v1689_v24 }
  0x48   :  { %1100 = vmatpush1.bf16.msra.mxu0 %v1692_v25  ;;  %1019 = vmatprep.subr.bf16.mxu1 %v1697_v26 }
  0x49   :  { %1101 = vmatprep.subr.bf16.mxu0 %v1700_v27 }
  0x4b   :  { %1020 = vmatpush1.bf16.msra.mxu1 %v1695_v28 }
  0x4c   :  { %1102 = vmatpush1.bf16.msra.mxu0 %v1698_v29  ;;  %1021 = vmatprep.subr.bf16.mxu1 %v1703_v30 }
  0x4d   :  { %1103 = vmatprep.subr.bf16.mxu0 %v1706_v31 }
  0x4f   :  { %1022 = vmatpush1.bf16.msra.mxu1 %v1701_v32 }
  0x50   :  { %1104 = vmatpush1.bf16.msra.mxu0 %v1704_v33  ;;  %1023 = vmatprep.subr.bf16.mxu1 %v1709_v34 }
  0x51   :  { %1105 = vmatprep.subr.bf16.mxu0 %v1712_v35 }
  0x53   :  { %1024 = vmatpush1.bf16.msra.mxu1 %v1707_v36 }
  0x54   :  { %1106 = vmatpush1.bf16.msra.mxu0 %v1710_v37  ;;  %1025 = vmatprep.subr.bf16.mxu1 %v1715_v38 }
  0x55   :  { %1107 = vmatprep.subr.bf16.mxu0 %v1718_v39 }
  0x57   :  { %1026 = vmatpush1.bf16.msra.mxu1 %v1713_v40 }
  0x58   :  { %1108 = vmatpush1.bf16.msra.mxu0 %v1716_v41  ;;  %1027 = vmatprep.subr.bf16.mxu1 %v1721_v43 }
  0x59   :  { %1109 = vmatprep.subr.bf16.mxu0 %v1724_v44 }
  0x5b   :  { %1028 = vmatpush1.bf16.msra.mxu1 %v1719_v45 }
  0x5c   :  { %1110 = vmatpush1.bf16.msra.mxu0 %v1722_v46  ;;  %1029 = vmatprep.subr.bf16.mxu1 %v1727_v47 }
  0x5d   :  { %1111 = vmatprep.subr.bf16.mxu0 %v1730_v48 }
  0x5f   :  { %1030 = vmatpush1.bf16.msra.mxu1 %v1725_v50 }
  0x60   :  { %1112 = vmatpush1.bf16.msra.mxu0 %v1728_v51  ;;  %1031 = vmatprep.subr.bf16.mxu1 %v1733_v52 }
  0x61   :  { %1113 = vmatprep.subr.bf16.mxu0 %v1736_v53 }
  0x63   :  { %1032 = vmatpush1.bf16.msra.mxu1 %v1731_v54 }
  0x64   :  { %1114 = vmatpush1.bf16.msra.mxu0 %v1734_v55  ;;  %1033 = vmatprep.subr.bf16.mxu1 %v1739_v56 }
  0x65   :  { %1115 = vmatprep.subr.bf16.mxu0 %v1742_v57 }
  0x67   :  { %1034 = vmatpush1.bf16.msra.mxu1 %v1737_v58 }
  0x68   :  { %1116 = vmatpush1.bf16.msra.mxu0 %v1740_v59  ;;  %1035 = vmatprep.subr.bf16.mxu1 %v1745_v60 }
  0x69   :  { %1117 = vmatprep.subr.bf16.mxu0 %v1748_v61 }
  0x6b   :  { %1036 = vmatpush1.bf16.msra.mxu1 %v1743_v62 }
  0x6c   :  { %1118 = vmatpush1.bf16.msra.mxu0 %v1746_v63 }
  0x6d   :  { %10 = vsyncpa [#allocation3], 0  ;;  %1037 = vmatprep.subr.bf16.mxu1 %v1751_v0  ;;  %1119 = vmatprep.subr.bf16.mxu0 %v1754_v1  ;;  %v1757_v4 = vld [vmem:[%s2412_s1 + $0x1c4] ss:$8 sps:$4 sm:$0xff]   ;;  %v1755_v6 = vld [vmem:[%s2412_s1 + $0x1c0] ss:$8 sps:$4 sm:$0xff]   ;;  %v227_v23 = vcombine.high %v2094_v17, %v2094_v17  ;;  %v228_v24 = vcombine.high %v2097_v18, %v2097_v18 }
  0x6e   :  { %v1760_v5 = vld [vmem:[%s2412_s1 + $0x3c4] ss:$8 sps:$4 sm:$0xff]   ;;  %v1758_v7 = vld [vmem:[%s2412_s1 + $0x3c0] ss:$8 sps:$4 sm:$0xff]   ;;  %v1763_v8 = vld [vmem:[%s2412_s1 + $0x1d4] ss:$8 sps:$4 sm:$0xff]  }
  0x6f   :  { %1038 = vmatpush1.bf16.msra.mxu1 %v1749_v2  ;;  %v1766_v9 = vld [vmem:[%s2412_s1 + $0x3d4] ss:$8 sps:$4 sm:$0xff]   ;;  %v1761_v10 = vld [vmem:[%s2412_s1 + $0x1d0] ss:$8 sps:$4 sm:$0xff]   ;;  %v1769_v12 = vld [vmem:[%s2412_s1 + $0x1e4] ss:$8 sps:$4 sm:$0xff]  }
  0x70   :  { %1120 = vmatpush1.bf16.msra.mxu0 %v1752_v3  ;;  %1039 = vmatprep.subr.bf16.mxu1 %v1757_v4  ;;  %v1764_v11 = vld [vmem:[%s2412_s1 + $0x3d0] ss:$8 sps:$4 sm:$0xff]   ;;  %v1772_v13 = vld [vmem:[%s2412_s1 + $0x3e4] ss:$8 sps:$4 sm:$0xff]   ;;  %v1767_v14 = vld [vmem:[%s2412_s1 + $0x1e0] ss:$8 sps:$4 sm:$0xff]  }
  0x71   :  { %1121 = vmatprep.subr.bf16.mxu0 %v1760_v5  ;;  %v1770_v15 = vld [vmem:[%s2412_s1 + $0x3e0] ss:$8 sps:$4 sm:$0xff]   ;;  %v1775_v16 = vld [vmem:[%s2412_s1 + $0x1f4] ss:$8 sps:$4 sm:$0xff]   ;;  %v1773_v20 = vld [vmem:[%s2412_s1 + $0x1f0] ss:$8 sps:$4 sm:$0xff]  }
  0x72   :  { %v1778_v19 = vld [vmem:[%s2412_s1 + $0x3f4] ss:$8 sps:$4 sm:$0xff]   ;;  %v1776_v21 = vld [vmem:[%s2412_s1 + $0x3f0] ss:$8 sps:$4 sm:$0xff]   ;;  %v1781_v22 = vld [vmem:[%s2412_s1 + $0x404] ss:$8 sps:$4 sm:$0xff]  }
  0x73   :  { %1040 = vmatpush1.bf16.msra.mxu1 %v1755_v6  ;;  %v1779_v25 = vld [vmem:[%s2412_s1 + $0x400] ss:$8 sps:$4 sm:$0xff]   ;;  %v1784_v26 = vld [vmem:[%s2412_s1 + $0x414] ss:$8 sps:$4 sm:$0xff]   ;;  %v1782_v17 = vld [vmem:[%s2412_s1 + $0x410] ss:$8 sps:$4 sm:$0xff]  }
  0x74   :  { %1122 = vmatpush1.bf16.msra.mxu0 %v1758_v7  ;;  %1041 = vmatprep.subr.bf16.mxu1 %v1763_v8  ;;  %v1848_v27 = vmov 0   ;;  %v1787_v18 = vld [vmem:[%s2412_s1 + $0x424] ss:$8 sps:$4 sm:$0xff]   ;;  %v1785_v28 = vld [vmem:[%s2412_s1 + $0x420] ss:$8 sps:$4 sm:$0xff]   ;;  %v1807_v45 = vld [vmem:[%s2414_s3 + $0x50] sm:$0xff]  }
  0x75   :  { %1123 = vmatprep.subr.bf16.mxu0 %v1766_v9  ;;  %v1790_v29 = vld [vmem:[%s2412_s1 + $0x434] ss:$8 sps:$4 sm:$0xff]   ;;  %v1788_v30 = vld [vmem:[%s2412_s1 + $0x430] ss:$8 sps:$4 sm:$0xff]   ;;  %v1793_v31 = vld [vmem:[%s2412_s1 + $0x444] ss:$8 sps:$4 sm:$0xff]  }
  0x76   :  { %v1791_v32 = vld [vmem:[%s2412_s1 + $0x440] ss:$8 sps:$4 sm:$0xff]   ;;  %v1796_v33 = vld [vmem:[%s2412_s1 + $0x454] ss:$8 sps:$4 sm:$0xff]   ;;  %v1794_v34 = vld [vmem:[%s2412_s1 + $0x450] ss:$8 sps:$4 sm:$0xff]  }
  0x77   :  { %1042 = vmatpush1.bf16.msra.mxu1 %v1761_v10  ;;  %v1799_v35 = vld [vmem:[%s2412_s1 + $0x464] ss:$8 sps:$4 sm:$0xff]   ;;  %v1797_v36 = vld [vmem:[%s2412_s1 + $0x460] ss:$8 sps:$4 sm:$0xff]   ;;  %v1802_v37 = vld [vmem:[%s2412_s1 + $0x474] ss:$8 sps:$4 sm:$0xff]  }
  0x78   :  { %1124 = vmatpush1.bf16.msra.mxu0 %v1764_v11  ;;  %1043 = vmatprep.subr.bf16.mxu1 %v1769_v12  ;;  %v1800_v38 = vld [vmem:[%s2412_s1 + $0x470] ss:$8 sps:$4 sm:$0xff]   ;;  %v1383_v39 = vld.sshfl [vmem:[%s2411_s0 + $0x8] sm:$0x1 pattern:$0x75316420] }
  0x79   :  { %1125 = vmatprep.subr.bf16.mxu0 %v1772_v13  ;;  %v244_v40 = vrot.slane %v1383_v39, %v2015_v49  ;;  %v1803_v41 = vld [vmem:[%s2414_s3 + $0x40] sm:$0xff]   ;;  %v1805_v44 = vld [vmem:[%s2414_s3 + $0x48] sm:$0xff]   ;;  %v1808_v46 = vld [vmem:[%s2414_s3 + $0x10] sm:$0xff]   ;;  %v172_v62 = vsub.s32 0, %v1997_v42  ;;  %v176_v0 = vsub.s32 1, %v1997_v42  ;;  %vm1356_vm0 = vcmask 58368  }
  0x7a   :  { %v1804_v43 = vld [vmem:[%s2414_s3] sm:$0xff]   ;;  %v1806_v49 = vld [vmem:[%s2414_s3 + $0x8] sm:$0xff]   ;;  %v1809_v47 = vld [vmem:[%s2414_s3 + $0x58] sm:$0xff]   ;;  %s1849_s1 = smov [#allocation2]  }
  0x7b   :  { %1044 = vmatpush1.bf16.msra.mxu1 %v1767_v14  ;;  %v1810_v48 = vld [vmem:[%s2414_s3 + $0x18] sm:$0xff]   ;;  %v1811_v50 = vld [vmem:[%s2414_s3 + $0x60] sm:$0xff]   ;;  %v1813_v52 = vld [vmem:[%s2414_s3 + $0x68] sm:$0xff]  }
  0x7c   :  { %1126 = vmatpush1.bf16.msra.mxu0 %v1770_v15  ;;  %1045 = vmatprep.subr.bf16.mxu1 %v1775_v16  ;;  %v1812_v51 = vld [vmem:[%s2414_s3 + $0x20] sm:$0xff]   ;;  %v1814_v53 = vld [vmem:[%s2414_s3 + $0x28] sm:$0xff]   ;;  %v1815_v54 = vld [vmem:[%s2414_s3 + $0x70] sm:$0xff]  }
  0x7d   :  { %1127 = vmatprep.subr.bf16.mxu0 %v1778_v19  ;;  %v1816_v55 = vld [vmem:[%s2414_s3 + $0x30] sm:$0xff]   ;;  %v1817_v56 = vld [vmem:[%s2414_s3 + $0x78] sm:$0xff]   ;;  %v168_v63 = vld [vmem:[%s2413_s2] sm:$0x3] }
  0x7e   :  { %v1818_v57 = vld [vmem:[%s2414_s3 + $0x38] sm:$0xff]   ;;  %v173_v1 = vrot.slane %v168_v63, %v172_v62  ;;  %v177_v2 = vrot.slane %v168_v63, %v176_v0  ;;  %v1528_v42 = vld [vmem:[%s2415_s4] ss:$0 sm:$0xff]  ;;  %s1375_s4 = sshll.u32 %s1849_s1, 4  ;;  %s1376_s4 = int_to_ptr.vmem [resolvable:$true] %s1375_s4 }
  0x7f   :  { %1046 = vmatpush1.bf16.msra.mxu1 %v1773_v20  ;;  %s1823_s16 = scalar_lea.vmem %s1376_s4, 32  ;;  %p1828_p1 = scmp.lt.s32.totalorder %s1376_s4, %s1376_s4 }
  0x80   :  { %1128 = vmatpush1.bf16.msra.mxu0 %v1776_v21  ;;  %1545 = vmatprep.subr.bf16.mxu1 %v1803_v41  ;;  %p1824_p0 = scmp.ne.s32.totalorder %s1376_s4, %s1823_s16  ;;  %p1829_p2 = scmp.lt.s32.totalorder %s1823_s16, %s1823_s16 }
  0x81   :  { %1138 = vmatprep.subr.bf16.mxu0 %v1781_v22 }
  0x82   :  { %1048 = vmatmul.mubr.bf16.vlgmr.msra.gmra.mrb[0].mxu1 %v227_v23  ;;  %p1830_p3 = por %p1829_p2, %p1828_p1 }
  0x83   :  { %1130 = vmatmul.mubr.bf16.vlgmr.msra.gmra.mrb[0].mxu0 %v228_v24  ;;  %1546 = vmatpush3.bf16.msra.mxu1 %v1804_v43 }
  0x84   :  { %1139 = vmatpush1.bf16.msra.mxu0 %v1779_v25  ;;  %1170 = vmatprep.mubr.bf16.mxu0 %v1848_v27  ;;  %p1831_p4 = pnand %p1830_p3, %p1824_p0 }
  0x85   :  { %1140 = vmatprep.subr.bf16.mxu0 %v1784_v26  ;;  %1547 = vmatprep.subr.bf16.mxu1 %v1805_v44 }
  0x87   :  { %1548 = vmatpush3.bf16.msra.mxu1 %v1806_v49 }
  0x88   :  { %1141 = vmatpush1.bf16.msra.mxu0 %v1782_v17  ;;  %1549 = vmatprep.subr.bf16.mxu1 %v1807_v45 }
  0x89   :  { %1142 = vmatprep.subr.bf16.mxu0 %v1787_v18 }
  0x8b   :  { %1550 = vmatpush3.bf16.msra.mxu1 %v1808_v46 }
  0x8c   :  { %1143 = vmatpush1.bf16.msra.mxu0 %v1785_v28  ;;  %1551 = vmatprep.subr.bf16.mxu1 %v1809_v47 }
  0x8d   :  { %1144 = vmatprep.subr.bf16.mxu0 %v1790_v29 }
  0x8f   :  { %1552 = vmatpush3.bf16.msra.mxu1 %v1810_v48 }
  0x90   :  { %1145 = vmatpush1.bf16.msra.mxu0 %v1788_v30  ;;  %1553 = vmatprep.subr.bf16.mxu1 %v1811_v50 }
  0x91   :  { %1146 = vmatprep.subr.bf16.mxu0 %v1793_v31 }
  0x93   :  { %1554 = vmatpush3.bf16.msra.mxu1 %v1812_v51 }
  0x94   :  { %1147 = vmatpush1.bf16.msra.mxu0 %v1791_v32  ;;  %1555 = vmatprep.subr.bf16.mxu1 %v1813_v52 }
  0x95   :  { %1148 = vmatprep.subr.bf16.mxu0 %v1796_v33 }
  0x97   :  { %1556 = vmatpush3.bf16.msra.mxu1 %v1814_v53 }
  0x98   :  { %1149 = vmatpush1.bf16.msra.mxu0 %v1794_v34  ;;  %1557 = vmatprep.subr.bf16.mxu1 %v1815_v54 }
  0x99   :  { %1150 = vmatprep.subr.bf16.mxu0 %v1799_v35 }
  0x9b   :  { %1558 = vmatpush3.bf16.msra.mxu1 %v1816_v55 }
  0x9c   :  { %1151 = vmatpush1.bf16.msra.mxu0 %v1797_v36  ;;  %1559 = vmatprep.subr.bf16.mxu1 %v1817_v56 }
  0x9d   :  { %1152 = vmatprep.subr.bf16.mxu0 %v1802_v37 }
  0x9f   :  { %1560 = vmatpush3.bf16.msra.mxu1 %v1818_v57 }
  0xa0   :  { %1153 = vmatpush1.bf16.msra.mxu0 %v1800_v38 }
  0xa3   :  { %1171 = vmatmul.mubr.bf16.vlgmr.msra.gmra.mrb[0].mxu0 %v244_v40 }
 0x155   :  { %v1049_v58 = vpop.f32.mrb[0].mxu1 }
 0x156   :  { %v1051_v59 = vpop.f32.mrb[1].mxu1  ;;  %v1567_v3 = vadd.f32 %v1049_v58, %v173_v1 }
 0x157   :  { %v1053_v60 = vpop.f32.mrb[2].mxu1  ;;  %v1569_v4 = vadd.f32 %v1051_v59, %v177_v2 }
 0x158   :  { %v1054_v61 = vpop.f32.mrb[3].mxu1 }
 0x176   :  { %v1172_v5 = vpop.f32.mrb[0].mxu0 }
 0x177   :  { %v1568_v6 = vadd.f32 %v1567_v3, %v1172_v5  ;;  %v1174_v7 = vpop.f32.mrb[1].mxu0 }
 0x178   :  { %v1570_v8 = vadd.f32 %v1569_v4, %v1174_v7  ;;  %v1176_v9 = vpop.f32.mrb[2].mxu0 }
 0x179   :  { %v1177_v10 = vpop.f32.mrb[3].mxu0  ;;  %v1179_v12 = vpack.c.bf16 %v1568_v6, %v1568_v6 }
 0x17a   :  { %v1180_v11 = vpack.c.bf16 %v1570_v8, %v1570_v8 }
 0x17c   :  { %1348 = vmatprep.mubr.bf16.mxu1 %v1180_v11 }
 0x17d   :  { %1349 = vmatmul.mubr.bf16.vlgmr.msra.gmra.mrb[4].mxu1 %v1179_v12 }
 0x250   :  { %v1561_v13 = vpop.f32.mrb[4].mxu1 }
 0x251   :  { %v1562_v14 = vpop.f32.mrb[5].mxu1 }
 0x252   :  { %v1563_v15 = vadd.f32 %v1562_v14, %v1561_v13  ;;  %v1564_v16 = vpop.f32.mrb[6].mxu1 }
 0x253   :  { %v1565_v19 = vpop.f32.mrb[7].mxu1 }
 0x254   :  { %v1351_v20 = vadd.f32 %v1563_v15, %v1528_v42 }
 0x256   :  { %v1357_v21 = vsel %vm1356_vm0, %v1351_v20, -inf }
 0x257   :  { %1358 = vmax.xlane.f32.xlu0 %v1357_v21 }
 0x2e4   :  { %v1359_v22 = vpop.xlane.xlu0 %1358 }
 0x2e5   :  { %v1360_v23 = vsub.f32 %v1351_v20, %v1359_v22 }
 0x2e7   :  { %v1361_v24 = vmul.f32 1.442695, %v1360_v23 }
 0x2e9   :  { %1819 = vpow2.f32 %v1361_v24 }
 0x2f3   :  { %v1820_v25 = vpop.eup %1819 }
 0x2f4   :  { %v1363_v26 = vsel %vm1356_vm0, %v1820_v25, 0.0 }
 0x2f5   :  { %1364 = vadd.xlane.f32.xlu0 %v1363_v26 }
 0x382   :  { %v1365_v17 = vpop.xlane.xlu0 %1364 }
 0x383   :  { %1821 = vrcp.f32 %v1365_v17 }
 0x38d   :  { %v1822_v27 = vpop.eup %1821 }
 0x38e   :  { %v1367_v18 = vmul.f32 %v1822_v27, %v1820_v25 }
 0x390   :  { %1368 = vst.msk [vmem:[#allocation2] sm:$0x3] %vm1356_vm0, %v1367_v18 }
 0x391   :  { %1834 = shalt.err (!%p1831_p4)
}
 0x392   :  { %s1835_s19 = scalar_lea.hbm %s2416_s5, 32 }
 0x393   :  { %p1836_p5 = scmp.ne.s32.totalorder %s2416_s5, %s1835_s19  ;;  %p1839_p6 = scmp.lt.u32.totalorder %s1835_s19, %s2416_s5 }
 0x395   :  { %p1841_p7 = pnand %p1839_p6, %p1836_p5 }
 0x397   :  { %1844 = shalt.err (!%p1841_p7)
}
 0x398   :  { %1378 = dma.vmem_to_hbm [thread:$0]  %s1376_s4, 32, %s2416_s5, [#allocation3]  }
 0x399   :  { %1845 = dma.done.wait [#allocation3], 32  }
 0x39a   :  { %1846 = vsyncadd [#allocation3], 4294967264 }
 0x39b   :  { %1382 = vsyncpa [#allocation3], 1 }

</bundles_post_ra>
